<compile_context>
chip_gen: v5e
topology: v5e:2x2
jax: 0.10.0
libtpu: 0.0.40
codegen_flags: <defaults>
</compile_context>

<pallas_src>
import jax
import jax.numpy as jnp
import numpy as np
from jax.experimental import pallas as pl
from jax.experimental.pallas import tpu as pltpu

BN_EPS = 1e-5


def _round_up(x, m):
    return ((x + m - 1) // m) * m


def _vmem_limit_bytes():
    # ~108 MiB on v5e/v6e (128 MiB physical), ~54 MiB on v7x (64 MiB physical);
    # conservative fallback if the hardware query is unavailable.
    try:
        cap = int(pltpu.get_tpu_info().vmem_capacity_bytes)
    except Exception:
        cap = 64 * 1024 * 1024
    return int(max(32 * 1024 * 1024, min(cap * 0.85, 112 * 1024 * 1024)))


# ----------------------------------------------------------------------------
# One-time weight packing (hoisted out of the per-forward path).
# ----------------------------------------------------------------------------
def prepare_params(params, compute_dtype=jnp.bfloat16):
    cdt = jnp.dtype(compute_dtype)
    sub = max(8, 32 // cdt.itemsize)             # sublane group: 8 f32 / 16 bf16

    up_w = params["up_w"]                        # (Cin, Ch, 2, 2) ConvTranspose2d
    cin, ch = up_w.shape[0], up_w.shape[1]
    # rows ordered (dj, di, co); cols = ci  ->  u = Wup @ x1_dilated
    wup = jnp.transpose(up_w, (3, 2, 1, 0)).reshape(4 * ch, cin).astype(cdt)
    bup = params["up_b"].reshape(ch, 1).astype(jnp.float32)

    def pack_conv(w):                            # torch Conv2d weight (Cout, C, 3, 3)
        cout, c = w.shape[0], w.shape[1]
        cg = _round_up(c, sub)                   # tile-aligned channel-group stride
        wp = jnp.zeros((cout, 9, cg), jnp.float32)
        wp = wp.at[:, :, :c].set(jnp.transpose(w, (0, 2, 3, 1)).reshape(cout, 9, c))
        return wp.reshape(cout, 9 * cg).astype(cdt)

    return {
        "up_w": wup, "up_b": bup,
        "c1_w": pack_conv(params["c1_w"]),
        "c1_b": params["c1_b"].reshape(-1, 1).astype(jnp.float32),
        "c2_w": pack_conv(params["c2_w"]),
        "c2_b": params["c2_b"].reshape(-1, 1).astype(jnp.float32),
    }


def _bn_scale_shift(stats, count):
    """stats: (B, C, 2) per-batch partial [sum, sum_sq] over H*W."""
    s = jnp.sum(stats, axis=0)
    mean = s[:, 0] / count
    var = jnp.maximum(s[:, 1] / count - mean * mean, 0.0)   # biased (train mode)
    # TODO(synk): centered / Welford accumulation if E[x^2]-E[x]^2 cancellation
    #             ever matters at production scale.
    scale = jax.lax.rsqrt(var + BN_EPS)
    shift = -mean * scale
    return scale.reshape(-1, 1), shift.reshape(-1, 1)


# ----------------------------------------------------------------------------
# Up.forward
# ----------------------------------------------------------------------------
@jax.jit
def up_forward(x1, x2, prep):
    """x1: (B, Cin, h1, w1) NCHW;  x2: (B, Cin//2, Hs, Ws) NCHW."""
    f32 = jnp.float32
    B, cin, h1, w1 = x1.shape
    _, cx2, Hs, Ws = x2.shape
    ch = prep["up_w"].shape[0] // 4              # ConvTranspose output channels
    ccat = cx2 + ch                              # DoubleConv input channels
    cout = prep["c1_b"].shape[0]
    CG1 = prep["c1_w"].shape[1] // 9             # padded channel-group strides
    CG2 = prep["c2_w"].shape[1] // 9
    cdt = prep["c1_w"].dtype                     # compute / storage dtype

    h1u, w1u = 2 * h1, 2 * w1
    HWu = h1u * w1u
    diffY, diffX = Hs - h1u, Ws - w1u
    if diffY < 0 or diffX < 0:
        # TODO(synk): negative pad (crop) branch of F.pad is not implemented.
        raise NotImplementedError("x2 spatial must be >= upsampled x1 spatial")
    padT, padL = diffY // 2, diffX // 2
    nopad = (diffY == 0 and diffX == 0)

    HW = Hs * Ws
    HALO = _round_up(Ws + 1, 128)                # lane-aligned left halo (>= 1 row)
    L = HALO + HW + Ws + 1                       # flat spatial + top/bottom halos

    # trace-time constants: column-validity masks for the dx = -1 / +1 taps
    q = np.arange(HW)
    colmask = jnp.asarray(
        np.stack([(q % Ws) != 0, (q % Ws) != (Ws - 1)]).astype(np.float32), dtype=cdt)

    # ConvTranspose2d(k=2,s=2) as one matmul: zero-dilate x1 (interior pad) so
    # every (di, dj) phase lands on even/even flat positions; phases are then
    # placed with cheap in-kernel column shifts (no scatter matmul needed).
    x1d = jax.lax.pad(x1, jnp.array(0, x1.dtype),
                      ((0, 0, 0), (0, 0, 0), (0, 1, 1), (0, 1, 1)))
    x1d = x1d.reshape(B, cin, HWu).astype(cdt)
    x2f = x2.reshape(B, cx2, HW).astype(cdt)     # free reshape; cast to compute dtype

    vmem_limit = _vmem_limit_bytes()

    # ---------------- shared in-kernel helpers ----------------
    def shift_cols(x, s):
        # result[:, p + s] = x[:, p]; the shifted-in columns only ever cover
        # structurally-zero phase positions, so zero-fill is exact.
        if s == 0:
            return x
        return jnp.concatenate(
            [jnp.zeros((x.shape[0], s), x.dtype), x[:, :x.shape[1] - s]], axis=1)

    def zero_static(p_ref, Cg, C):
        # Zero only what data never overwrites: halo columns + channel-pad rows.
        # Done every step (tiny) so the batch grid axis can stay "parallel".
        p_ref[:, 0:HALO] = jnp.zeros((Cg, HALO), p_ref.dtype)
        p_ref[:, HALO + HW:L] = jnp.zeros((Cg, L - HALO - HW), p_ref.dtype)
        if Cg > C:
            p_ref[C:Cg, HALO:HALO + HW] = jnp.zeros((Cg - C, HW), p_ref.dtype)

    def im2col_conv(p_ref, m_ref, wc_ref, bc_ref, mask_ref, Cg):
        # Build the (9*Cg, HW) im2col patch in VMEM, then ONE MXU matmul.
        t = 0
        for dy in (-1, 0, 1):
            for dx in (-1, 0, 1):
                start = HALO + dy * Ws + dx
                tap = p_ref[:, start:start + HW]
                if dx == -1:
                    tap = tap * mask_ref[0:1, :]
                elif dx == 1:
                    tap = tap * mask_ref[1:2, :]
                m_ref[t * Cg:(t + 1) * Cg, :] = tap
                t += 1
        return jnp.dot(wc_ref[...], m_ref[...],
                       preferred_element_type=f32) + bc_ref[...]

    def stats_of(z):                             # per-batch BN partials (f32)
        return jnp.concatenate([jnp.sum(z, axis=1, keepdims=True),
                                jnp.sum(z * z, axis=1, keepdims=True)], axis=1)

    # ---- kernel 1: ConvTranspose2d + pad + concat + conv1 + BN1 partials ----
    def kernel1(x1_ref, x2_ref, wup_ref, bup_ref, wc_ref, bc_ref, mask_ref,
                o_ref, stats_ref, p_ref, m_ref):
        zero_static(p_ref, CG1, ccat)
        # cat([x2, x1u], dim=channel): x2 -> channel rows [0, cx2)
        p_ref[0:cx2, HALO:HALO + HW] = x2_ref[0]
        # up-conv: one matmul over the dilated x1; three column shifts place the
        # (di, dj) phases; bias added once on the combined plane.
        u = jnp.dot(wup_ref[...], x1_ref[0], preferred_element_type=f32)
        up = (u[0:ch]
              + shift_cols(u[2 * ch:3 * ch], 1)
              + shift_cols(u[ch:2 * ch], w1u)
              + shift_cols(u[3 * ch:4 * ch], w1u + 1)
              + bup_ref[...])
        if nopad:                                # one lane-dense store
            p_ref[cx2:ccat, HALO:HALO + HW] = up.astype(p_ref.dtype)
        else:
            # TODO(synk): padded placement falls back to per-row stores.
            p_ref[cx2:ccat, HALO:HALO + HW] = jnp.zeros((ch, HW), p_ref.dtype)
            for rr in range(h1u):
                col = HALO + (rr + padT) * Ws + padL
                p_ref[cx2:ccat, col:col + w1u] = (
                    up[:, rr * w1u:(rr + 1) * w1u].astype(p_ref.dtype))
        z = im2col_conv(p_ref, m_ref, wc_ref, bc_ref, mask_ref, CG1)
        o_ref[0] = z.astype(o_ref.dtype)
        stats_ref[0] = stats_of(z)

    # ---- kernel 2: BN1+ReLU prologue + conv2 + BN2 partials ----
    def kernel2(z1_ref, sc_ref, sh_ref, wc_ref, bc_ref, mask_ref,
                o_ref, stats_ref, p_ref, m_ref):
        zero_static(p_ref, CG2, cout)
        a = jnp.maximum(z1_ref[0].astype(f32) * sc_ref[...] + sh_ref[...], 0.0)
        p_ref[0:cout, HALO:HALO + HW] = a.astype(p_ref.dtype)
        z = im2col_conv(p_ref, m_ref, wc_ref, bc_ref, mask_ref, CG2)
        o_ref[0] = z.astype(o_ref.dtype)
        stats_ref[0] = stats_of(z)

    # ---- kernel 3: final BN2 + ReLU (elementwise, lane-dense) ----
    def kernel3(z_ref, sc_ref, sh_ref, o_ref):
        o_ref[0] = jnp.maximum(z_ref[0].astype(f32) * sc_ref[...] + sh_ref[...], 0.0)

    full2 = lambda b: (0, 0)
    batch3 = lambda b: (b, 0, 0)

    z1, st1 = pl.pallas_call(
        kernel1,
        out_shape=(jax.ShapeDtypeStruct((B, cout, HW), cdt),
                   jax.ShapeDtypeStruct((B, cout, 2), f32)),
        grid_spec=pltpu.PrefetchScalarGridSpec(
            num_scalar_prefetch=0, grid=(B,),
            in_specs=[
                pl.BlockSpec((1, cin, HWu), batch3),
                pl.BlockSpec((1, cx2, HW), batch3),
                pl.BlockSpec((4 * ch, cin), full2),
                pl.BlockSpec((ch, 1), full2),
                pl.BlockSpec((cout, 9 * CG1), full2),
                pl.BlockSpec((cout, 1), full2),
                pl.BlockSpec((2, HW), full2),
            ],
            out_specs=[pl.BlockSpec((1, cout, HW), batch3),
                       pl.BlockSpec((1, cout, 2), batch3)],
            scratch_shapes=[pltpu.VMEM((CG1, L), cdt),
                            pltpu.VMEM((9 * CG1, HW), cdt)],
        ),
        compiler_params=pltpu.CompilerParams(
            dimension_semantics=("parallel",),
            vmem_limit_bytes=vmem_limit),
    )(x1d, x2f, prep["up_w"], prep["up_b"], prep["c1_w"], prep["c1_b"], colmask)

    scale1, shift1 = _bn_scale_shift(st1, float(B * HW))

    z2, st2 = pl.pallas_call(
        kernel2,
        out_shape=(jax.ShapeDtypeStruct((B, cout, HW), cdt),
                   jax.ShapeDtypeStruct((B, cout, 2), f32)),
        grid_spec=pltpu.PrefetchScalarGridSpec(
            num_scalar_prefetch=0, grid=(B,),
            in_specs=[
                pl.BlockSpec((1, cout, HW), batch3),
                pl.BlockSpec((cout, 1), full2),
                pl.BlockSpec((cout, 1), full2),
                pl.BlockSpec((cout, 9 * CG2), full2),
                pl.BlockSpec((cout, 1), full2),
                pl.BlockSpec((2, HW), full2),
            ],
            out_specs=[pl.BlockSpec((1, cout, HW), batch3),
                       pl.BlockSpec((1, cout, 2), batch3)],
            scratch_shapes=[pltpu.VMEM((CG2, L), cdt),
                            pltpu.VMEM((9 * CG2, HW), cdt)],
        ),
        compiler_params=pltpu.CompilerParams(
            dimension_semantics=("parallel",),
            vmem_limit_bytes=vmem_limit),
    )(z1, scale1, shift1, prep["c2_w"], prep["c2_b"], colmask)

    scale2, shift2 = _bn_scale_shift(st2, float(B * HW))

    out = pl.pallas_call(
        kernel3,
        out_shape=jax.ShapeDtypeStruct((B, cout, HW), f32),
        grid_spec=pltpu.PrefetchScalarGridSpec(
            num_scalar_prefetch=0, grid=(B,),
            in_specs=[pl.BlockSpec((1, cout, HW), batch3),
                      pl.BlockSpec((cout, 1), full2),
                      pl.BlockSpec((cout, 1), full2)],
            out_specs=pl.BlockSpec((1, cout, HW), batch3),
        ),
        compiler_params=pltpu.CompilerParams(
            dimension_semantics=("parallel",),
            vmem_limit_bytes=vmem_limit),
    )(z2, scale2, shift2)

    return out.reshape(B, cout, Hs, Ws)              # planar layout == NCHW, free


# ----------------------------------------------------------------------------
# Pure-JAX reference (same math, independent implementation).
# ----------------------------------------------------------------------------
def ref_up(x1, x2, params):
    y = jnp.einsum("nchw,cokl->nohwkl", x1, params["up_w"])
    B, ch, hh, ww = y.shape[:4]
    y = jnp.transpose(y, (0, 1, 2, 4, 3, 5)).reshape(B, ch, 2 * hh, 2 * ww)
    y = y + params["up_b"][None, :, None, None]
    dY = x2.shape[2] - y.shape[2]
    dX = x2.shape[3] - y.shape[3]
    y = jnp.pad(y, ((0, 0), (0, 0), (dY // 2, dY - dY // 2), (dX // 2, dX - dX // 2)))
    x = jnp.concatenate([x2, y], axis=1)

    def conv_bn_relu(x, w, b):
        z = jax.lax.conv_general_dilated(
            x, w, (1, 1), "SAME", dimension_numbers=("NCHW", "OIHW", "NCHW")
        ) + b[None, :, None, None]
        m = z.mean(axis=(0, 2, 3), keepdims=True)
        v = ((z - m) ** 2).mean(axis=(0, 2, 3), keepdims=True)
        return jnp.maximum((z - m) * jax.lax.rsqrt(v + BN_EPS), 0.0)

    x = conv_bn_relu(x, params["c1_w"], params["c1_b"])
    x = conv_bn_relu(x, params["c2_w"], params["c2_b"])
    return x


if __name__ == "__main__":
    B = 2
    in_channels = 8          # Up(in_channels=8, out_channels=4)
    out_channels = 4
    h1 = w1 = 16             # x1 spatial; x2 spatial = 32 x 32

    key = jax.random.PRNGKey(0)
    k = jax.random.split(key, 8)

    x1 = jax.random.normal(k[0], (B, in_channels, h1, w1), jnp.float32)
    x2 = jax.random.normal(k[1], (B, in_channels // 2, 2 * h1, 2 * w1), jnp.float32)

    params = {
        # ConvTranspose2d(in, in//2, 2, 2): weight (in, in//2, 2, 2), bias (in//2,)
        "up_w": 0.1 * jax.random.normal(k[2], (in_channels, in_channels // 2, 2, 2), jnp.float32),
        "up_b": 0.1 * jax.random.normal(k[3], (in_channels // 2,), jnp.float32),
        # Conv2d(in, out, 3, padding=1)
        "c1_w": 0.1 * jax.random.normal(k[4], (out_channels, in_channels, 3, 3), jnp.float32),
        "c1_b": 0.1 * jax.random.normal(k[5], (out_channels,), jnp.float32),
        # Conv2d(out, out, 3, padding=1)
        "c2_w": 0.1 * jax.random.normal(k[6], (out_channels, out_channels, 3, 3), jnp.float32),
        "c2_b": 0.1 * jax.random.normal(k[7], (out_channels,), jnp.float32),
    }

    ref = jax.block_until_ready(ref_up(x1, x2, params))

    # f32 operands end-to-end: tight check against the pure-JAX reference.
    out_f32 = jax.block_until_ready(up_forward(x1, x2, prepare_params(params, jnp.float32)))
    assert out_f32.shape == (B, out_channels, 2 * h1, 2 * w1), out_f32.shape
    np.testing.assert_allclose(np.asarray(out_f32), np.asarray(ref), rtol=1e-4, atol=1e-4)

    # bf16 operands / intermediates (f32 accumulation & BN): bandwidth-optimized path.
    out_bf16 = jax.block_until_ready(up_forward(x1, x2, prepare_params(params, jnp.bfloat16)))
    np.testing.assert_allclose(np.asarray(out_bf16), np.asarray(ref), rtol=1e-1, atol=1e-1)

    print("KERNEL_OK")
</pallas_src>

<mosaic_0001>
module attributes {stable_mosaic.version = 11 : i64} {
  func.func @kernel1(%arg0: i32, %arg1: memref<1x8x1024xf32, #tpu.memory_space<vmem>>, %arg2: memref<1x4x1024xf32, #tpu.memory_space<vmem>>, %arg3: memref<16x8xf32, #tpu.memory_space<vmem>>, %arg4: memref<4x1xf32, #tpu.memory_space<vmem>>, %arg5: memref<4x72xf32, #tpu.memory_space<vmem>>, %arg6: memref<4x1xf32, #tpu.memory_space<vmem>>, %arg7: memref<2x1024xf32, #tpu.memory_space<vmem>>, %arg8: memref<1x4x1024xf32, #tpu.memory_space<vmem>>, %arg9: memref<1x4x2xf32, #tpu.memory_space<vmem>>, %arg10: memref<8x1185xf32, #tpu.memory_space<vmem>>, %arg11: memref<72x1024xf32, #tpu.memory_space<vmem>>) attributes {dimension_semantics = [#tpu.dimension_semantics<parallel>], iteration_bounds = array<i64: 2>, scalar_prefetch = 0 : i64, scratch_operands = 2 : i64, tpu.core_type = #tpu.core_type<tc>, window_params = [{transform_indices = @transform_0, window_bounds = array<i64: 1, 8, 1024>}, {transform_indices = @transform_1, window_bounds = array<i64: 1, 4, 1024>}, {pipeline_mode = #tpu.pipeline_mode<synchronous>, transform_indices = @transform_2, window_bounds = array<i64: 16, 8>}, {pipeline_mode = #tpu.pipeline_mode<synchronous>, transform_indices = @transform_3, window_bounds = array<i64: 4, 1>}, {pipeline_mode = #tpu.pipeline_mode<synchronous>, transform_indices = @transform_4, window_bounds = array<i64: 4, 72>}, {pipeline_mode = #tpu.pipeline_mode<synchronous>, transform_indices = @transform_5, window_bounds = array<i64: 4, 1>}, {pipeline_mode = #tpu.pipeline_mode<synchronous>, transform_indices = @transform_6, window_bounds = array<i64: 2, 1024>}, {transform_indices = @transform_7, window_bounds = array<i64: 1, 4, 1024>}, {transform_indices = @transform_8, window_bounds = array<i64: 1, 4, 2>}]} {
    %cst = arith.constant 0.000000e+00 : f32
    %0 = vector.broadcast %cst : f32 to vector<8x128xf32>
    %c0 = arith.constant 0 : index
    %c0_0 = arith.constant 0 : index
    %1 = vector.load %arg10[%c0, %c0_0] : memref<8x1185xf32, #tpu.memory_space<vmem>>, vector<8x128xf32>
    tpu.vector_store %arg10[%c0, %c0_0], %0 {strides = array<i32>} : memref<8x1185xf32, #tpu.memory_space<vmem>>, vector<8x128xf32>,
    %cst_1 = arith.constant 0.000000e+00 : f32
    %2 = vector.broadcast %cst_1 : f32 to vector<8x33xf32>
    %c0_2 = arith.constant 0 : index
    %c1152 = arith.constant 1152 : index
    %3 = vector.load %arg10[%c0_2, %c1152] : memref<8x1185xf32, #tpu.memory_space<vmem>>, vector<8x33xf32>
    tpu.vector_store %arg10[%c0_2, %c1152], %2 {strides = array<i32>} : memref<8x1185xf32, #tpu.memory_space<vmem>>, vector<8x33xf32>,
    %c0_3 = arith.constant 0 : index
    %c0_4 = arith.constant 0 : index
    %c0_5 = arith.constant 0 : index
    %4 = vector.load %arg2[%c0_3, %c0_4, %c0_5] : memref<1x4x1024xf32, #tpu.memory_space<vmem>>, vector<1x4x1024xf32>
    %5 = vector.shape_cast %4 : vector<1x4x1024xf32> to vector<4x1024xf32>
    %c0_6 = arith.constant 0 : index
    %c128 = arith.constant 128 : index
    %6 = vector.load %arg10[%c0_6, %c128] : memref<8x1185xf32, #tpu.memory_space<vmem>>, vector<4x1024xf32>
    tpu.vector_store %arg10[%c0_6, %c128], %5 {strides = array<i32>} : memref<8x1185xf32, #tpu.memory_space<vmem>>, vector<4x1024xf32>,
    %c0_7 = arith.constant 0 : index
    %c0_8 = arith.constant 0 : index
    %7 = vector.load %arg3[%c0_7, %c0_8] : memref<16x8xf32, #tpu.memory_space<vmem>>, vector<16x8xf32>
    %c0_9 = arith.constant 0 : index
    %c0_10 = arith.constant 0 : index
    %c0_11 = arith.constant 0 : index
    %8 = vector.load %arg1[%c0_9, %c0_10, %c0_11] : memref<1x8x1024xf32, #tpu.memory_space<vmem>>, vector<1x8x1024xf32>
    %9 = vector.shape_cast %8 : vector<1x8x1024xf32> to vector<8x1024xf32>
    %cst_12 = arith.constant dense<0.000000e+00> : vector<16x1024xf32>
    %10 = tpu.matmul %7, %9, %cst_12 {dimension_numbers = #tpu.dot_dimension_numbers<[1], [0], [0], [1], [0, 0, 1, 1], [], []>} : vector<16x8xf32>, vector<8x1024xf32>, vector<16x1024xf32> -> vector<16x1024xf32>
    %11 = vector.extract_strided_slice %10 {offsets = [0, 0], sizes = [4, 1024], strides = [1, 1]} : vector<16x1024xf32> to vector<4x1024xf32>
    %12 = vector.extract_strided_slice %10 {offsets = [8, 0], sizes = [4, 1024], strides = [1, 1]} : vector<16x1024xf32> to vector<4x1024xf32>
    %cst_13 = arith.constant 0.000000e+00 : f32
    %13 = vector.broadcast %cst_13 : f32 to vector<4x1xf32>
    %14 = vector.extract_strided_slice %12 {offsets = [0, 0], sizes = [4, 1023], strides = [1, 1]} : vector<4x1024xf32> to vector<4x1023xf32>
    %15 = tpu.concatenate %13, %14 in 1 : vector<4x1xf32>, vector<4x1023xf32> -> vector<4x1024xf32>
    %16 = arith.addf %11, %15 : vector<4x1024xf32>
    %17 = vector.extract_strided_slice %10 {offsets = [4, 0], sizes = [4, 1024], strides = [1, 1]} : vector<16x1024xf32> to vector<4x1024xf32>
    %cst_14 = arith.constant 0.000000e+00 : f32
    %18 = vector.broadcast %cst_14 : f32 to vector<4x32xf32>
    %19 = vector.extract_strided_slice %17 {offsets = [0, 0], sizes = [4, 992], strides = [1, 1]} : vector<4x1024xf32> to vector<4x992xf32>
    %20 = tpu.concatenate %18, %19 in 1 : vector<4x32xf32>, vector<4x992xf32> -> vector<4x1024xf32>
    %21 = arith.addf %16, %20 : vector<4x1024xf32>
    %22 = vector.extract_strided_slice %10 {offsets = [12, 0], sizes = [4, 1024], strides = [1, 1]} : vector<16x1024xf32> to vector<4x1024xf32>
    %cst_15 = arith.constant 0.000000e+00 : f32
    %23 = vector.broadcast %cst_15 : f32 to vector<4x33xf32>
    %24 = vector.extract_strided_slice %22 {offsets = [0, 0], sizes = [4, 991], strides = [1, 1]} : vector<4x1024xf32> to vector<4x991xf32>
    %25 = tpu.concatenate %23, %24 in 1 : vector<4x33xf32>, vector<4x991xf32> -> vector<4x1024xf32>
    %26 = arith.addf %21, %25 : vector<4x1024xf32>
    %c0_16 = arith.constant 0 : index
    %c0_17 = arith.constant 0 : index
    %27 = vector.load %arg4[%c0_16, %c0_17] : memref<4x1xf32, #tpu.memory_space<vmem>>, vector<4x1xf32>
    %28 = vector.broadcast %27 : vector<4x1xf32> to vector<4x1024xf32>
    %29 = arith.addf %26, %28 : vector<4x1024xf32>
    %c4 = arith.constant 4 : index
    %c128_18 = arith.constant 128 : index
    %30 = vector.load %arg10[%c4, %c128_18] : memref<8x1185xf32, #tpu.memory_space<vmem>>, vector<4x1024xf32>
    tpu.vector_store %arg10[%c4, %c128_18], %29 {strides = array<i32>} : memref<8x1185xf32, #tpu.memory_space<vmem>>, vector<4x1024xf32>,
    %c0_19 = arith.constant 0 : index
    %c95 = arith.constant 95 : index
    %31 = vector.load %arg10[%c0_19, %c95] : memref<8x1185xf32, #tpu.memory_space<vmem>>, vector<8x1024xf32>
    %c0_20 = arith.constant 0 : index
    %c0_21 = arith.constant 0 : index
    %32 = vector.load %arg7[%c0_20, %c0_21] : memref<2x1024xf32, #tpu.memory_space<vmem>>, vector<1x1024xf32>
    %33 = vector.broadcast %32 : vector<1x1024xf32> to vector<8x1024xf32>
    %34 = arith.mulf %31, %33 : vector<8x1024xf32>
    %c0_22 = arith.constant 0 : index
    %c0_23 = arith.constant 0 : index
    %35 = vector.load %arg11[%c0_22, %c0_23] : memref<72x1024xf32, #tpu.memory_space<vmem>>, vector<8x1024xf32>
    tpu.vector_store %arg11[%c0_22, %c0_23], %34 {strides = array<i32>} : memref<72x1024xf32, #tpu.memory_space<vmem>>, vector<8x1024xf32>,
    %c0_24 = arith.constant 0 : index
    %c96 = arith.constant 96 : index
    %36 = vector.load %arg10[%c0_24, %c96] : memref<8x1185xf32, #tpu.memory_space<vmem>>, vector<8x1024xf32>
    %c8 = arith.constant 8 : index
    %c0_25 = arith.constant 0 : index
    %37 = vector.load %arg11[%c8, %c0_25] : memref<72x1024xf32, #tpu.memory_space<vmem>>, vector<8x1024xf32>
    tpu.vector_store %arg11[%c8, %c0_25], %36 {strides = array<i32>} : memref<72x1024xf32, #tpu.memory_space<vmem>>, vector<8x1024xf32>,
    %c0_26 = arith.constant 0 : index
    %c97 = arith.constant 97 : index
    %38 = vector.load %arg10[%c0_26, %c97] : memref<8x1185xf32, #tpu.memory_space<vmem>>, vector<8x1024xf32>
    %c1 = arith.constant 1 : index
    %c0_27 = arith.constant 0 : index
    %39 = vector.load %arg7[%c1, %c0_27] : memref<2x1024xf32, #tpu.memory_space<vmem>>, vector<1x1024xf32>
    %40 = vector.broadcast %39 : vector<1x1024xf32> to vector<8x1024xf32>
    %41 = arith.mulf %38, %40 : vector<8x1024xf32>
    %c16 = arith.constant 16 : index
    %c0_28 = arith.constant 0 : index
    %42 = vector.load %arg11[%c16, %c0_28] : memref<72x1024xf32, #tpu.memory_space<vmem>>, vector<8x1024xf32>
    tpu.vector_store %arg11[%c16, %c0_28], %41 {strides = array<i32>} : memref<72x1024xf32, #tpu.memory_space<vmem>>, vector<8x1024xf32>,
    %c0_29 = arith.constant 0 : index
    %c127 = arith.constant 127 : index
    %43 = vector.load %arg10[%c0_29, %c127] : memref<8x1185xf32, #tpu.memory_space<vmem>>, vector<8x1024xf32>
    %c0_30 = arith.constant 0 : index
    %c0_31 = arith.constant 0 : index
    %44 = vector.load %arg7[%c0_30, %c0_31] : memref<2x1024xf32, #tpu.memory_space<vmem>>, vector<1x1024xf32>
    %45 = vector.broadcast %44 : vector<1x1024xf32> to vector<8x1024xf32>
    %46 = arith.mulf %43, %45 : vector<8x1024xf32>
    %c24 = arith.constant 24 : index
    %c0_32 = arith.constant 0 : index
    %47 = vector.load %arg11[%c24, %c0_32] : memref<72x1024xf32, #tpu.memory_space<vmem>>, vector<8x1024xf32>
    tpu.vector_store %arg11[%c24, %c0_32], %46 {strides = array<i32>} : memref<72x1024xf32, #tpu.memory_space<vmem>>, vector<8x1024xf32>,
    %c0_33 = arith.constant 0 : index
    %c128_34 = arith.constant 128 : index
    %48 = vector.load %arg10[%c0_33, %c128_34] : memref<8x1185xf32, #tpu.memory_space<vmem>>, vector<8x1024xf32>
    %c32 = arith.constant 32 : index
    %c0_35 = arith.constant 0 : index
    %49 = vector.load %arg11[%c32, %c0_35] : memref<72x1024xf32, #tpu.memory_space<vmem>>, vector<8x1024xf32>
    tpu.vector_store %arg11[%c32, %c0_35], %48 {strides = array<i32>} : memref<72x1024xf32, #tpu.memory_space<vmem>>, vector<8x1024xf32>,
    %c0_36 = arith.constant 0 : index
    %c129 = arith.constant 129 : index
    %50 = vector.load %arg10[%c0_36, %c129] : memref<8x1185xf32, #tpu.memory_space<vmem>>, vector<8x1024xf32>
    %c1_37 = arith.constant 1 : index
    %c0_38 = arith.constant 0 : index
    %51 = vector.load %arg7[%c1_37, %c0_38] : memref<2x1024xf32, #tpu.memory_space<vmem>>, vector<1x1024xf32>
    %52 = vector.broadcast %51 : vector<1x1024xf32> to vector<8x1024xf32>
    %53 = arith.mulf %50, %52 : vector<8x1024xf32>
    %c40 = arith.constant 40 : index
    %c0_39 = arith.constant 0 : index
    %54 = vector.load %arg11[%c40, %c0_39] : memref<72x1024xf32, #tpu.memory_space<vmem>>, vector<8x1024xf32>
    tpu.vector_store %arg11[%c40, %c0_39], %53 {strides = array<i32>} : memref<72x1024xf32, #tpu.memory_space<vmem>>, vector<8x1024xf32>,
    %c0_40 = arith.constant 0 : index
    %c159 = arith.constant 159 : index
    %55 = vector.load %arg10[%c0_40, %c159] : memref<8x1185xf32, #tpu.memory_space<vmem>>, vector<8x1024xf32>
    %c0_41 = arith.constant 0 : index
    %c0_42 = arith.constant 0 : index
    %56 = vector.load %arg7[%c0_41, %c0_42] : memref<2x1024xf32, #tpu.memory_space<vmem>>, vector<1x1024xf32>
    %57 = vector.broadcast %56 : vector<1x1024xf32> to vector<8x1024xf32>
    %58 = arith.mulf %55, %57 : vector<8x1024xf32>
    %c48 = arith.constant 48 : index
    %c0_43 = arith.constant 0 : index
    %59 = vector.load %arg11[%c48, %c0_43] : memref<72x1024xf32, #tpu.memory_space<vmem>>, vector<8x1024xf32>
    tpu.vector_store %arg11[%c48, %c0_43], %58 {strides = array<i32>} : memref<72x1024xf32, #tpu.memory_space<vmem>>, vector<8x1024xf32>,
    %c0_44 = arith.constant 0 : index
    %c160 = arith.constant 160 : index
    %60 = vector.load %arg10[%c0_44, %c160] : memref<8x1185xf32, #tpu.memory_space<vmem>>, vector<8x1024xf32>
    %c56 = arith.constant 56 : index
    %c0_45 = arith.constant 0 : index
    %61 = vector.load %arg11[%c56, %c0_45] : memref<72x1024xf32, #tpu.memory_space<vmem>>, vector<8x1024xf32>
    tpu.vector_store %arg11[%c56, %c0_45], %60 {strides = array<i32>} : memref<72x1024xf32, #tpu.memory_space<vmem>>, vector<8x1024xf32>,
    %c0_46 = arith.constant 0 : index
    %c161 = arith.constant 161 : index
    %62 = vector.load %arg10[%c0_46, %c161] : memref<8x1185xf32, #tpu.memory_space<vmem>>, vector<8x1024xf32>
    %c1_47 = arith.constant 1 : index
    %c0_48 = arith.constant 0 : index
    %63 = vector.load %arg7[%c1_47, %c0_48] : memref<2x1024xf32, #tpu.memory_space<vmem>>, vector<1x1024xf32>
    %64 = vector.broadcast %63 : vector<1x1024xf32> to vector<8x1024xf32>
    %65 = arith.mulf %62, %64 : vector<8x1024xf32>
    %c64 = arith.constant 64 : index
    %c0_49 = arith.constant 0 : index
    %66 = vector.load %arg11[%c64, %c0_49] : memref<72x1024xf32, #tpu.memory_space<vmem>>, vector<8x1024xf32>
    tpu.vector_store %arg11[%c64, %c0_49], %65 {strides = array<i32>} : memref<72x1024xf32, #tpu.memory_space<vmem>>, vector<8x1024xf32>,
    %c0_50 = arith.constant 0 : index
    %c0_51 = arith.constant 0 : index
    %67 = vector.load %arg5[%c0_50, %c0_51] : memref<4x72xf32, #tpu.memory_space<vmem>>, vector<4x72xf32>
    %c0_52 = arith.constant 0 : index
    %c0_53 = arith.constant 0 : index
    %68 = vector.load %arg11[%c0_52, %c0_53] : memref<72x1024xf32, #tpu.memory_space<vmem>>, vector<72x1024xf32>
    %cst_54 = arith.constant dense<0.000000e+00> : vector<4x1024xf32>
    %69 = tpu.matmul %67, %68, %cst_54 {dimension_numbers = #tpu.dot_dimension_numbers<[1], [0], [0], [1], [0, 0, 1, 1], [], []>} : vector<4x72xf32>, vector<72x1024xf32>, vector<4x1024xf32> -> vector<4x1024xf32>
    %c0_55 = arith.constant 0 : index
    %c0_56 = arith.constant 0 : index
    %70 = vector.load %arg6[%c0_55, %c0_56] : memref<4x1xf32, #tpu.memory_space<vmem>>, vector<4x1xf32>
    %71 = vector.broadcast %70 : vector<4x1xf32> to vector<4x1024xf32>
    %72 = arith.addf %69, %71 : vector<4x1024xf32>
    %c0_57 = arith.constant 0 : index
    %c0_58 = arith.constant 0 : index
    %c0_59 = arith.constant 0 : index
    %73 = vector.load %arg8[%c0_57, %c0_58, %c0_59] : memref<1x4x1024xf32, #tpu.memory_space<vmem>>, vector<1x4x1024xf32>
    %74 = vector.shape_cast %73 : vector<1x4x1024xf32> to vector<4x1024xf32>
    %75 = vector.shape_cast %72 : vector<4x1024xf32> to vector<1x4x1024xf32>
    tpu.vector_store %arg8[%c0_57, %c0_58, %c0_59], %75 {strides = array<i32>} : memref<1x4x1024xf32, #tpu.memory_space<vmem>>, vector<1x4x1024xf32>,
    %cst_60 = arith.constant dense<0.000000e+00> : vector<4xf32>
    %76 = vector.multi_reduction <add>, %72, %cst_60 [1] : vector<4x1024xf32> to vector<4xf32>
    %77 = vector.shape_cast %76 : vector<4xf32> to vector<4x1xf32>
    %78 = arith.mulf %72, %72 : vector<4x1024xf32>
    %cst_61 = arith.constant dense<0.000000e+00> : vector<4xf32>
    %79 = vector.multi_reduction <add>, %78, %cst_61 [1] : vector<4x1024xf32> to vector<4xf32>
    %80 = vector.shape_cast %79 : vector<4xf32> to vector<4x1xf32>
    %81 = tpu.concatenate %77, %80 in 1 : vector<4x1xf32>, vector<4x1xf32> -> vector<4x2xf32>
    %c0_62 = arith.constant 0 : index
    %c0_63 = arith.constant 0 : index
    %c0_64 = arith.constant 0 : index
    %82 = vector.load %arg9[%c0_62, %c0_63, %c0_64] : memref<1x4x2xf32, #tpu.memory_space<vmem>>, vector<1x4x2xf32>
    %83 = vector.shape_cast %82 : vector<1x4x2xf32> to vector<4x2xf32>
    %84 = vector.shape_cast %81 : vector<4x2xf32> to vector<1x4x2xf32>
    tpu.vector_store %arg9[%c0_62, %c0_63, %c0_64], %84 {strides = array<i32>} : memref<1x4x2xf32, #tpu.memory_space<vmem>>, vector<1x4x2xf32>,
    return
  }
  func.func @transform_0(%arg0: i32) -> (i32, i32, i32) {
    %c0_i32 = arith.constant 0 : i32
    %c0_i32_0 = arith.constant 0 : i32
    %c0_i32_1 = arith.constant 0 : i32
    return %arg0, %c0_i32, %c0_i32_0 : i32, i32, i32
  }
  func.func @transform_1(%arg0: i32) -> (i32, i32, i32) {
    %c0_i32 = arith.constant 0 : i32
    %c0_i32_0 = arith.constant 0 : i32
    %c0_i32_1 = arith.constant 0 : i32
    return %arg0, %c0_i32, %c0_i32_0 : i32, i32, i32
  }
  func.func @transform_2(%arg0: i32) -> (i32, i32) {
    %c0_i32 = arith.constant 0 : i32
    %c0_i32_0 = arith.constant 0 : i32
    %c0_i32_1 = arith.constant 0 : i32
    return %c0_i32, %c0_i32_0 : i32, i32
  }
  func.func @transform_3(%arg0: i32) -> (i32, i32) {
    %c0_i32 = arith.constant 0 : i32
    %c0_i32_0 = arith.constant 0 : i32
    %c0_i32_1 = arith.constant 0 : i32
    return %c0_i32, %c0_i32_0 : i32, i32
  }
  func.func @transform_4(%arg0: i32) -> (i32, i32) {
    %c0_i32 = arith.constant 0 : i32
    %c0_i32_0 = arith.constant 0 : i32
    %c0_i32_1 = arith.constant 0 : i32
    return %c0_i32, %c0_i32_0 : i32, i32
  }
  func.func @transform_5(%arg0: i32) -> (i32, i32) {
    %c0_i32 = arith.constant 0 : i32
    %c0_i32_0 = arith.constant 0 : i32
    %c0_i32_1 = arith.constant 0 : i32
    return %c0_i32, %c0_i32_0 : i32, i32
  }
  func.func @transform_6(%arg0: i32) -> (i32, i32) {
    %c0_i32 = arith.constant 0 : i32
    %c0_i32_0 = arith.constant 0 : i32
    %c0_i32_1 = arith.constant 0 : i32
    return %c0_i32, %c0_i32_0 : i32, i32
  }
  func.func @transform_7(%arg0: i32) -> (i32, i32, i32) {
    %c0_i32 = arith.constant 0 : i32
    %c0_i32_0 = arith.constant 0 : i32
    %c0_i32_1 = arith.constant 0 : i32
    return %arg0, %c0_i32, %c0_i32_0 : i32, i32, i32
  }
  func.func @transform_8(%arg0: i32) -> (i32, i32, i32) {
    %c0_i32 = arith.constant 0 : i32
    %c0_i32_0 = arith.constant 0 : i32
    %c0_i32_1 = arith.constant 0 : i32
    return %arg0, %c0_i32, %c0_i32_0 : i32, i32, i32
  }
}

module attributes {stable_mosaic.version = 11 : i64} {
  func.func @kernel3(%arg0: i32, %arg1: memref<1x4x1024xf32, #tpu.memory_space<vmem>>, %arg2: memref<4x1xf32, #tpu.memory_space<vmem>>, %arg3: memref<4x1xf32, #tpu.memory_space<vmem>>, %arg4: memref<1x4x1024xf32, #tpu.memory_space<vmem>>) attributes {dimension_semantics = [#tpu.dimension_semantics<parallel>], iteration_bounds = array<i64: 2>, scalar_prefetch = 0 : i64, scratch_operands = 0 : i64, tpu.core_type = #tpu.core_type<tc>, window_params = [{transform_indices = @transform_0, window_bounds = array<i64: 1, 4, 1024>}, {pipeline_mode = #tpu.pipeline_mode<synchronous>, transform_indices = @transform_1, window_bounds = array<i64: 4, 1>}, {pipeline_mode = #tpu.pipeline_mode<synchronous>, transform_indices = @transform_2, window_bounds = array<i64: 4, 1>}, {transform_indices = @transform_3, window_bounds = array<i64: 1, 4, 1024>}]} {
    %c0 = arith.constant 0 : index
    %c0_0 = arith.constant 0 : index
    %c0_1 = arith.constant 0 : index
    %0 = vector.load %arg1[%c0, %c0_0, %c0_1] : memref<1x4x1024xf32, #tpu.memory_space<vmem>>, vector<1x4x1024xf32>
    %1 = vector.shape_cast %0 : vector<1x4x1024xf32> to vector<4x1024xf32>
    %c0_2 = arith.constant 0 : index
    %c0_3 = arith.constant 0 : index
    %2 = vector.load %arg2[%c0_2, %c0_3] : memref<4x1xf32, #tpu.memory_space<vmem>>, vector<4x1xf32>
    %3 = vector.broadcast %2 : vector<4x1xf32> to vector<4x1024xf32>
    %4 = arith.mulf %1, %3 : vector<4x1024xf32>
    %c0_4 = arith.constant 0 : index
    %c0_5 = arith.constant 0 : index
    %5 = vector.load %arg3[%c0_4, %c0_5] : memref<4x1xf32, #tpu.memory_space<vmem>>, vector<4x1xf32>
    %6 = vector.broadcast %5 : vector<4x1xf32> to vector<4x1024xf32>
    %7 = arith.addf %4, %6 : vector<4x1024xf32>
    %cst = arith.constant 0.000000e+00 : f32
    %8 = vector.broadcast %cst : f32 to vector<4x1024xf32>
    %9 = arith.maximumf %7, %8 : vector<4x1024xf32>
    %c0_6 = arith.constant 0 : index
    %c0_7 = arith.constant 0 : index
    %c0_8 = arith.constant 0 : index
    %10 = vector.load %arg4[%c0_6, %c0_7, %c0_8] : memref<1x4x1024xf32, #tpu.memory_space<vmem>>, vector<1x4x1024xf32>
    %11 = vector.shape_cast %10 : vector<1x4x1024xf32> to vector<4x1024xf32>
    %12 = vector.shape_cast %9 : vector<4x1024xf32> to vector<1x4x1024xf32>
    tpu.vector_store %arg4[%c0_6, %c0_7, %c0_8], %12 {strides = array<i32>} : memref<1x4x1024xf32, #tpu.memory_space<vmem>>, vector<1x4x1024xf32>,
    return
  }
  func.func @transform_0(%arg0: i32) -> (i32, i32, i32) {
    %c0_i32 = arith.constant 0 : i32
    %c0_i32_0 = arith.constant 0 : i32
    %c0_i32_1 = arith.constant 0 : i32
    return %arg0, %c0_i32, %c0_i32_0 : i32, i32, i32
  }
  func.func @transform_1(%arg0: i32) -> (i32, i32) {
    %c0_i32 = arith.constant 0 : i32
    %c0_i32_0 = arith.constant 0 : i32
    %c0_i32_1 = arith.constant 0 : i32
    return %c0_i32, %c0_i32_0 : i32, i32
  }
  func.func @transform_2(%arg0: i32) -> (i32, i32) {
    %c0_i32 = arith.constant 0 : i32
    %c0_i32_0 = arith.constant 0 : i32
    %c0_i32_1 = arith.constant 0 : i32
    return %c0_i32, %c0_i32_0 : i32, i32
  }
  func.func @transform_3(%arg0: i32) -> (i32, i32, i32) {
    %c0_i32 = arith.constant 0 : i32
    %c0_i32_0 = arith.constant 0 : i32
    %c0_i32_1 = arith.constant 0 : i32
    return %arg0, %c0_i32, %c0_i32_0 : i32, i32, i32
  }
}

module attributes {stable_mosaic.version = 11 : i64} {
  func.func @kernel2(%arg0: i32, %arg1: memref<1x4x1024xf32, #tpu.memory_space<vmem>>, %arg2: memref<4x1xf32, #tpu.memory_space<vmem>>, %arg3: memref<4x1xf32, #tpu.memory_space<vmem>>, %arg4: memref<4x72xf32, #tpu.memory_space<vmem>>, %arg5: memref<4x1xf32, #tpu.memory_space<vmem>>, %arg6: memref<2x1024xf32, #tpu.memory_space<vmem>>, %arg7: memref<1x4x1024xf32, #tpu.memory_space<vmem>>, %arg8: memref<1x4x2xf32, #tpu.memory_space<vmem>>, %arg9: memref<8x1185xf32, #tpu.memory_space<vmem>>, %arg10: memref<72x1024xf32, #tpu.memory_space<vmem>>) attributes {dimension_semantics = [#tpu.dimension_semantics<parallel>], iteration_bounds = array<i64: 2>, scalar_prefetch = 0 : i64, scratch_operands = 2 : i64, tpu.core_type = #tpu.core_type<tc>, window_params = [{transform_indices = @transform_0, window_bounds = array<i64: 1, 4, 1024>}, {pipeline_mode = #tpu.pipeline_mode<synchronous>, transform_indices = @transform_1, window_bounds = array<i64: 4, 1>}, {pipeline_mode = #tpu.pipeline_mode<synchronous>, transform_indices = @transform_2, window_bounds = array<i64: 4, 1>}, {pipeline_mode = #tpu.pipeline_mode<synchronous>, transform_indices = @transform_3, window_bounds = array<i64: 4, 72>}, {pipeline_mode = #tpu.pipeline_mode<synchronous>, transform_indices = @transform_4, window_bounds = array<i64: 4, 1>}, {pipeline_mode = #tpu.pipeline_mode<synchronous>, transform_indices = @transform_5, window_bounds = array<i64: 2, 1024>}, {transform_indices = @transform_6, window_bounds = array<i64: 1, 4, 1024>}, {transform_indices = @transform_7, window_bounds = array<i64: 1, 4, 2>}]} {
    %cst = arith.constant 0.000000e+00 : f32
    %0 = vector.broadcast %cst : f32 to vector<8x128xf32>
    %c0 = arith.constant 0 : index
    %c0_0 = arith.constant 0 : index
    %1 = vector.load %arg9[%c0, %c0_0] : memref<8x1185xf32, #tpu.memory_space<vmem>>, vector<8x128xf32>
    tpu.vector_store %arg9[%c0, %c0_0], %0 {strides = array<i32>} : memref<8x1185xf32, #tpu.memory_space<vmem>>, vector<8x128xf32>,
    %cst_1 = arith.constant 0.000000e+00 : f32
    %2 = vector.broadcast %cst_1 : f32 to vector<8x33xf32>
    %c0_2 = arith.constant 0 : index
    %c1152 = arith.constant 1152 : index
    %3 = vector.load %arg9[%c0_2, %c1152] : memref<8x1185xf32, #tpu.memory_space<vmem>>, vector<8x33xf32>
    tpu.vector_store %arg9[%c0_2, %c1152], %2 {strides = array<i32>} : memref<8x1185xf32, #tpu.memory_space<vmem>>, vector<8x33xf32>,
    %cst_3 = arith.constant 0.000000e+00 : f32
    %4 = vector.broadcast %cst_3 : f32 to vector<4x1024xf32>
    %c4 = arith.constant 4 : index
    %c128 = arith.constant 128 : index
    %5 = vector.load %arg9[%c4, %c128] : memref<8x1185xf32, #tpu.memory_space<vmem>>, vector<4x1024xf32>
    tpu.vector_store %arg9[%c4, %c128], %4 {strides = array<i32>} : memref<8x1185xf32, #tpu.memory_space<vmem>>, vector<4x1024xf32>,
    %c0_4 = arith.constant 0 : index
    %c0_5 = arith.constant 0 : index
    %c0_6 = arith.constant 0 : index
    %6 = vector.load %arg1[%c0_4, %c0_5, %c0_6] : memref<1x4x1024xf32, #tpu.memory_space<vmem>>, vector<1x4x1024xf32>
    %7 = vector.shape_cast %6 : vector<1x4x1024xf32> to vector<4x1024xf32>
    %c0_7 = arith.constant 0 : index
    %c0_8 = arith.constant 0 : index
    %8 = vector.load %arg2[%c0_7, %c0_8] : memref<4x1xf32, #tpu.memory_space<vmem>>, vector<4x1xf32>
    %9 = vector.broadcast %8 : vector<4x1xf32> to vector<4x1024xf32>
    %10 = arith.mulf %7, %9 : vector<4x1024xf32>
    %c0_9 = arith.constant 0 : index
    %c0_10 = arith.constant 0 : index
    %11 = vector.load %arg3[%c0_9, %c0_10] : memref<4x1xf32, #tpu.memory_space<vmem>>, vector<4x1xf32>
    %12 = vector.broadcast %11 : vector<4x1xf32> to vector<4x1024xf32>
    %13 = arith.addf %10, %12 : vector<4x1024xf32>
    %cst_11 = arith.constant 0.000000e+00 : f32
    %14 = vector.broadcast %cst_11 : f32 to vector<4x1024xf32>
    %15 = arith.maximumf %13, %14 : vector<4x1024xf32>
    %c0_12 = arith.constant 0 : index
    %c128_13 = arith.constant 128 : index
    %16 = vector.load %arg9[%c0_12, %c128_13] : memref<8x1185xf32, #tpu.memory_space<vmem>>, vector<4x1024xf32>
    tpu.vector_store %arg9[%c0_12, %c128_13], %15 {strides = array<i32>} : memref<8x1185xf32, #tpu.memory_space<vmem>>, vector<4x1024xf32>,
    %c0_14 = arith.constant 0 : index
    %c95 = arith.constant 95 : index
    %17 = vector.load %arg9[%c0_14, %c95] : memref<8x1185xf32, #tpu.memory_space<vmem>>, vector<8x1024xf32>
    %c0_15 = arith.constant 0 : index
    %c0_16 = arith.constant 0 : index
    %18 = vector.load %arg6[%c0_15, %c0_16] : memref<2x1024xf32, #tpu.memory_space<vmem>>, vector<1x1024xf32>
    %19 = vector.broadcast %18 : vector<1x1024xf32> to vector<8x1024xf32>
    %20 = arith.mulf %17, %19 : vector<8x1024xf32>
    %c0_17 = arith.constant 0 : index
    %c0_18 = arith.constant 0 : index
    %21 = vector.load %arg10[%c0_17, %c0_18] : memref<72x1024xf32, #tpu.memory_space<vmem>>, vector<8x1024xf32>
    tpu.vector_store %arg10[%c0_17, %c0_18], %20 {strides = array<i32>} : memref<72x1024xf32, #tpu.memory_space<vmem>>, vector<8x1024xf32>,
    %c0_19 = arith.constant 0 : index
    %c96 = arith.constant 96 : index
    %22 = vector.load %arg9[%c0_19, %c96] : memref<8x1185xf32, #tpu.memory_space<vmem>>, vector<8x1024xf32>
    %c8 = arith.constant 8 : index
    %c0_20 = arith.constant 0 : index
    %23 = vector.load %arg10[%c8, %c0_20] : memref<72x1024xf32, #tpu.memory_space<vmem>>, vector<8x1024xf32>
    tpu.vector_store %arg10[%c8, %c0_20], %22 {strides = array<i32>} : memref<72x1024xf32, #tpu.memory_space<vmem>>, vector<8x1024xf32>,
    %c0_21 = arith.constant 0 : index
    %c97 = arith.constant 97 : index
    %24 = vector.load %arg9[%c0_21, %c97] : memref<8x1185xf32, #tpu.memory_space<vmem>>, vector<8x1024xf32>
    %c1 = arith.constant 1 : index
    %c0_22 = arith.constant 0 : index
    %25 = vector.load %arg6[%c1, %c0_22] : memref<2x1024xf32, #tpu.memory_space<vmem>>, vector<1x1024xf32>
    %26 = vector.broadcast %25 : vector<1x1024xf32> to vector<8x1024xf32>
    %27 = arith.mulf %24, %26 : vector<8x1024xf32>
    %c16 = arith.constant 16 : index
    %c0_23 = arith.constant 0 : index
    %28 = vector.load %arg10[%c16, %c0_23] : memref<72x1024xf32, #tpu.memory_space<vmem>>, vector<8x1024xf32>
    tpu.vector_store %arg10[%c16, %c0_23], %27 {strides = array<i32>} : memref<72x1024xf32, #tpu.memory_space<vmem>>, vector<8x1024xf32>,
    %c0_24 = arith.constant 0 : index
    %c127 = arith.constant 127 : index
    %29 = vector.load %arg9[%c0_24, %c127] : memref<8x1185xf32, #tpu.memory_space<vmem>>, vector<8x1024xf32>
    %c0_25 = arith.constant 0 : index
    %c0_26 = arith.constant 0 : index
    %30 = vector.load %arg6[%c0_25, %c0_26] : memref<2x1024xf32, #tpu.memory_space<vmem>>, vector<1x1024xf32>
    %31 = vector.broadcast %30 : vector<1x1024xf32> to vector<8x1024xf32>
    %32 = arith.mulf %29, %31 : vector<8x1024xf32>
    %c24 = arith.constant 24 : index
    %c0_27 = arith.constant 0 : index
    %33 = vector.load %arg10[%c24, %c0_27] : memref<72x1024xf32, #tpu.memory_space<vmem>>, vector<8x1024xf32>
    tpu.vector_store %arg10[%c24, %c0_27], %32 {strides = array<i32>} : memref<72x1024xf32, #tpu.memory_space<vmem>>, vector<8x1024xf32>,
    %c0_28 = arith.constant 0 : index
    %c128_29 = arith.constant 128 : index
    %34 = vector.load %arg9[%c0_28, %c128_29] : memref<8x1185xf32, #tpu.memory_space<vmem>>, vector<8x1024xf32>
    %c32 = arith.constant 32 : index
    %c0_30 = arith.constant 0 : index
    %35 = vector.load %arg10[%c32, %c0_30] : memref<72x1024xf32, #tpu.memory_space<vmem>>, vector<8x1024xf32>
    tpu.vector_store %arg10[%c32, %c0_30], %34 {strides = array<i32>} : memref<72x1024xf32, #tpu.memory_space<vmem>>, vector<8x1024xf32>,
    %c0_31 = arith.constant 0 : index
    %c129 = arith.constant 129 : index
    %36 = vector.load %arg9[%c0_31, %c129] : memref<8x1185xf32, #tpu.memory_space<vmem>>, vector<8x1024xf32>
    %c1_32 = arith.constant 1 : index
    %c0_33 = arith.constant 0 : index
    %37 = vector.load %arg6[%c1_32, %c0_33] : memref<2x1024xf32, #tpu.memory_space<vmem>>, vector<1x1024xf32>
    %38 = vector.broadcast %37 : vector<1x1024xf32> to vector<8x1024xf32>
    %39 = arith.mulf %36, %38 : vector<8x1024xf32>
    %c40 = arith.constant 40 : index
    %c0_34 = arith.constant 0 : index
    %40 = vector.load %arg10[%c40, %c0_34] : memref<72x1024xf32, #tpu.memory_space<vmem>>, vector<8x1024xf32>
    tpu.vector_store %arg10[%c40, %c0_34], %39 {strides = array<i32>} : memref<72x1024xf32, #tpu.memory_space<vmem>>, vector<8x1024xf32>,
    %c0_35 = arith.constant 0 : index
    %c159 = arith.constant 159 : index
    %41 = vector.load %arg9[%c0_35, %c159] : memref<8x1185xf32, #tpu.memory_space<vmem>>, vector<8x1024xf32>
    %c0_36 = arith.constant 0 : index
    %c0_37 = arith.constant 0 : index
    %42 = vector.load %arg6[%c0_36, %c0_37] : memref<2x1024xf32, #tpu.memory_space<vmem>>, vector<1x1024xf32>
    %43 = vector.broadcast %42 : vector<1x1024xf32> to vector<8x1024xf32>
    %44 = arith.mulf %41, %43 : vector<8x1024xf32>
    %c48 = arith.constant 48 : index
    %c0_38 = arith.constant 0 : index
    %45 = vector.load %arg10[%c48, %c0_38] : memref<72x1024xf32, #tpu.memory_space<vmem>>, vector<8x1024xf32>
    tpu.vector_store %arg10[%c48, %c0_38], %44 {strides = array<i32>} : memref<72x1024xf32, #tpu.memory_space<vmem>>, vector<8x1024xf32>,
    %c0_39 = arith.constant 0 : index
    %c160 = arith.constant 160 : index
    %46 = vector.load %arg9[%c0_39, %c160] : memref<8x1185xf32, #tpu.memory_space<vmem>>, vector<8x1024xf32>
    %c56 = arith.constant 56 : index
    %c0_40 = arith.constant 0 : index
    %47 = vector.load %arg10[%c56, %c0_40] : memref<72x1024xf32, #tpu.memory_space<vmem>>, vector<8x1024xf32>
    tpu.vector_store %arg10[%c56, %c0_40], %46 {strides = array<i32>} : memref<72x1024xf32, #tpu.memory_space<vmem>>, vector<8x1024xf32>,
    %c0_41 = arith.constant 0 : index
    %c161 = arith.constant 161 : index
    %48 = vector.load %arg9[%c0_41, %c161] : memref<8x1185xf32, #tpu.memory_space<vmem>>, vector<8x1024xf32>
    %c1_42 = arith.constant 1 : index
    %c0_43 = arith.constant 0 : index
    %49 = vector.load %arg6[%c1_42, %c0_43] : memref<2x1024xf32, #tpu.memory_space<vmem>>, vector<1x1024xf32>
    %50 = vector.broadcast %49 : vector<1x1024xf32> to vector<8x1024xf32>
    %51 = arith.mulf %48, %50 : vector<8x1024xf32>
    %c64 = arith.constant 64 : index
    %c0_44 = arith.constant 0 : index
    %52 = vector.load %arg10[%c64, %c0_44] : memref<72x1024xf32, #tpu.memory_space<vmem>>, vector<8x1024xf32>
    tpu.vector_store %arg10[%c64, %c0_44], %51 {strides = array<i32>} : memref<72x1024xf32, #tpu.memory_space<vmem>>, vector<8x1024xf32>,
    %c0_45 = arith.constant 0 : index
    %c0_46 = arith.constant 0 : index
    %53 = vector.load %arg4[%c0_45, %c0_46] : memref<4x72xf32, #tpu.memory_space<vmem>>, vector<4x72xf32>
    %c0_47 = arith.constant 0 : index
    %c0_48 = arith.constant 0 : index
    %54 = vector.load %arg10[%c0_47, %c0_48] : memref<72x1024xf32, #tpu.memory_space<vmem>>, vector<72x1024xf32>
    %cst_49 = arith.constant dense<0.000000e+00> : vector<4x1024xf32>
    %55 = tpu.matmul %53, %54, %cst_49 {dimension_numbers = #tpu.dot_dimension_numbers<[1], [0], [0], [1], [0, 0, 1, 1], [], []>} : vector<4x72xf32>, vector<72x1024xf32>, vector<4x1024xf32> -> vector<4x1024xf32>
    %c0_50 = arith.constant 0 : index
    %c0_51 = arith.constant 0 : index
    %56 = vector.load %arg5[%c0_50, %c0_51] : memref<4x1xf32, #tpu.memory_space<vmem>>, vector<4x1xf32>
    %57 = vector.broadcast %56 : vector<4x1xf32> to vector<4x1024xf32>
    %58 = arith.addf %55, %57 : vector<4x1024xf32>
    %c0_52 = arith.constant 0 : index
    %c0_53 = arith.constant 0 : index
    %c0_54 = arith.constant 0 : index
    %59 = vector.load %arg7[%c0_52, %c0_53, %c0_54] : memref<1x4x1024xf32, #tpu.memory_space<vmem>>, vector<1x4x1024xf32>
    %60 = vector.shape_cast %59 : vector<1x4x1024xf32> to vector<4x1024xf32>
    %61 = vector.shape_cast %58 : vector<4x1024xf32> to vector<1x4x1024xf32>
    tpu.vector_store %arg7[%c0_52, %c0_53, %c0_54], %61 {strides = array<i32>} : memref<1x4x1024xf32, #tpu.memory_space<vmem>>, vector<1x4x1024xf32>,
    %cst_55 = arith.constant dense<0.000000e+00> : vector<4xf32>
    %62 = vector.multi_reduction <add>, %58, %cst_55 [1] : vector<4x1024xf32> to vector<4xf32>
    %63 = vector.shape_cast %62 : vector<4xf32> to vector<4x1xf32>
    %64 = arith.mulf %58, %58 : vector<4x1024xf32>
    %cst_56 = arith.constant dense<0.000000e+00> : vector<4xf32>
    %65 = vector.multi_reduction <add>, %64, %cst_56 [1] : vector<4x1024xf32> to vector<4xf32>
    %66 = vector.shape_cast %65 : vector<4xf32> to vector<4x1xf32>
    %67 = tpu.concatenate %63, %66 in 1 : vector<4x1xf32>, vector<4x1xf32> -> vector<4x2xf32>
    %c0_57 = arith.constant 0 : index
    %c0_58 = arith.constant 0 : index
    %c0_59 = arith.constant 0 : index
    %68 = vector.load %arg8[%c0_57, %c0_58, %c0_59] : memref<1x4x2xf32, #tpu.memory_space<vmem>>, vector<1x4x2xf32>
    %69 = vector.shape_cast %68 : vector<1x4x2xf32> to vector<4x2xf32>
    %70 = vector.shape_cast %67 : vector<4x2xf32> to vector<1x4x2xf32>
    tpu.vector_store %arg8[%c0_57, %c0_58, %c0_59], %70 {strides = array<i32>} : memref<1x4x2xf32, #tpu.memory_space<vmem>>, vector<1x4x2xf32>,
    return
  }
  func.func @transform_0(%arg0: i32) -> (i32, i32, i32) {
    %c0_i32 = arith.constant 0 : i32
    %c0_i32_0 = arith.constant 0 : i32
    %c0_i32_1 = arith.constant 0 : i32
    return %arg0, %c0_i32, %c0_i32_0 : i32, i32, i32
  }
  func.func @transform_1(%arg0: i32) -> (i32, i32) {
    %c0_i32 = arith.constant 0 : i32
    %c0_i32_0 = arith.constant 0 : i32
    %c0_i32_1 = arith.constant 0 : i32
    return %c0_i32, %c0_i32_0 : i32, i32
  }
  func.func @transform_2(%arg0: i32) -> (i32, i32) {
    %c0_i32 = arith.constant 0 : i32
    %c0_i32_0 = arith.constant 0 : i32
    %c0_i32_1 = arith.constant 0 : i32
    return %c0_i32, %c0_i32_0 : i32, i32
  }
  func.func @transform_3(%arg0: i32) -> (i32, i32) {
    %c0_i32 = arith.constant 0 : i32
    %c0_i32_0 = arith.constant 0 : i32
    %c0_i32_1 = arith.constant 0 : i32
    return %c0_i32, %c0_i32_0 : i32, i32
  }
  func.func @transform_4(%arg0: i32) -> (i32, i32) {
    %c0_i32 = arith.constant 0 : i32
    %c0_i32_0 = arith.constant 0 : i32
    %c0_i32_1 = arith.constant 0 : i32
    return %c0_i32, %c0_i32_0 : i32, i32
  }
  func.func @transform_5(%arg0: i32) -> (i32, i32) {
    %c0_i32 = arith.constant 0 : i32
    %c0_i32_0 = arith.constant 0 : i32
    %c0_i32_1 = arith.constant 0 : i32
    return %c0_i32, %c0_i32_0 : i32, i32
  }
  func.func @transform_6(%arg0: i32) -> (i32, i32, i32) {
    %c0_i32 = arith.constant 0 : i32
    %c0_i32_0 = arith.constant 0 : i32
    %c0_i32_1 = arith.constant 0 : i32
    return %arg0, %c0_i32, %c0_i32_0 : i32, i32, i32
  }
  func.func @transform_7(%arg0: i32) -> (i32, i32, i32) {
    %c0_i32 = arith.constant 0 : i32
    %c0_i32_0 = arith.constant 0 : i32
    %c0_i32_1 = arith.constant 0 : i32
    return %arg0, %c0_i32, %c0_i32_0 : i32, i32, i32
  }
}

</mosaic_0001>

<bundles_post_ra>
// kernel: up_forward.5
= control target key start
LH: loop header
LB: loop body
LE: loop exit
PB: predicated region body
PF: predicated region fallthrough
CT: control target
= control target key end

     0   :  { %s320_s12 = smov 0   ;;  %s343_s0 = inlined_call_operand.vmem [shape: f32[2,4,1024], index: 0, kind: input, shape index: {}]   ;;  %s344_s1 = inlined_call_operand.vmem [shape: f32[4,1], index: 1, kind: input, shape index: {}]   ;;  %s345_s2 = inlined_call_operand.vmem [shape: f32[4,1], index: 2, kind: input, shape index: {}]   ;;  %s346_s3 = inlined_call_operand.vmem [shape: f32[2,4,1024], index: 3, kind: output, shape index: {}]  }
   0x1 LB: > { %s266_s13 = sadd.s32 4294967295, %s296_s12   ;;  %p270_p0 = scmp.ge.s32.totalorder %s296_s12, 1  ;;  %s296_s12 = sphi %s320_s12, %s13_s12  }
   0x2   : > { %p137_p1 = scmp.lt.s32.totalorder %s296_s12, 3 }
   0x4   : > { %p138_p2 = pnand %p270_p0, %p137_p1 }
   0x5   : > { %p161_p3 = scmp.lt.s32.totalorder (!%p138_p2), %s266_s13, 1 }
   0x6   : > { %141 = sbr.rel (%p138_p2) target bundleno = 146 (0x92), region = 32 }
   0xb   : > { %v175_v0 = vld [vmem:[%s344_s1] sm:$0xf]  ;;  %v298_v1 = vmov 0   ;;  %s348_s13 = smov (!%p161_p3, %s266_s13), 1  ;;  %v299_v3 = vmov 839922192  }
   0xc   : > { %289 = vset.pattern.permute.xlu0 %v298_v1  ;;  %v189_v2 = vld [vmem:[%s345_s2] sm:$0xf]  ;;  %v181_v4 = vunpack.c.l.s4 %v299_v3  ;;  %s277_s18 = sshll.u32 %s348_s13, 5 }
   0xd   : > { %178 = vperm.xlu0 %289, %v175_v0   ;;  %s165_s21 = scalar_lea.vmem %s343_s0, %s277_s18  ;;  %s170_s24 = scalar_lea.vmem %s346_s3, %s277_s18 }
   0xe   : > { %v182_v5 = vunpack.c.0.s8 %v181_v4  ;;  %v171_v8 = vld [vmem:[%s165_s21] sm:$0xff]  ;;  %v172_v9 = vld [vmem:[%s165_s21 + $0x8] sm:$0xff]  ;;  %v173_v10 = vld [vmem:[%s165_s21 + $0x10] sm:$0xff] }
   0xf   : > { %v174_v11 = vld [vmem:[%s165_s21 + $0x18] sm:$0xff] }
  0x15   : > { %192 = vperm.xlu0 %289, %v189_v2  }
  0x7f   : > { %v179_v6 = vpop.permute.xlu0 %178 }
  0x80   : > { %v183_v7 = vperm.slane %v179_v6, %v182_v5 }
  0x82   : > { %v185_v12 = vmul.f32 %v183_v7, %v171_v8  ;;  %v186_v14 = vmul.f32 %v183_v7, %v172_v9  ;;  %v187_v15 = vmul.f32 %v183_v7, %v173_v10  ;;  %v188_v16 = vmul.f32 %v183_v7, %v174_v11 }
  0x87   : > { %v193_v13 = vpop.permute.xlu0 %192 }
  0x88   : > { %v197_v17 = vperm.slane %v193_v13, %v182_v5 }
  0x8a   : > { %v199_v18 = vadd.f32 %v197_v17, %v185_v12  ;;  %v200_v19 = vadd.f32 %v197_v17, %v186_v14  ;;  %v201_v20 = vadd.f32 %v197_v17, %v187_v15  ;;  %v202_v21 = vadd.f32 %v197_v17, %v188_v16 }
  0x8c   : > { %v203_v22 = vmax.f32 %v199_v18, 0.0  ;;  %v204_v23 = vmax.f32 %v200_v19, 0.0  ;;  %v205_v24 = vmax.f32 %v201_v20, 0.0  ;;  %v206_v25 = vmax.f32 %v202_v21, 0.0 }
  0x8e   : > { %207 = vst [vmem:[%s170_s24] sm:$0xff] %v203_v22 }
  0x8f   : > { %208 = vst [vmem:[%s170_s24 + $0x8] sm:$0xff] %v204_v23 }
  0x90   : > { %209 = vst [vmem:[%s170_s24 + $0x10] sm:$0xff] %v205_v24 }
  0x91   : > { %210 = vst [vmem:[%s170_s24 + $0x18] sm:$0xff] %v206_v25 }
  0x92 PF: > { %s13_s12 = sadd.s32 1, %s296_s12  }
  0x93   : > { %p10_p4 = scmp.ge.s32.totalorder %s13_s12, 4  }
  0x95   :  { %12 = sbr.rel (!%p10_p4) target bundleno = 1 (0x1), region = 62 }

// kernel: up_forward.3
= control target key start
LH: loop header
LB: loop body
LE: loop exit
PB: predicated region body
PF: predicated region fallthrough
CT: control target
= control target key end

     0   :  { %s2285_s27 = smov 0   ;;  %s3227_s0 = inlined_call_operand.vmem [shape: f32[2,8,1024], index: 0, kind: input, shape index: {}]   ;;  %s3228_s1 = inlined_call_operand.vmem [shape: f32[2,4,1024], index: 1, kind: input, shape index: {}]   ;;  %s3229_s2 = inlined_call_operand.vmem [shape: f32[16,8], index: 2, kind: input, shape index: {}]   ;;  %s3230_s3 = inlined_call_operand.vmem [shape: f32[4,1], index: 3, kind: input, shape index: {}]   ;;  %s3231_s4 = inlined_call_operand.vmem [shape: f32[4,72], index: 4, kind: input, shape index: {}]   ;;  %s3232_s5 = inlined_call_operand.vmem [shape: f32[4,1], index: 5, kind: input, shape index: {}]   ;;  %s3233_s6 = inlined_call_operand.vmem [shape: f32[2,1024], index: 6, kind: input, shape index: {}]   ;;  %s3234_s7 = inlined_call_operand.vmem [shape: f32[2,4,1024], index: 7, kind: output, shape index: {0}]   ;;  %s3235_s8 = inlined_call_operand.vmem [shape: f32[2,4,2], index: 8, kind: output, shape index: {1}]  }
   0x1 LB: > { %s1999_s28 = sadd.s32 4294967295, %s2228_s27   ;;  %p2003_p0 = scmp.ge.s32.totalorder %s2228_s27, 1  ;;  %s2228_s27 = sphi %s2285_s27, %s19_s27  }
   0x2   : > { %p275_p1 = scmp.lt.s32.totalorder %s2228_s27, 3 }
   0x4   : > { %p276_p2 = pnand %p2003_p0, %p275_p1 }
   0x6   : > { %279 = sbr.rel (%p276_p2) target bundleno = 795 (0x31b), region = 48 }
   0xb   : > { %p318_p3 = scmp.lt.s32.totalorder %s1999_s28, 1  ;;  %v2230_v0 = vmov 0   ;;  %v789_v1 = vld [vmem:[%s3233_s6] ss:$2 sm:$0xff]  ;;  %s2231_s13 = smov 95   ;;  %vm389_vm0 = vcmask 64512  }
   0xc   : > { %2061 = vset.pattern.permute.xlu0 %v2230_v0  ;;  %v734_v2 = vld [vmem:[%s3230_s3] sm:$0xf]  ;;  %v791_v3 = vperm.slane %v789_v1, 0  ;;  %v792_v4 = vperm.slane %v789_v1, 1  ;;  %v793_v16 = vperm.slane %v789_v1, 2  ;;  %v795_v17 = vperm.slane %v789_v1, 4 }
   0xd   : > { %s3263_s28 = smov (!%p318_p3, %s1999_s28), 1  ;;  %737 = vperm.xlu0 %2061, %v734_v2   ;;  %v379_v5 = vld [vmem:[%s3229_s2] sm:$0xff]  ;;  %v794_v18 = vperm.slane %v789_v1, 3  ;;  %v380_v21 = vld [vmem:[%s3229_s2 + $0x8] sm:$0xff]  ;;  %v796_v22 = vperm.slane %v789_v1, 5  ;;  %v798_v23 = vperm.slane %v789_v1, 7 }
   0xe   : > { %s2040_s11 = sshll.u32 %s3263_s28, 6  ;;  %s2041_s12 = sshll.u32 %s3263_s28, 5  ;;  %799 = vrot.lane.b32.xlu1 %v791_v3, %s2231_s13  ;;  %801 = vrot.lane.b32.xlu2 %v792_v4, %s2231_s13  ;;  %v797_v24 = vperm.slane %v789_v1, 6  ;;  %v2346_v25 = vld [vmem:[%s3233_s6 + $0x1] ss:$2 sm:$0xff]  ;;  %vm815_vm1 = vcmask 777216  }
   0xf   : > { %s2308_s16 = scalar_lea.vmem %s3227_s0, %s2040_s11  ;;  %s327_s19 = scalar_lea.vmem %s3228_s1, %s2041_s12  ;;  %v966_v26 = vperm.slane %v2346_v25, 2  ;;  %v965_v27 = vperm.slane %v2346_v25, 1  ;;  %v964_v28 = vperm.slane %v2346_v25, 0  ;;  %v969_v29 = vperm.slane %v2346_v25, 5  ;;  %v2029_v32 = vld [vmem:[%s3233_s6 + $0x1] ss:$2 sm:$0xff] }
  0x10   : > { %v340_v6 = vld [vmem:[%s327_s19] sm:$0xff]  ;;  %v341_v7 = vld [vmem:[%s327_s19 + $0x8] sm:$0xff]  ;;  %v342_v8 = vld [vmem:[%s327_s19 + $0x10] sm:$0xff]  ;;  %s2232_s26 = smov 97   ;;  %v968_v30 = vperm.slane %v2346_v25, 4  ;;  %v967_v31 = vperm.slane %v2346_v25, 3  ;;  %s3193_s30 = scalar_lea.vmem %s3234_s7, %s2041_s12 }
  0x11   : > { %v343_v9 = vld [vmem:[%s327_s19 + $0x18] sm:$0xff]  ;;  %348 = vst [vmem:[#allocation1] ss:$2 sm:$0xff] %v340_v6  ;;  %v381_v10 = vld [vmem:[%s2308_s16] sm:$0xff]  ;;  %v382_v11 = vld [vmem:[%s2308_s16 + $0x8] sm:$0xff]  ;;  %v1491_v33 = vperm.slane %v2029_v32, 3 }
  0x12   : > { %350 = vst [vmem:[#allocation1 + $0x10] ss:$2 sm:$0xff] %v341_v7  ;;  %411 = vmatpush.msra.mxu0 %v381_v10  ;;  %434 = vmatpush.msra.mxu1 %v382_v11  ;;  %v383_v12 = vld [vmem:[%s2308_s16 + $0x10] sm:$0xff]  ;;  %v384_v13 = vld [vmem:[%s2308_s16 + $0x18] sm:$0xff]  ;;  %v385_v14 = vld [vmem:[%s2308_s16 + $0x20] sm:$0xff]  ;;  %v1490_v34 = vperm.slane %v2029_v32, 2 }
  0x13   : > { %352 = vst [vmem:[#allocation1 + $0x20] ss:$2 sm:$0xff] %v342_v8  ;;  %457 = vmatpush.msra.mxu2 %v383_v12  ;;  %2011 = vmatmul.msk.f32.vlgmr.msra.gmra.mxu0 %vm389_vm0, %v379_v5  ;;  %v386_v15 = vld [vmem:[%s2308_s16 + $0x28] sm:$0xff]  ;;  %v388_v19 = vld [vmem:[%s2308_s16 + $0x38] sm:$0xff]  ;;  %v387_v20 = vld [vmem:[%s2308_s16 + $0x30] sm:$0xff]  ;;  %v1489_v35 = vperm.slane %v2029_v32, 1 }
  0x14   : > { %354 = vst [vmem:[#allocation1 + $0x30] ss:$2 sm:$0xff] %v343_v9  ;;  %2013 = vmatmul.msk.f32.vlgmr.msra.gmra.mxu1 %vm389_vm0, %v379_v5  ;;  %2015 = vmatmul.msk.f32.vlgmr.msra.gmra.mxu2 %vm389_vm0, %v379_v5  ;;  %s2233_s9 = smov 33   ;;  %v2377_v36 = vld [vmem:[%s3233_s6] ss:$2 sm:$0xff]  ;;  %v1492_v38 = vperm.slane %v2029_v32, 4 }
  0x15   : > { %480 = vmatpush.msra.mxu3 %v384_v13  ;;  %503 = vmatpush.msrb.mxu0 %v385_v14  ;;  %v1317_v37 = vperm.slane %v2377_v36, 1  ;;  %v1488_v39 = vperm.slane %v2029_v32, 0  ;;  %s2234_s14 = smov 31   ;;  %v2386_v40 = vld [vmem:[%s3233_s6 + $0x1] ss:$2 sm:$0xff]  ;;  %v1319_v41 = vperm.slane %v2377_v36, 3 }
  0x16   : > { %2017 = vmatmul.msk.f32.vlgmr.msra.gmra.mxu3 %vm389_vm0, %v379_v5  ;;  %526 = vmatpush.msrb.mxu1 %v386_v15  ;;  %v1206_v42 = vperm.slane %v2386_v40, 1  ;;  %v1318_v43 = vperm.slane %v2377_v36, 2  ;;  %s2235_s17 = smov 1   ;;  %v1208_v44 = vperm.slane %v2386_v40, 3  ;;  %v1316_v45 = vperm.slane %v2377_v36, 0  ;;  %s2236_s20 = smov 127  }
  0x17   : > { %803 = vrot.lane.b32.xlu1 %v793_v16, %s2231_s13  ;;  %807 = vrot.lane.b32.xlu0 %v795_v17, %s2231_s13  ;;  %v1207_v46 = vperm.slane %v2386_v40, 2  ;;  %v1205_v47 = vperm.slane %v2386_v40, 0  ;;  %v1209_v48 = vperm.slane %v2386_v40, 4  ;;  %v1320_v49 = vperm.slane %v2377_v36, 4  ;;  %v2412_v53 = vld [vmem:[%s3233_s6] ss:$2 sm:$0xff] }
  0x18   : > { %805 = vrot.lane.b32.xlu2 %v794_v18, %s2231_s13  ;;  %572 = vmatpush.msrb.mxu3 %v388_v19  ;;  %v1494_v50 = vperm.slane %v2029_v32, 6  ;;  %v1495_v51 = vperm.slane %v2029_v32, 7  ;;  %v1493_v52 = vperm.slane %v2029_v32, 5  ;;  %v1079_v54 = vperm.slane %v2412_v53, 2  ;;  %s2237_s21 = smov 32   ;;  %s2239_s22 = smov 96  }
  0x19   : > { %549 = vmatpush.msrb.mxu2 %v387_v20  ;;  %v1078_v55 = vperm.slane %v2412_v53, 1  ;;  %v1077_v57 = vperm.slane %v2412_v53, 0  ;;  %v1080_v58 = vperm.slane %v2412_v53, 3  ;;  %vm338_vm2 = vcmask 269312   ;;  %s2010_s12 = sshll.u32 %s3263_s28, 2 }
  0x1a   : > { %v3236_v16 = vmov 0.0   ;;  %vm988_vm3 = vcmask 793600   ;;  %vm1041_vm4 = vcmask 252928   ;;  %vm604_vm5 = vcmask 7168   ;;  %s336_s11 = scalar_lea.vmem %s3235_s8, %s2010_s12 }
  0x1b   : > { %2012 = vmatmul.msk.f32.gmra.mxu0 %vm389_vm0, %v380_v21  ;;  %339 = vst.msk [vmem:[#allocation2 + $0x48] sm:$0xff] %vm338_vm2, %v3236_v16  ;;  %vm1101_vm6 = vcmask 1039360   ;;  %vm661_vm7 = vcmask 261120   ;;  %vm1452_vm8 = vcmask 785408   ;;  %vm1667_vm9 = vcmask 588800  }
  0x1c   : > { %2014 = vmatmul.msk.f32.gmra.mxu1 %vm389_vm0, %v380_v21  ;;  %2016 = vmatmul.msk.f32.gmra.mxu2 %vm389_vm0, %v380_v21  ;;  %vm1843_vm10 = vcmask 1043456   ;;  %vm1899_vm11 = vcmask 11264  }
  0x1e   : > { %2018 = vmatmul.msk.f32.gmra.mxu3 %vm389_vm0, %v380_v21 }
  0x1f   : > { %809 = vrot.lane.b32.xlu1 %v796_v22, %s2231_s13  ;;  %813 = vrot.lane.b32.xlu0 %v798_v23, %s2231_s13 }
  0x20   : > { %811 = vrot.lane.b32.xlu2 %v797_v24, %s2231_s13 }
  0x23   : > { %2019 = vmatmul.msk.f32.vlgmr.msrb.gmra.mxu0 %vm389_vm0, %v379_v5 }
  0x24   : > { %2021 = vmatmul.msk.f32.vlgmr.msrb.gmra.mxu1 %vm389_vm0, %v379_v5  ;;  %2023 = vmatmul.msk.f32.vlgmr.msrb.gmra.mxu2 %vm389_vm0, %v379_v5 }
  0x26   : > { %2025 = vmatmul.msk.f32.vlgmr.msrb.gmra.mxu3 %vm389_vm0, %v379_v5 }
  0x27   : > { %976 = vrot.lane.b32.xlu1 %v966_v26, %s2232_s26  ;;  %974 = vrot.lane.b32.xlu0 %v965_v27, %s2232_s26 }
  0x28   : > { %972 = vrot.lane.b32.xlu2 %v964_v28, %s2232_s26 }
  0x2b   : > { %2020 = vmatmul.msk.f32.gmra.mxu0 %vm389_vm0, %v380_v21 }
  0x2c   : > { %2022 = vmatmul.msk.f32.gmra.mxu1 %vm389_vm0, %v380_v21  ;;  %2024 = vmatmul.msk.f32.gmra.mxu2 %vm389_vm0, %v380_v21 }
  0x2e   : > { %2026 = vmatmul.msk.f32.gmra.mxu3 %vm389_vm0, %v380_v21 }
  0x2f   : > { %982 = vrot.lane.b32.xlu1 %v969_v29, %s2232_s26  ;;  %980 = vrot.lane.b32.xlu0 %v968_v30, %s2232_s26 }
  0x30   : > { %978 = vrot.lane.b32.xlu2 %v967_v31, %s2232_s26 }
  0x37   : > { %1502 = vrot.lane.b32.xlu1 %v1491_v33, %s2233_s9  ;;  %1500 = vrot.lane.b32.xlu0 %v1490_v34, %s2233_s9 }
  0x38   : > { %1498 = vrot.lane.b32.xlu2 %v1489_v35, %s2233_s9 }
  0x3f   : > { %1326 = vrot.lane.b32.xlu1 %v1317_v37, %s2234_s14  ;;  %1504 = vrot.lane.b32.xlu0 %v1492_v38, %s2233_s9 }
  0x40   : > { %1496 = vrot.lane.b32.xlu2 %v1488_v39, %s2233_s9 }
  0x47   : > { %1330 = vrot.lane.b32.xlu0 %v1319_v41, %s2234_s14  ;;  %1215 = vrot.lane.b32.xlu1 %v1206_v42, %s2235_s17 }
  0x48   : > { %1328 = vrot.lane.b32.xlu2 %v1318_v43, %s2234_s14 }
  0x4f   : > { %1219 = vrot.lane.b32.xlu0 %v1208_v44, %s2235_s17  ;;  %1324 = vrot.lane.b32.xlu1 %v1316_v45, %s2234_s14 }
  0x50   : > { %1217 = vrot.lane.b32.xlu2 %v1207_v46, %s2235_s17 }
  0x57   : > { %1213 = vrot.lane.b32.xlu0 %v1205_v47, %s2235_s17  ;;  %1221 = vrot.lane.b32.xlu1 %v1209_v48, %s2235_s17 }
  0x58   : > { %1332 = vrot.lane.b32.xlu2 %v1320_v49, %s2234_s14 }
  0x5f   : > { %1508 = vrot.lane.b32.xlu0 %v1494_v50, %s2233_s9  ;;  %1510 = vrot.lane.b32.xlu1 %v1495_v51, %s2233_s9 }
  0x60   : > { %1506 = vrot.lane.b32.xlu2 %v1493_v52, %s2233_s9 }
  0x67   : > { %1089 = vrot.lane.b32.xlu0 %v1079_v54, %s2236_s20  ;;  %1091 = vrot.lane.b32.xlu1 %v1080_v58, %s2236_s20 }
  0x68   : > { %1087 = vrot.lane.b32.xlu2 %v1078_v55, %s2236_s20  ;;  %v802_v56 = vpop.permute.xlu2 %801 }
  0x70   : > { %1085 = vrot.lane.b32.xlu2 %v1077_v57, %s2236_s20 }
  0x72   : > { %v806_v59 = vpop.permute.xlu2 %805 }
  0x7a   : > { %v2422_v60 = vpop.permute.xlu2 %811 }
  0x7f   : > { %v2424_v61 = vpop.permute.xlu0 %737 }
  0x80   : > { %v2426_v62 = vpop.permute.xlu1 %799 }
  0x81   : > { %v2430_v63 = vsel %vm815_vm1, %v2426_v62, %v802_v56 }
  0x82   : > { %v2432_v0 = vpop.permute.xlu2 %972 }
  0x89   : > { %v804_v1 = vpop.permute.xlu1 %803  ;;  %v808_v2 = vpop.permute.xlu0 %807 }
  0x8a   : > { %v2435_v3 = vsel %vm815_vm1, %v802_v56, %v804_v1  ;;  %v2438_v4 = vsel %vm815_vm1, %v804_v1, %v806_v59  ;;  %v2441_v5 = vsel %vm815_vm1, %v806_v59, %v808_v2  ;;  %v979_v6 = vpop.permute.xlu2 %978 }
  0x90   : > { %v2443_v7 = vpop.f32.mrf.mxu0 }
  0x91   : > { %v637_v8 = vrot.slane %v2443_v7, 4  ;;  %v2446_v9 = vpop.f32.mrf.mxu1  ;;  %v810_v10 = vpop.permute.xlu1 %809 }
  0x92   : > { %v638_v11 = vrot.slane %v2446_v9, 4  ;;  %v2450_v12 = vsel %vm815_vm1, %v808_v2, %v810_v10  ;;  %v2454_v13 = vsel %vm815_vm1, %v810_v10, %v2422_v60  ;;  %v2456_v14 = vpop.permute.xlu0 %813  ;;  %v2458_v15 = vpop.permute.xlu2 %1498 }
  0x93   : > { %645 = vrot.lane.b32.xlu2 %v637_v8, %s2237_s21 }
  0x94   : > { %647 = vrot.lane.b32.xlu0 %v638_v11, %s2237_s21 }
  0x97   : > { %v2464_v17 = vpop.f32.mrf.mxu2 }
  0x98   : > { %v639_v18 = vrot.slane %v2464_v17, 4  ;;  %v416_v19 = vpop.f32.mrf.mxu0 }
  0x99   : > { %v2467_v20 = vpop.f32.mrf.mxu3  ;;  %v977_v22 = vpop.permute.xlu1 %976  ;;  %v686_v30 = vrot.slane %v416_v19, 4 }
  0x9a   : > { %v640_v21 = vrot.slane %v2467_v20, 4  ;;  %649 = vrot.lane.b32.xlu1 %v639_v18, %s2237_s21  ;;  %v975_v23 = vpop.permute.xlu0 %974  ;;  %v2472_v24 = vsel %vm988_vm3, %v977_v22, %v979_v6  ;;  %v2481_v28 = vpop.permute.xlu2 %1496 }
  0x9b   : > { %v2476_v26 = vsel %vm988_vm3, %v2432_v0, %v975_v23  ;;  %v2479_v27 = vsel %vm988_vm3, %v975_v23, %v977_v22  ;;  %v439_v29 = vpop.f32.mrf.mxu1 }
  0x9c   : > { %651 = vrot.lane.b32.xlu2 %v640_v21, %s2237_s21  ;;  %588 = vrot.lane.b32.xlu0 %v416_v19, %s2235_s17  ;;  %v687_v31 = vrot.slane %v439_v29, 4 }
  0x9f   : > { %v462_v38 = vpop.f32.mrf.mxu2 }
  0xa0   : > { %v2485_v32 = vpop.f32.mrf.mxu0  ;;  %v688_v41 = vrot.slane %v462_v38, 4 }
  0xa1   : > { %v2488_v33 = vpop.permute.xlu1 %982  ;;  %v485_v45 = vpop.f32.mrf.mxu3  ;;  %v641_v49 = vrot.slane %v2485_v32, 4 }
  0xa2   : > { %694 = vrot.lane.b32.xlu1 %v686_v30, %s2233_s9  ;;  %3243 = vst [vmem:[#allocation4_spill] sm:$0xff] %v2488_v33  ;;  %v2490_v34 = vpop.permute.xlu0 %980  ;;  %v1329_v37 = vpop.permute.xlu2 %1328  ;;  %v689_v59 = vrot.slane %v485_v45, 4 }
  0xa3   : > { %3244 = vst [vmem:[#allocation5_spill] sm:$0xff] %v2490_v34  ;;  %v2494_v35 = vsel %vm988_vm3, %v979_v6, %v2490_v34  ;;  %v2498_v39 = vpop.f32.mrf.mxu1 }
  0xa4   : > { %3245 = vst [vmem:[#allocation6_spill] sm:$0xff] %v2494_v35  ;;  %696 = vrot.lane.b32.xlu2 %v687_v31, %s2233_s9  ;;  %590 = vrot.lane.b32.xlu0 %v439_v29, %s2235_s17  ;;  %v642_v21 = vrot.slane %v2498_v39, 4 }
  0xa7   : > { %v2527_v58 = vpop.f32.mrf.mxu2 }
  0xa8   : > { %v508_v42 = vpop.f32.mrf.mxu0  ;;  %v643_v2 = vrot.slane %v2527_v58, 4 }
  0xa9   : > { %v1503_v43 = vpop.permute.xlu1 %1502  ;;  %v2525_v57 = vpop.f32.mrf.mxu3  ;;  %v690_v22 = vrot.slane %v508_v42, 4 }
  0xaa   : > { %592 = vrot.lane.b32.xlu1 %v462_v38, %s2235_s17  ;;  %v1501_v44 = vpop.permute.xlu0 %1500  ;;  %v1218_v48 = vpop.permute.xlu2 %1217  ;;  %v644_v1 = vrot.slane %v2525_v57, 4  ;;  %v1321_v38 = vperm.slane %v2377_v36, 5 }
  0xab   : > { %v2503_v46 = vsel %vm338_vm2, %v2458_v15, %v1501_v44  ;;  %v2506_v47 = vsel %vm338_vm2, %v1501_v44, %v1503_v43  ;;  %v531_v50 = vpop.f32.mrf.mxu1 }
  0xac   : > { %698 = vrot.lane.b32.xlu0 %v688_v41, %s2233_s9  ;;  %596 = vrot.lane.b32.xlu2 %v508_v42, %s2235_s17  ;;  %v691_v23 = vrot.slane %v531_v50, 4 }
  0xb1   : > { %v2512_v51 = vpop.permute.xlu1 %1326 }
  0xb2   : > { %594 = vrot.lane.b32.xlu1 %v485_v45, %s2235_s17  ;;  %v1505_v52 = vpop.permute.xlu0 %1504  ;;  %v2516_v54 = vsel %vm1041_vm4, %v2512_v51, %v1329_v37  ;;  %v2521_v56 = vpop.permute.xlu2 %1332 }
  0xb3   : > { %v2519_v55 = vsel %vm338_vm2, %v1503_v43, %v1505_v52  ;;  %v554_v43 = vpop.f32.mrf.mxu2 }
  0xb4   : > { %653 = vrot.lane.b32.xlu0 %v641_v49, %s2237_s21  ;;  %598 = vrot.lane.b32.xlu2 %v531_v50, %s2235_s17  ;;  %v1081_v50 = vperm.slane %v2412_v53, 4 }
  0xb9   : > { %v2534_v8 = vpop.permute.xlu1 %1215 }
  0xba   : > { %700 = vrot.lane.b32.xlu1 %v689_v59, %s2233_s9  ;;  %v2532_v6 = vpop.permute.xlu0 %1330  ;;  %v2542_v11 = vsel %vm604_vm5, %v2534_v8, %v1218_v48  ;;  %v1507_v18 = vpop.permute.xlu2 %1506 }
  0xbb   : > { %v2538_v10 = vsel %vm1041_vm4, %v1329_v37, %v2532_v6  ;;  %v2547_v19 = vsel %vm338_vm2, %v1505_v52, %v1507_v18  ;;  %v577_v37 = vpop.f32.mrf.mxu3  ;;  %v1322_v52 = vperm.slane %v2377_v36, 6 }
  0xbc   : > { %659 = vrot.lane.b32.xlu0 %v644_v1, %s2237_s21  ;;  %657 = vrot.lane.b32.xlu2 %v643_v2, %s2237_s21  ;;  %3246 = vst [vmem:[#allocation7_spill] sm:$0xff] %v2547_v19  ;;  %v693_v42 = vrot.slane %v577_v37, 4  ;;  %v692_v2 = vrot.slane %v554_v43, 4 }
  0xc1   : > { %v2560_v41 = vpop.permute.xlu1 %1324 }
  0xc2   : > { %655 = vrot.lane.b32.xlu1 %v642_v21, %s2237_s21  ;;  %v2551_v29 = vpop.permute.xlu0 %1219  ;;  %v1088_v31 = vpop.permute.xlu2 %1087 }
  0xc3   : > { %3247 = vst [vmem:[#allocation8_spill] sm:$0xff] %v2551_v29  ;;  %v2555_v30 = vsel %vm604_vm5, %v1218_v48, %v2551_v29 }
  0xc4   : > { %704 = vrot.lane.b32.xlu0 %v691_v23, %s2233_s9  ;;  %702 = vrot.lane.b32.xlu2 %v690_v22, %s2233_s9  ;;  %v1323_v23 = vperm.slane %v2377_v36, 7  ;;  %v1083_v36 = vperm.slane %v2412_v53, 6 }
  0xc9   : > { %v2573_v49 = vpop.permute.xlu1 %1221 }
  0xca   : > { %1334 = vrot.lane.b32.xlu1 %v1321_v38, %s2234_s14  ;;  %v2563_v44 = vpop.permute.xlu0 %1213  ;;  %v2565_v45 = vpop.permute.xlu2 %1085  ;;  %3248 = vst [vmem:[#allocation9_spill] sm:$0xff] %v2573_v49  ;;  %v1211_v38 = vperm.slane %v2386_v40, 6  ;;  %v358_v49 = vld.sshfl [vmem:[#allocation1 + $0x18] sm:$0xff pattern:$0x75316420] }
  0xcb   : > { %v2571_v48 = vsel %vm1101_vm6, %v2565_v45, %v1088_v31  ;;  %374 = vst [vmem:[#allocation2 + $0x20] sm:$0xf] %v358_v49 }
  0xcc   : > { %600 = vrot.lane.b32.xlu0 %v554_v43, %s2235_s17  ;;  %708 = vrot.lane.b32.xlu2 %v693_v42, %s2233_s9  ;;  %v1210_v42 = vperm.slane %v2386_v40, 5  ;;  %v1212_v43 = vperm.slane %v2386_v40, 7  ;;  %v2609_v40 = vld [vmem:[#allocation2 + $0x48] sm:$0xff] }
  0xcd   : > { %3251 = vst [vmem:[#allocation12_spill] sm:$0xff] %v2609_v40 }
  0xd1   : > { %v1511_v21 = vpop.permute.xlu1 %1510 }
  0xd2   : > { %602 = vrot.lane.b32.xlu1 %v577_v37, %s2235_s17  ;;  %v1509_v59 = vpop.permute.xlu0 %1508 }
  0xd3   : > { %v2579_v1 = vsel %vm338_vm2, %v1507_v18, %v1509_v59  ;;  %v2584_v22 = vsel %vm338_vm2, %v1509_v59, %v1511_v21  ;;  %v970_v59 = vperm.slane %v2346_v25, 6 }
  0xd4   : > { %3249 = vst [vmem:[#allocation10_spill] sm:$0xff] %v2579_v1  ;;  %1093 = vrot.lane.b32.xlu0 %v1081_v50, %s2236_s20  ;;  %1336 = vrot.lane.b32.xlu2 %v1322_v52, %s2234_s14  ;;  %v1082_v50 = vperm.slane %v2412_v53, 5  ;;  %v971_v52 = vperm.slane %v2346_v25, 7 }
  0xd5   : > { %3250 = vst [vmem:[#allocation11_spill] sm:$0xff] %v2584_v22 }
  0xda   : > { %706 = vrot.lane.b32.xlu1 %v692_v2, %s2233_s9  ;;  %v2589_v37 = vpop.permute.xlu0 %1089  ;;  %v1536_v2 = vmul.f32 %v1511_v21, %v2609_v40  ;;  %v357_v21 = vld.sshfl [vmem:[#allocation1 + $0x10] sm:$0xff pattern:$0x75316420] }
  0xdb   : > { %v2593_v18 = vsel %vm1101_vm6, %v1088_v31, %v2589_v37  ;;  %v1084_v31 = vperm.slane %v2412_v53, 7  ;;  %v355_v53 = vld.sshfl [vmem:[#allocation1] sm:$0xff pattern:$0x75316420]  ;;  %373 = vst [vmem:[#allocation2 + $0x18] sm:$0xf] %v357_v21 }
  0xdc   : > { %1338 = vrot.lane.b32.xlu0 %v1323_v23, %s2234_s14  ;;  %1225 = vrot.lane.b32.xlu2 %v1211_v38, %s2235_s17  ;;  %371 = vst [vmem:[#allocation2 + $0x8] sm:$0xf] %v355_v53  ;;  %v359_v21 = vld.sshfl [vmem:[#allocation1 + $0x20] sm:$0xff pattern:$0x75316420] }
  0xdd   : > { %375 = vst [vmem:[#allocation2 + $0x28] sm:$0xf] %v359_v21 }
  0xe2   : > { %1223 = vrot.lane.b32.xlu1 %v1210_v42, %s2235_s17  ;;  %v2619_v42 = vpop.permute.xlu1 %1091 }
  0xe4   : > { %1227 = vrot.lane.b32.xlu0 %v1212_v43, %s2235_s17  ;;  %1097 = vrot.lane.b32.xlu2 %v1083_v36, %s2236_s20  ;;  %v356_v43 = vld.sshfl [vmem:[#allocation1 + $0x8] sm:$0xff pattern:$0x75316420] }
  0xe5   : > { %372 = vst [vmem:[#allocation2 + $0x10] sm:$0xf] %v356_v43 }
  0xea   : > { %1095 = vrot.lane.b32.xlu1 %v1082_v50, %s2236_s20 }
  0xec   : > { %1099 = vrot.lane.b32.xlu0 %v1084_v31, %s2236_s20  ;;  %986 = vrot.lane.b32.xlu2 %v971_v52, %s2232_s26 }
  0xed   : > { %v646_v23 = vpop.permute.xlu2 %645 }
  0xee   : > { %v677_v53 = vsel %vm661_vm7, 0.0, %v646_v23 }
  0xf2   : > { %984 = vrot.lane.b32.xlu1 %v970_v59, %s2232_s26 }
  0xf4   : > { %1562 = vrot.lane.b32.xlu0 %v1536_v2, %s2231_s13  ;;  %1450 = vrot.lane.b32.xlu2 %v2609_v40, %s2239_s22 }
  0xf6   : > { %v2617_v38 = vpop.permute.xlu2 %651 }
  0xfe   : > { %v697_v25 = vpop.permute.xlu2 %696 }
 0x106   : > { %v648_v36 = vpop.permute.xlu0 %647  ;;  %v2624_v59 = vpop.permute.xlu2 %596 }
 0x10c   : > { %v2621_v50 = vpop.permute.xlu1 %649 }
 0x10e   : > { %v589_v31 = vpop.permute.xlu0 %588 }
 0x10f   : > { %v620_v52 = vsel %vm604_vm5, 0.0, %v589_v31 }
 0x110   : > { %v621_v2 = vadd.f32 %v620_v52, %v2443_v7  ;;  %v662_v7 = vsel %vm661_vm7, %v646_v23, %v648_v36  ;;  %v2633_v52 = vpop.permute.xlu2 %598 }
 0x112   : > { %v678_v16 = vadd.f32 %v677_v53, %v621_v2 }
 0x114   : > { %v695_v34 = vpop.permute.xlu1 %694 }
 0x115   : > { %v725_v43 = vsel %vm338_vm2, 0.0, %v695_v34  ;;  %v710_v19 = vsel %vm338_vm2, %v695_v34, %v697_v25 }
 0x116   : > { %v726_v40 = vadd.f32 %v725_v43, %v678_v16  ;;  %v591_v29 = vpop.permute.xlu0 %590 }
 0x117   : > { %v605_v35 = vsel %vm604_vm5, %v589_v31, %v591_v29 }
 0x118   : > { %v740_v33 = vadd.f32 %v2424_v61, %v726_v40  ;;  %v622_v22 = vadd.f32 %v605_v35, %v2446_v9  ;;  %v360_v9 = vld.sshfl [vmem:[#allocation1 + $0x28] sm:$0xff pattern:$0x75316420]  ;;  %v663_v35 = vsel %vm661_vm7, %v648_v36, %v2621_v50 }
 0x119   : > { %376 = vst [vmem:[#allocation2 + $0x30] sm:$0xf] %v360_v9 }
 0x11a   : > { %v756_v2 = vrot.slane %v740_v33, 4  ;;  %v679_v53 = vadd.f32 %v662_v7, %v622_v22  ;;  %v3252_v7 = vmov 0.0  }
 0x11c   : > { %772 = vst [vmem:[#allocation2 + $0x8] sm:$0xf0] %v756_v2  ;;  %v727_v16 = vadd.f32 %v710_v19, %v679_v53  ;;  %v593_v43 = vpop.permute.xlu1 %592  ;;  %v2642_v19 = vpop.permute.xlu2 %657  ;;  %v1005_v53 = vmul.f32 0.0, %v2432_v0 }
 0x11d   : > { %v606_v1 = vsel %vm604_vm5, %v591_v29, %v593_v43  ;;  %v832_v29 = vmul.f32 0.0, %v2426_v62 }
 0x11e   : > { %v741_v49 = vadd.f32 %v2424_v61, %v727_v16  ;;  %v623_v40 = vadd.f32 %v606_v1, %v2464_v17  ;;  %v699_v31 = vpop.permute.xlu0 %698 }
 0x11f   : > { %v711_v22 = vsel %vm338_vm2, %v697_v25, %v699_v31 }
 0x120   : > { %v757_v23 = vrot.slane %v741_v49, 4  ;;  %v680_v33 = vadd.f32 %v663_v35, %v623_v40  ;;  %v2660_v35 = vmul.f32 0.0, %v2565_v45 }
 0x122   : > { %773 = vst [vmem:[#allocation2 + $0x10] sm:$0xf0] %v757_v23  ;;  %v728_v34 = vadd.f32 %v711_v22, %v680_v33 }
 0x123   : > { %v2645_v21 = vld [vmem:[#allocation2 + $0x8] sm:$0xff] }
 0x124   : > { %v742_v17 = vadd.f32 %v2424_v61, %v728_v34  ;;  %v595_v1 = vpop.permute.xlu1 %594  ;;  %v2062_v2 = vpack.i.bf16 %v2645_v21, %v3252_v7  ;;  %v833_v36 = vmul.f32 %v2645_v21, %v2430_v63  ;;  %v1006_v25 = vmul.f32 %v2476_v26, %v2645_v21 }
 0x125   : > { %v607_v16 = vsel %vm604_vm5, %v593_v43, %v595_v1  ;;  %v608_v62 = vsel %vm604_vm5, %v595_v1, %v2624_v59  ;;  %v2664_v63 = vmul.f32 %v2571_v48, %v2645_v21  ;;  %v1229_v43 = vsel %vm604_vm5, %v2563_v44, %v2534_v8 }
 0x126   : > { %v758_v49 = vrot.slane %v742_v17, 4  ;;  %2063 = vrot.lane.b32.xlu0 %v2062_v2, %s2237_s21  ;;  %v654_v40 = vpop.permute.xlu0 %653  ;;  %v2072_v9 = vpack.i.bf16 %v833_v36, %v832_v29  ;;  %v2097_v23 = vpack.i.bf16 %v1006_v25, %v1005_v53  ;;  %v624_v0 = vadd.f32 %v607_v16, %v2467_v20  ;;  %v703_v29 = vpop.permute.xlu2 %702 }
 0x127   : > { %v625_v26 = vadd.f32 %v608_v62, %v2485_v32  ;;  %v665_v45 = vsel %vm661_vm7, %v2617_v38, %v654_v40  ;;  %v2092_v48 = vpack.i.bf16 %v2664_v63, %v2660_v35  ;;  %v664_v32 = vsel %vm661_vm7, %v2621_v50, %v2617_v38 }
 0x128   : > { %774 = vst [vmem:[#allocation2 + $0x18] sm:$0xf0] %v758_v49  ;;  %2073 = vrot.lane.b32.xlu1 %v2072_v9, %s2233_s9  ;;  %v681_v8 = vadd.f32 %v664_v32, %v624_v0  ;;  %v1245_v1 = vmul.f32 %v2563_v44, %v2645_v21  ;;  %v1512_v7 = vsel %vm338_vm2, %v2481_v28, %v2458_v15 }
 0x129   : > { %v2674_v33 = vld [vmem:[#allocation2 + $0x10] sm:$0xff]  ;;  %v682_v34 = vadd.f32 %v665_v45, %v625_v26  ;;  %v1104_v44 = vsel %vm1101_vm6, %v2589_v37, %v2619_v42  ;;  %v609_v15 = vsel %vm604_vm5, %v2624_v59, %v2633_v52  ;;  %v1528_v9 = vmul.f32 %v2481_v28, %v2645_v21 }
 0x12a   : > { %v2067_v22 = vpack.i.bf16 %v2674_v33, %v2645_v21  ;;  %v1246_v20 = vmul.f32 %v2674_v33, %v1229_v43  ;;  %v1529_v16 = vmul.f32 %v1512_v7, %v2674_v33  ;;  %v2719_v59 = vmul.f32 %v2674_v33, %v2593_v18  ;;  %v361_v7 = vld.sshfl [vmem:[#allocation1 + $0x30] sm:$0xff pattern:$0x75316420] }
 0x12b   : > { %v2726_v26 = vmul.f32 %v2674_v33, %v2479_v27  ;;  %377 = vst [vmem:[#allocation2 + $0x38] sm:$0xf] %v361_v7 }
 0x12c   : > { %v701_v17 = vpop.permute.xlu1 %700  ;;  %2068 = vrot.lane.b32.xlu2 %v2067_v22, %s2239_s22  ;;  %v2087_v50 = vpack.i.bf16 %v1246_v20, %v1245_v1  ;;  %v2077_v45 = vpack.i.bf16 %v1529_v16, %v1528_v9  ;;  %v626_v22 = vadd.f32 %v609_v15, %v2498_v39 }
 0x12d   : > { %v712_v2 = vsel %vm338_vm2, %v699_v31, %v701_v17  ;;  %v713_v36 = vsel %vm338_vm2, %v701_v17, %v703_v29 }
 0x12e   : > { %v729_v25 = vadd.f32 %v712_v2, %v681_v8  ;;  %v730_v53 = vadd.f32 %v713_v36, %v682_v34  ;;  %2098 = vrot.lane.b32.xlu0 %v2097_v23, %s2234_s14  ;;  %v2693_v38 = vpop.permute.xlu0 %659  ;;  %v2711_v23 = vmul.f32 %v2674_v33, %v2435_v3  ;;  %v362_v34 = vld.sshfl [vmem:[#allocation1 + $0x38] sm:$0xff pattern:$0x75316420] }
 0x12f   : > { %v2702_v31 = vld [vmem:[#allocation2 + $0x18] sm:$0xff]  ;;  %378 = vst [vmem:[#allocation2 + $0x40] sm:$0xf] %v362_v34 }
 0x130   : > { %v743_v62 = vadd.f32 %v2424_v61, %v729_v25  ;;  %v744_v49 = vadd.f32 %v2424_v61, %v730_v53  ;;  %2088 = vrot.lane.b32.xlu1 %v2087_v50, %s2236_s20  ;;  %v2715_v37 = vmul.f32 %v2702_v31, %v2438_v4  ;;  %v2722_v0 = vmul.f32 %v1104_v44, %v2702_v31 }
 0x131   : > { %v2730_v3 = vmul.f32 %v2472_v24, %v2702_v31  ;;  %v1340_v24 = vsel %vm1041_vm4, %v2560_v41, %v2512_v51  ;;  %v2102_v39 = vpack.i.bf16 %v2702_v31, %v2674_v33  ;;  %v1356_v51 = vmul.f32 %v2560_v41, %v2645_v21 }
 0x132   : > { %v759_v28 = vrot.slane %v743_v62, 4  ;;  %v760_v43 = vrot.slane %v744_v49, 4  ;;  %v2112_v4 = vpack.i.bf16 %v2715_v37, %v2711_v23  ;;  %v2132_v18 = vpack.i.bf16 %v2722_v0, %v2719_v59 }
 0x133   : > { %v2137_v27 = vpack.i.bf16 %v2730_v3, %v2726_v26  ;;  %v1357_v1 = vmul.f32 %v2674_v33, %v1340_v24  ;;  %v1530_v50 = vmul.f32 %v2503_v46, %v2702_v31  ;;  %v1358_v15 = vmul.f32 %v2516_v54, %v2702_v31 }
 0x134   : > { %775 = vst [vmem:[#allocation2 + $0x20] sm:$0xf0] %v759_v28  ;;  %v656_v20 = vpop.permute.xlu1 %655  ;;  %2078 = vrot.lane.b32.xlu2 %v2077_v45, %s2231_s13  ;;  %v1247_v9 = vmul.f32 %v2542_v11, %v2702_v31  ;;  %v668_v24 = vsel %vm661_vm7, %v2642_v19, %v2693_v38 }
 0x135   : > { %776 = vst [vmem:[#allocation2 + $0x28] sm:$0xf0] %v760_v43  ;;  %v666_v32 = vsel %vm661_vm7, %v654_v40, %v656_v20  ;;  %v2082_v25 = vpack.i.bf16 %v1357_v1, %v1356_v51  ;;  %v667_v35 = vsel %vm661_vm7, %v656_v20, %v2642_v19 }
 0x136   : > { %v683_v8 = vadd.f32 %v666_v32, %v626_v22  ;;  %v705_v17 = vpop.permute.xlu0 %704 }
 0x137   : > { %v714_v2 = vsel %vm338_vm2, %v703_v29, %v705_v17 }
 0x138   : > { %v731_v36 = vadd.f32 %v714_v2, %v683_v8  ;;  %2103 = vrot.lane.b32.xlu1 %v2102_v39, %s2237_s21 }
 0x13a   : > { %v745_v40 = vadd.f32 %v2424_v61, %v731_v36 }
 0x13b   : > { %v2752_v53 = vld [vmem:[#allocation2 + $0x20] sm:$0xff] }
 0x13c   : > { %v761_v16 = vrot.slane %v745_v40, 4  ;;  %v2756_v44 = vpop.permute.xlu1 %1334  ;;  %2083 = vrot.lane.b32.xlu2 %v2082_v25, %s2232_s26  ;;  %v1531_v29 = vmul.f32 %v2506_v47, %v2752_v53  ;;  %v1359_v41 = vmul.f32 %v2752_v53, %v2538_v10  ;;  %v2765_v62 = vld [vmem:[#allocation2 + $0x28] sm:$0xff]  ;;  %v836_v49 = vmul.f32 %v2752_v53, %v2441_v5 }
 0x13d   : > { %v837_v46 = vmul.f32 %v2450_v12, %v2765_v62  ;;  %v2107_v47 = vpack.i.bf16 %v2752_v53, %v2702_v31  ;;  %v1248_v10 = vmul.f32 %v2752_v53, %v2555_v30  ;;  %v709_v12 = vpop.permute.xlu2 %708  ;;  %v2142_v1 = vpack.i.bf16 %v2765_v62, %v2752_v53 }
 0x13e   : > { %777 = vst [vmem:[#allocation2 + $0x30] sm:$0xf0] %v761_v16  ;;  %v2117_v23 = vpack.i.bf16 %v1531_v29, %v1530_v50  ;;  %v2122_v54 = vpack.i.bf16 %v1359_v41, %v1358_v15  ;;  %v601_v28 = vpop.permute.xlu0 %600 }
 0x13f   : > { %v2147_v37 = vpack.i.bf16 %v837_v46, %v836_v49  ;;  %v2127_v5 = vpack.i.bf16 %v1248_v10, %v1247_v9  ;;  %v610_v11 = vsel %vm604_vm5, %v2633_v52, %v601_v28  ;;  %v3253_v46 = vld [vmem:[#allocation10_spill] sm:$0xff] }
 0x140   : > { %2108 = vrot.lane.b32.xlu1 %v2107_v47, %s2239_s22  ;;  %2118 = vrot.lane.b32.xlu0 %v2117_v23, %s2231_s13  ;;  %v627_v30 = vadd.f32 %v610_v11, %v2527_v58 }
 0x144   : > { %v603_v43 = vpop.permute.xlu1 %602  ;;  %2093 = vrot.lane.b32.xlu2 %v2092_v48, %s2235_s17  ;;  %v684_v48 = vadd.f32 %v667_v35, %v627_v30 }
 0x145   : > { %v611_v45 = vsel %vm604_vm5, %v601_v28, %v603_v43  ;;  %v2795_v63 = vpop.permute.xlu2 %1336  ;;  %v2813_v2 = vld [vmem:[#allocation2 + $0x30] sm:$0xff] }
 0x146   : > { %v628_v22 = vadd.f32 %v611_v45, %v2525_v57  ;;  %v1345_v15 = vsel %vm1041_vm4, %v2756_v44, %v2795_v63  ;;  %v3256_v28 = vld [vmem:[#allocation4_spill] sm:$0xff]  ;;  %v3257_v45 = vld [vmem:[#allocation6_spill] sm:$0xff] }
 0x147   : > { %v1009_v30 = vmul.f32 %v2752_v53, %v3257_v45 }
 0x148   : > { %2123 = vrot.lane.b32.xlu1 %v2122_v54, %s2232_s26  ;;  %2148 = vrot.lane.b32.xlu0 %v2147_v37, %s2233_s9  ;;  %v685_v32 = vadd.f32 %v668_v24, %v628_v22  ;;  %v3254_v54 = vld [vmem:[#allocation7_spill] sm:$0xff] }
 0x149   : > { %v1533_v10 = vmul.f32 %v3254_v54, %v2813_v2  ;;  %v3255_v37 = vld [vmem:[#allocation11_spill] sm:$0xff] }
 0x14c   : > { %v707_v52 = vpop.permute.xlu1 %706  ;;  %2113 = vrot.lane.b32.xlu2 %v2112_v4, %s2233_s9 }
 0x14d   : > { %v715_v57 = vsel %vm338_vm2, %v705_v17, %v707_v52  ;;  %v716_v58 = vsel %vm338_vm2, %v707_v52, %v709_v12  ;;  %v1226_v7 = vpop.permute.xlu2 %1225  ;;  %v1094_v17 = vpop.permute.xlu0 %1093 }
 0x14e   : > { %v732_v34 = vadd.f32 %v715_v57, %v684_v48  ;;  %v733_v8 = vadd.f32 %v716_v58, %v685_v32  ;;  %v1105_v51 = vsel %vm1101_vm6, %v2619_v42, %v1094_v17  ;;  %v3258_v32 = vld [vmem:[#allocation9_spill] sm:$0xff]  ;;  %v3259_v57 = vld [vmem:[#allocation8_spill] sm:$0xff] }
 0x14f   : > { %v1122_v42 = vmul.f32 %v2752_v53, %v1105_v51 }
 0x150   : > { %v746_v39 = vadd.f32 %v2424_v61, %v732_v34  ;;  %v747_v38 = vadd.f32 %v2424_v61, %v733_v8  ;;  %2128 = vrot.lane.b32.xlu1 %v2127_v5, %s2236_s20  ;;  %v822_v61 = vsel %vm815_vm1, %v2422_v60, %v2456_v14  ;;  %v838_v60 = vmul.f32 %v2813_v2, %v2454_v13 }
 0x152   : > { %v762_v19 = vrot.slane %v746_v39, 4  ;;  %v763_v20 = vrot.slane %v747_v38, 4 }
 0x154   : > { %778 = vst [vmem:[#allocation2 + $0x38] sm:$0xf0] %v762_v19  ;;  %v1224_v4 = vpop.permute.xlu1 %1223  ;;  %2143 = vrot.lane.b32.xlu2 %v2142_v1, %s2237_s21 }
 0x155   : > { %779 = vst [vmem:[#allocation2 + $0x40] sm:$0xf0] %v763_v20  ;;  %v1098_v16 = vpop.permute.xlu2 %1097  ;;  %v2835_v41 = vpop.permute.xlu0 %1338  ;;  %v1234_v24 = vsel %vm604_vm5, %v1224_v4, %v1226_v7  ;;  %v1233_v8 = vsel %vm604_vm5, %v3258_v32, %v1224_v4 }
 0x156   : > { %v1250_v20 = vmul.f32 %v2813_v2, %v1233_v8 }
 0x158   : > { %2133 = vrot.lane.b32.xlu1 %v2132_v18, %s2235_s17  ;;  %v1343_v18 = vsel %vm1041_vm4, %v2532_v6, %v2521_v56  ;;  %v1532_v6 = vmul.f32 %v2519_v55, %v2765_v62 }
 0x159   : > { %v1360_v47 = vmul.f32 %v1343_v18, %v2765_v62 }
 0x15b   : > { %v2815_v36 = vld [vmem:[#allocation2 + $0x38] sm:$0xff] }
 0x15c   : > { %v2819_v40 = vld [vmem:[#allocation2 + $0x40] sm:$0xff]  ;;  %v1096_v25 = vpop.permute.xlu1 %1095  ;;  %v839_v50 = vmul.f32 %v2815_v36, %v822_v61  ;;  %v1534_v9 = vmul.f32 %v3253_v46, %v2815_v36  ;;  %v1362_v23 = vmul.f32 %v1345_v15, %v2815_v36  ;;  %v2162_v35 = vpack.i.bf16 %v2815_v36, %v2813_v2 }
 0x15d   : > { %v1107_v59 = vsel %vm1101_vm6, %v1096_v25, %v1098_v16  ;;  %v2172_v0 = vpack.i.bf16 %v2813_v2, %v2819_v40  ;;  %v1535_v5 = vmul.f32 %v3255_v37, %v2819_v40  ;;  %v840_v11 = vmul.f32 %v2819_v40, %v2456_v14  ;;  %v1228_v48 = vpop.permute.xlu0 %1227  ;;  %v987_v1 = vpop.permute.xlu2 %986 }
 0x15e   : > { %v1124_v29 = vmul.f32 %v2813_v2, %v1107_v59  ;;  %v2177_v13 = vpack.i.bf16 %v839_v50, %v838_v60  ;;  %v2182_v26 = vpack.i.bf16 %v1534_v9, %v1532_v6  ;;  %v2187_v3 = vpack.i.bf16 %v1362_v23, %v1360_v47  ;;  %v3260_v60 = vld [vmem:[#allocation12_spill] sm:$0xff] }
 0x15f   : > { %2173 = vrot.lane.b32.xlu2 %v2172_v0, %s2239_s22  ;;  %v2197_v55 = vpack.i.bf16 %v1533_v10, %v1535_v5  ;;  %v1251_v52 = vmul.f32 %v1234_v24, %v2815_v36  ;;  %v1232_v14 = vsel %vm604_vm5, %v3259_v57, %v3258_v32  ;;  %v1235_v39 = vsel %vm604_vm5, %v1226_v7, %v1228_v48 }
 0x160   : > { %2138 = vrot.lane.b32.xlu1 %v2137_v27, %s2234_s14  ;;  %v2152_v49 = vpack.i.bf16 %v1124_v29, %v1122_v42  ;;  %v1249_v58 = vmul.f32 %v1232_v14, %v2765_v62  ;;  %v2167_v38 = vpack.i.bf16 %v2815_v36, %v2765_v62  ;;  %v1252_v19 = vmul.f32 %v2819_v40, %v1235_v39 }
 0x161   : > { %v1106_v7 = vsel %vm1101_vm6, %v1094_v17, %v1096_v25  ;;  %v1253_v18 = vmul.f32 %v3260_v60, %v1228_v48  ;;  %v1346_v17 = vsel %vm1041_vm4, %v2795_v63, %v2835_v41  ;;  %v1013_v15 = vmul.f32 %v2819_v40, %v987_v1 }
 0x162   : > { %2153 = vrot.lane.b32.xlu0 %v2152_v49, %s2235_s17  ;;  %v2192_v34 = vpack.i.bf16 %v1251_v52, %v1249_v58  ;;  %v2207_v51 = vpack.i.bf16 %v1250_v20, %v1252_v19  ;;  %v1123_v59 = vmul.f32 %v1106_v7, %v2765_v62  ;;  %v1363_v25 = vmul.f32 %v1346_v17, %v2819_v40 }
 0x163   : > { %v1364_v47 = vmul.f32 %v3260_v60, %v2835_v41  ;;  %v3261_v41 = vld [vmem:[#allocation5_spill] sm:$0xff] }
 0x164   : > { %v985_v27 = vpop.permute.xlu1 %984 }
 0x165   : > { %v994_v12 = vsel %vm988_vm3, %v3256_v28, %v985_v27  ;;  %v1100_v61 = vpop.permute.xlu0 %1099  ;;  %v2889_v0 = vpop.permute.xlu2 %1450  ;;  %v995_v54 = vsel %vm988_vm3, %v985_v27, %v987_v1 }
 0x166   : > { %v1011_v43 = vmul.f32 %v2813_v2, %v994_v12  ;;  %v1108_v50 = vsel %vm1101_vm6, %v1098_v16, %v1100_v61  ;;  %v1344_v16 = vsel %vm1041_vm4, %v2521_v56, %v2756_v44  ;;  %v1126_v9 = vmul.f32 %v2819_v40, %v1100_v61 }
 0x167   : > { %866 = vrot.lane.b32.xlu2 %v840_v11, %s2233_s9  ;;  %v1125_v4 = vmul.f32 %v2815_v36, %v1108_v50  ;;  %v1361_v29 = vmul.f32 %v1344_v16, %v2813_v2  ;;  %v1012_v5 = vmul.f32 %v2815_v36, %v995_v54 }
 0x168   : > { %v2157_v22 = vpack.i.bf16 %v1011_v43, %v1009_v30 }
 0x169   : > { %v2212_v42 = vpack.i.bf16 %v1123_v59, %v1125_v4  ;;  %v2202_v6 = vpack.i.bf16 %v1361_v29, %v1363_v25 }
 0x16a   : > { %2158 = vrot.lane.b32.xlu1 %v2157_v22, %s2234_s14  ;;  %2163 = vrot.lane.b32.xlu0 %v2162_v35, %s2237_s21  ;;  %v1661_v22 = vld [vmem:[%s3232_s5] sm:$0xf] }
 0x16d   : > { %v2920_v10 = vpop.permute.xlu0 %1562 }
 0x16f   : > { %2193 = vrot.lane.b32.xlu2 %v2192_v34, %s2236_s20 }
 0x172   : > { %926 = vrot.lane.b32.xlu1 %v2819_v40, %s2237_s21  ;;  %2168 = vrot.lane.b32.xlu0 %v2167_v38, %s2239_s22 }
 0x177   : > { %2208 = vrot.lane.b32.xlu2 %v2207_v51, %s2236_s20  ;;  %v2967_v51 = vld [vmem:[%s3231_s4] sm:$0xf] }
 0x17a   : > { %2178 = vrot.lane.b32.xlu1 %v2177_v13, %s2233_s9  ;;  %2183 = vrot.lane.b32.xlu0 %v2182_v26, %s2231_s13  ;;  %v993_v26 = vsel %vm988_vm3, %v3261_v41, %v3256_v28 }
 0x17b   : > { %v1010_v12 = vmul.f32 %v993_v26, %v2765_v62 }
 0x17d   : > { %v2217_v43 = vpack.i.bf16 %v1010_v12, %v1012_v5 }
 0x17f   : > { %2213 = vrot.lane.b32.xlu2 %v2212_v42, %s2235_s17 }
 0x182   : > { %1279 = vrot.lane.b32.xlu1 %v1253_v18, %s2236_s20  ;;  %2188 = vrot.lane.b32.xlu0 %v2187_v3, %s2232_s26 }
 0x186   : > { %v2904_v13 = vpop.permute.xlu2 %2068 }
 0x187   : > { %1039 = vrot.lane.b32.xlu2 %v1013_v15, %s2234_s14  ;;  %v2071_v49 = vunpack.i.h.bf16 %v2904_v13  ;;  %v2070_v46 = vunpack.i.l.bf16 %v2904_v13 }
 0x189   : > { %v1453_v37 = vsel %vm1452_vm8, %v2070_v46, %v2071_v49 }
 0x18a   : > { %2203 = vrot.lane.b32.xlu1 %v2202_v6, %s2232_s26  ;;  %2198 = vrot.lane.b32.xlu0 %v2197_v55, %s2231_s13 }
 0x18e   : > { %v2909_v63 = vpop.permute.xlu2 %2078 }
 0x18f   : > { %v2081_v56 = vunpack.i.h.bf16 %v2909_v63  ;;  %v2080_v44 = vunpack.i.l.bf16 %v2909_v63 }
 0x191   : > { %v1564_v23 = vsel %vm815_vm1, %v2080_v44, %v2081_v56 }
 0x192   : > { %1152 = vrot.lane.b32.xlu1 %v1126_v9, %s2235_s17  ;;  %1678 = vmatpush.msra.mxu0 %v1564_v23 }
 0x193   : > { %1390 = vrot.lane.b32.xlu0 %v1364_v47, %s2232_s26 }
 0x194   : > { %1679 = vmatpush.msra.mxu0 %v1453_v37 }
 0x196   : > { %v2084_v3 = vpop.permute.xlu2 %2083 }
 0x197   : > { %v2086_v27 = vunpack.i.h.bf16 %v2084_v3  ;;  %v2085_v55 = vunpack.i.l.bf16 %v2084_v3 }
 0x198   : > { %v2933_v45 = vpop.permute.xlu0 %2063 }
 0x199   : > { %v1392_v11 = vsel %vm988_vm3, %v2085_v55, %v2086_v27  ;;  %v2066_v8 = vunpack.i.h.bf16 %v2933_v45  ;;  %v2065_v39 = vunpack.i.l.bf16 %v2933_v45 }
 0x19a   : > { %v2935_v30 = vpop.permute.xlu1 %2073  ;;  %1680 = vmatpush.msra.mxu0 %v1392_v11 }
 0x19b   : > { %2218 = vrot.lane.b32.xlu0 %v2217_v43, %s2234_s14  ;;  %v2076_v20 = vunpack.i.h.bf16 %v2935_v30  ;;  %v2075_v1 = vunpack.i.l.bf16 %v2935_v30 }
 0x19d   : > { %v868_v50 = vsel %vm338_vm2, %v2075_v1, %v2076_v20 }
 0x19e   : > { %v2941_v28 = vpop.permute.xlu2 %2093 }
 0x19f   : > { %v2096_v32 = vunpack.i.h.bf16 %v2941_v28  ;;  %v2095_v57 = vunpack.i.l.bf16 %v2941_v28 }
 0x1a0   : > { %v2943_v48 = vpop.permute.xlu0 %2098 }
 0x1a1   : > { %v2101_v58 = vunpack.i.h.bf16 %v2943_v48  ;;  %v2100_v34 = vunpack.i.l.bf16 %v2943_v48  ;;  %v1154_v38 = vsel %vm604_vm5, %v2095_v57, %v2096_v32 }
 0x1a2   : > { %v2089_v24 = vpop.permute.xlu1 %2088 }
 0x1a3   : > { %v2091_v35 = vunpack.i.h.bf16 %v2089_v24  ;;  %v2090_v52 = vunpack.i.l.bf16 %v2089_v24  ;;  %1664 = vperm.xlu0 %2061, %v1661_v22   ;;  %v1042_v61 = vsel %vm1041_vm4, %v2100_v34, %v2101_v58 }
 0x1a5   : > { %v1281_v14 = vsel %vm1101_vm6, %v2090_v52, %v2091_v35 }
 0x1a6   : > { %1681 = vmatpush.msra.mxu0 %v1281_v14  ;;  %v3010_v23 = vpop.permute.xlu2 %2113 }
 0x1a7   : > { %v2116_v11 = vunpack.i.h.bf16 %v3010_v23  ;;  %v2115_v22 = vunpack.i.l.bf16 %v3010_v23 }
 0x1a8   : > { %1682 = vmatpush.msra.mxu0 %v2645_v21  ;;  %v928_v21 = vsel %vm661_vm7, %v2065_v39, %v2066_v8 }
 0x1a9   : > { %v869_v48 = vsel %vm338_vm2, %v2076_v20, %v2115_v22  ;;  %v870_v57 = vsel %vm338_vm2, %v2115_v22, %v2116_v11 }
 0x1aa   : > { %v2954_v19 = vpop.permute.xlu1 %2103  ;;  %1683 = vmatpush.msra.mxu0 %v1154_v38 }
 0x1ac   : > { %1684 = vmatpush.msra.mxu0 %v1042_v61 }
 0x1ae   : > { %1685 = vmatpush.msra.mxu0 %v928_v21  ;;  %v3026_v55 = vpop.permute.xlu2 %2143 }
 0x1b0   : > { %1686 = vmatpush.msra.mxu0 %v868_v50 }
 0x1b1   : > { %2030 = vmatmul.msk.f32.vlgmr.msra.gmra.mxu0 %vm1667_vm9, %v2967_v51 }
 0x1b2   : > { %v2974_v7 = vpop.permute.xlu1 %2108  ;;  %v2976_v4 = vpop.permute.xlu0 %2118 }
 0x1b3   : > { %v2111_v59 = vunpack.i.h.bf16 %v2974_v7  ;;  %v2110_v60 = vunpack.i.l.bf16 %v2974_v7  ;;  %v2121_v18 = vunpack.i.h.bf16 %v2976_v4  ;;  %v2120_v42 = vunpack.i.l.bf16 %v2976_v4 }
 0x1b5   : > { %v1565_v17 = vsel %vm815_vm1, %v2081_v56, %v2120_v42  ;;  %v1566_v25 = vsel %vm815_vm1, %v2120_v42, %v2121_v18  ;;  %v1455_v16 = vsel %vm1452_vm8, %v2110_v60, %v2111_v59  ;;  %v1454_v29 = vsel %vm1452_vm8, %v2071_v49, %v2110_v60 }
 0x1b6   : > { %1698 = vmatpush.msra.mxu1 %v1565_v17  ;;  %1718 = vmatpush.msra.mxu2 %v1566_v25 }
 0x1b8   : > { %1719 = vmatpush.msra.mxu2 %v1455_v16  ;;  %1699 = vmatpush.msra.mxu1 %v1454_v29 }
 0x1b9   : > { %v3050_v14 = vpop.permute.xlu2 %2173 }
 0x1ba   : > { %v2992_v15 = vpop.permute.xlu1 %2123  ;;  %v3016_v41 = vpop.permute.xlu0 %2148 }
 0x1bb   : > { %v2126_v6 = vunpack.i.h.bf16 %v2992_v15  ;;  %v2125_v63 = vunpack.i.l.bf16 %v2992_v15 }
 0x1bd   : > { %v1393_v46 = vsel %vm988_vm3, %v2086_v27, %v2125_v63  ;;  %v1394_v56 = vsel %vm988_vm3, %v2125_v63, %v2126_v6  ;;  %v2105_v27 = vunpack.i.l.bf16 %v2954_v19 }
 0x1be   : > { %1700 = vmatpush.msra.mxu1 %v1393_v46  ;;  %1720 = vmatpush.msra.mxu2 %v1394_v56 }
 0x1c1   : > { %v3062_v34 = vpop.permute.xlu2 %866 }
 0x1c2   : > { %v3000_v44 = vpop.permute.xlu1 %2128 }
 0x1c3   : > { %v2131_v13 = vunpack.i.h.bf16 %v3000_v44  ;;  %v2130_v49 = vunpack.i.l.bf16 %v3000_v44 }
 0x1c5   : > { %v1282_v9 = vsel %vm1101_vm6, %v2091_v35, %v2130_v49  ;;  %v1283_v47 = vsel %vm1101_vm6, %v2130_v49, %v2131_v13  ;;  %v2150_v49 = vunpack.i.l.bf16 %v3016_v41 }
 0x1c6   : > { %1701 = vmatpush.msra.mxu1 %v1282_v9  ;;  %1721 = vmatpush.msra.mxu2 %v1283_v47 }
 0x1c8   : > { %1722 = vmatpush.msra.mxu2 %v2702_v31  ;;  %1702 = vmatpush.msra.mxu1 %v2674_v33  ;;  %v2106_v33 = vunpack.i.h.bf16 %v2954_v19  ;;  %v871_v19 = vsel %vm338_vm2, %v2116_v11, %v2150_v49 }
 0x1c9   : > { %v3066_v61 = vpop.permute.xlu2 %2193 }
 0x1ca   : > { %v3012_v54 = vpop.permute.xlu1 %2133  ;;  %v930_v52 = vsel %vm661_vm7, %v2105_v27, %v2106_v33  ;;  %v2195_v17 = vunpack.i.l.bf16 %v3066_v61 }
 0x1cb   : > { %v2136_v37 = vunpack.i.h.bf16 %v3012_v54  ;;  %v2135_v5 = vunpack.i.l.bf16 %v3012_v54 }
 0x1cc   : > { %v1284_v7 = vsel %vm1101_vm6, %v2131_v13, %v2195_v17  ;;  %v2176_v13 = vunpack.i.h.bf16 %v3050_v14 }
 0x1cd   : > { %v1155_v26 = vsel %vm604_vm5, %v2096_v32, %v2135_v5  ;;  %v1156_v3 = vsel %vm604_vm5, %v2135_v5, %v2136_v37  ;;  %v929_v32 = vsel %vm661_vm7, %v2066_v8, %v2105_v27 }
 0x1ce   : > { %1703 = vmatpush.msra.mxu1 %v1155_v26  ;;  %1723 = vmatpush.msra.mxu2 %v1156_v3 }
 0x1d1   : > { %v3080_v29 = vpop.permute.xlu2 %2208 }
 0x1d2   : > { %v3022_v31 = vpop.permute.xlu1 %2138 }
 0x1d3   : > { %v2141_v12 = vunpack.i.h.bf16 %v3022_v31  ;;  %v2140_v43 = vunpack.i.l.bf16 %v3022_v31  ;;  %v2211_v31 = vunpack.i.h.bf16 %v3080_v29 }
 0x1d4   : > { %v3032_v28 = vpop.permute.xlu0 %2153 }
 0x1d5   : > { %v1043_v24 = vsel %vm1041_vm4, %v2101_v58, %v2140_v43  ;;  %v1044_v35 = vsel %vm1041_vm4, %v2140_v43, %v2141_v12  ;;  %v2155_v4 = vunpack.i.l.bf16 %v3032_v28 }
 0x1d6   : > { %1704 = vmatpush.msra.mxu1 %v1043_v24  ;;  %1724 = vmatpush.msra.mxu2 %v1044_v35 }
 0x1d7   : > { %v1157_v44 = vsel %vm604_vm5, %v2136_v37, %v2155_v4  ;;  %v2175_v37 = vunpack.i.l.bf16 %v3050_v14 }
 0x1d8   : > { %1725 = vmatpush.msra.mxu2 %v930_v52  ;;  %1705 = vmatpush.msra.mxu1 %v929_v32  ;;  %v2210_v52 = vunpack.i.l.bf16 %v3080_v29  ;;  %v2196_v32 = vunpack.i.h.bf16 %v3066_v61  ;;  %v2156_v61 = vunpack.i.h.bf16 %v3032_v28 }
 0x1d9   : > { %v3114_v43 = vpop.permute.xlu2 %2213 }
 0x1da   : > { %1706 = vmatpush.msra.mxu1 %v869_v48  ;;  %1726 = vmatpush.msra.mxu2 %v870_v57  ;;  %v1286_v11 = vsel %vm1101_vm6, %v2211_v31, %v2196_v32 }
 0x1db   : > { %2031 = vmatmul.msk.f32.vlgmr.msra.gmra.mxu1 %vm1667_vm9, %v2967_v51  ;;  %2032 = vmatmul.msk.f32.vlgmr.msra.gmra.mxu2 %vm1667_vm9, %v2967_v51 }
 0x1dc   : > { %v3056_v45 = vpop.permute.xlu1 %2158  ;;  %v3058_v58 = vpop.permute.xlu0 %2163 }
 0x1e4   : > { %v3060_v30 = vpop.permute.xlu1 %926  ;;  %v2169_v8 = vpop.permute.xlu0 %2168 }
 0x1e5   : > { %v2170_v20 = vunpack.i.l.bf16 %v2169_v8  ;;  %v2171_v9 = vunpack.i.h.bf16 %v2169_v8  ;;  %v2216_v8 = vunpack.i.h.bf16 %v3114_v43 }
 0x1e7   : > { %v1456_v50 = vsel %vm1452_vm8, %v2111_v59, %v2170_v20  ;;  %v2160_v59 = vunpack.i.l.bf16 %v3056_v45  ;;  %v1458_v24 = vsel %vm1452_vm8, %v2176_v13, %v2171_v9  ;;  %v1459_v35 = vsel %vm1452_vm8, %v2171_v9, %v2175_v37 }
 0x1e9   : > { %v1045_v47 = vsel %vm1041_vm4, %v2141_v12, %v2160_v59  ;;  %v1457_v12 = vsel %vm1452_vm8, %v2170_v20, %v2176_v13  ;;  %v2215_v20 = vunpack.i.l.bf16 %v3114_v43 }
 0x1ec   : > { %v3064_v39 = vpop.permute.xlu1 %2178  ;;  %v2184_v38 = vpop.permute.xlu0 %2183 }
 0x1ed   : > { %v2185_v1 = vunpack.i.l.bf16 %v2184_v38  ;;  %v2186_v15 = vunpack.i.h.bf16 %v2184_v38  ;;  %v1285_v38 = vsel %vm1101_vm6, %v2195_v17, %v2211_v31  ;;  %v2161_v17 = vunpack.i.h.bf16 %v3056_v45 }
 0x1ef   : > { %v1567_v21 = vsel %vm815_vm1, %v2121_v18, %v2185_v1  ;;  %v2145_v18 = vunpack.i.l.bf16 %v3026_v55 }
 0x1f0   : > { %1738 = vmatpush.msra.mxu3 %v1567_v21  ;;  %v1460_v21 = vsel %vm1452_vm8, %v2175_v37, %v2889_v0  ;;  %v1160_v0 = vsel %vm604_vm5, %v2156_v61, %v2215_v20 }
 0x1f1   : > { %v931_v27 = vsel %vm661_vm7, %v2106_v33, %v2145_v18 }
 0x1f2   : > { %1739 = vmatpush.msra.mxu3 %v1456_v50 }
 0x1f4   : > { %v3074_v60 = vpop.permute.xlu1 %1279  ;;  %v2189_v42 = vpop.permute.xlu0 %2188 }
 0x1f5   : > { %v2190_v25 = vunpack.i.l.bf16 %v2189_v42  ;;  %v2191_v22 = vunpack.i.h.bf16 %v2189_v42  ;;  %v1159_v42 = vsel %vm604_vm5, %v2216_v8, %v2156_v61 }
 0x1f7   : > { %v1395_v16 = vsel %vm988_vm3, %v2126_v6, %v2190_v25 }
 0x1f8   : > { %1740 = vmatpush.msra.mxu3 %v1395_v16 }
 0x1fa   : > { %1741 = vmatpush.msra.mxu3 %v1284_v7  ;;  %v2166_v7 = vunpack.i.h.bf16 %v3058_v58 }
 0x1fc   : > { %v3088_v63 = vpop.permute.xlu1 %2203  ;;  %v2199_v46 = vpop.permute.xlu0 %2198  ;;  %1742 = vmatpush.msra.mxu3 %v2752_v53  ;;  %v935_v9 = vsel %vm661_vm7, %v2166_v7, %v3060_v30 }
 0x1fd   : > { %v2201_v6 = vunpack.i.h.bf16 %v2199_v46  ;;  %v2200_v56 = vunpack.i.l.bf16 %v2199_v46  ;;  %v2206_v53 = vunpack.i.h.bf16 %v3088_v63  ;;  %v2205_v3 = vunpack.i.l.bf16 %v3088_v63  ;;  %v1040_v63 = vpop.permute.xlu2 %1039 }
 0x1fe   : > { %1743 = vmatpush.msra.mxu3 %v1157_v44  ;;  %v2180_v46 = vunpack.i.l.bf16 %v3064_v39 }
 0x1ff   : > { %v1568_v5 = vsel %vm815_vm1, %v2185_v1, %v2201_v6  ;;  %v1569_v26 = vsel %vm815_vm1, %v2201_v6, %v2186_v15  ;;  %v1570_v54 = vsel %vm815_vm1, %v2186_v15, %v2200_v56  ;;  %v1396_v33 = vsel %vm988_vm3, %v2190_v25, %v2206_v53 }
 0x200   : > { %1744 = vmatpush.msra.mxu3 %v1045_v47  ;;  %1758 = vmatpush.msrb.mxu0 %v1568_v5  ;;  %v1397_v57 = vsel %vm988_vm3, %v2206_v53, %v2191_v22  ;;  %v1398_v14 = vsel %vm988_vm3, %v2191_v22, %v2205_v3  ;;  %v1571_v23 = vsel %vm815_vm1, %v2200_v56, %v2920_v10  ;;  %v2181_v56 = vunpack.i.h.bf16 %v3064_v39 }
 0x201   : > { %1778 = vmatpush.msrb.mxu1 %v1569_v26  ;;  %1798 = vmatpush.msrb.mxu2 %v1570_v54  ;;  %v1287_v1 = vsel %vm1101_vm6, %v2196_v32, %v2210_v52  ;;  %v1158_v10 = vsel %vm604_vm5, %v2155_v4, %v2216_v8  ;;  %v2151_v4 = vunpack.i.h.bf16 %v3016_v41 }
 0x202   : > { %1745 = vmatpush.msra.mxu3 %v931_v27  ;;  %1759 = vmatpush.msrb.mxu0 %v1457_v12  ;;  %v875_v41 = vsel %vm338_vm2, %v2181_v56, %v3062_v34 }
 0x203   : > { %1779 = vmatpush.msrb.mxu1 %v1458_v24  ;;  %1799 = vmatpush.msrb.mxu2 %v1459_v35  ;;  %v872_v39 = vsel %vm338_vm2, %v2150_v49, %v2151_v4  ;;  %v873_v13 = vsel %vm338_vm2, %v2151_v4, %v2180_v46 }
 0x204   : > { %1746 = vmatpush.msra.mxu3 %v871_v19  ;;  %1760 = vmatpush.msrb.mxu0 %v1396_v33  ;;  %v1153_v25 = vpop.permute.xlu1 %1152 }
 0x205   : > { %v1391_v48 = vpop.permute.xlu0 %1390  ;;  %1780 = vmatpush.msrb.mxu1 %v1397_v57  ;;  %1800 = vmatpush.msrb.mxu2 %v1398_v14  ;;  %v1161_v44 = vsel %vm604_vm5, %v2215_v20, %v1153_v25 }
 0x206   : > { %2033 = vmatmul.msk.f32.vlgmr.msra.gmra.mxu3 %vm1667_vm9, %v2967_v51  ;;  %1761 = vmatpush.msrb.mxu0 %v1285_v38  ;;  %v1399_v50 = vsel %vm988_vm3, %v2205_v3, %v1391_v48 }
 0x207   : > { %1818 = vmatpush.msrb.mxu3 %v1571_v23  ;;  %1781 = vmatpush.msrb.mxu1 %v1286_v11 }
 0x208   : > { %1801 = vmatpush.msrb.mxu2 %v1287_v1  ;;  %1762 = vmatpush.msrb.mxu0 %v2765_v62  ;;  %v2146_v62 = vunpack.i.h.bf16 %v3026_v55  ;;  %v874_v55 = vsel %vm338_vm2, %v2180_v46, %v2181_v56 }
 0x209   : > { %1819 = vmatpush.msrb.mxu3 %v1460_v21  ;;  %1782 = vmatpush.msrb.mxu1 %v2813_v2  ;;  %v1288_v2 = vsel %vm1101_vm6, %v2210_v52, %v3074_v60 }
 0x20a   : > { %1802 = vmatpush.msrb.mxu2 %v2815_v36  ;;  %1763 = vmatpush.msrb.mxu0 %v1158_v10  ;;  %v2165_v36 = vunpack.i.l.bf16 %v3058_v58 }
 0x20b   : > { %1820 = vmatpush.msrb.mxu3 %v1399_v50  ;;  %1783 = vmatpush.msrb.mxu1 %v1159_v42 }
 0x20c   : > { %1803 = vmatpush.msrb.mxu2 %v1160_v0  ;;  %v933_v45 = vsel %vm661_vm7, %v2146_v62, %v2165_v36 }
 0x20d   : > { %v2219_v28 = vpop.permute.xlu0 %2218  ;;  %1821 = vmatpush.msrb.mxu3 %v1288_v2 }
 0x20e   : > { %v2221_v16 = vunpack.i.h.bf16 %v2219_v28  ;;  %v2220_v29 = vunpack.i.l.bf16 %v2219_v28 }
 0x20f   : > { %1822 = vmatpush.msrb.mxu3 %v2819_v40  ;;  %v932_v40 = vsel %vm661_vm7, %v2145_v18, %v2146_v62 }
 0x210   : > { %v1046_v60 = vsel %vm1041_vm4, %v2160_v59, %v2221_v16  ;;  %v1047_v15 = vsel %vm1041_vm4, %v2221_v16, %v2161_v17  ;;  %v1048_v6 = vsel %vm1041_vm4, %v2161_v17, %v2220_v29  ;;  %v1049_v58 = vsel %vm1041_vm4, %v2220_v29, %v1040_v63 }
 0x211   : > { %1764 = vmatpush.msrb.mxu0 %v1046_v60  ;;  %1784 = vmatpush.msrb.mxu1 %v1047_v15  ;;  %v934_v59 = vsel %vm661_vm7, %v2165_v36, %v2166_v7 }
 0x212   : > { %1823 = vmatpush.msrb.mxu3 %v1161_v44  ;;  %1804 = vmatpush.msrb.mxu2 %v1048_v6 }
 0x213   : > { %1765 = vmatpush.msrb.mxu0 %v932_v40  ;;  %1785 = vmatpush.msrb.mxu1 %v933_v45 }
 0x214   : > { %1824 = vmatpush.msrb.mxu3 %v1049_v58  ;;  %1805 = vmatpush.msrb.mxu2 %v934_v59 }
 0x215   : > { %1766 = vmatpush.msrb.mxu0 %v872_v39  ;;  %1786 = vmatpush.msrb.mxu1 %v873_v13  ;;  %v1665_v30 = vpop.permute.xlu0 %1664 }
 0x216   : > { %1825 = vmatpush.msrb.mxu3 %v935_v9  ;;  %1806 = vmatpush.msrb.mxu2 %v874_v55 }
 0x217   : > { %2034 = vmatmul.msk.f32.vlgmr.msrb.gmra.mxu0 %vm1667_vm9, %v2967_v51  ;;  %2035 = vmatmul.msk.f32.vlgmr.msrb.gmra.mxu1 %vm1667_vm9, %v2967_v51 }
 0x218   : > { %2036 = vmatmul.msk.f32.vlgmr.msrb.gmra.mxu2 %vm1667_vm9, %v2967_v51  ;;  %1826 = vmatpush.msrb.mxu3 %v875_v41 }
 0x219   : > { %2037 = vmatmul.msk.f32.vlgmr.msrb.gmra.mxu3 %vm1667_vm9, %v2967_v51 }
 0x22e   : > { %v1688_v18 = vpop.f32.mrf.mxu0 }
 0x22f   : > { %v1689_v53 = vadd.f32 %v1688_v18, %v1665_v30 }
 0x231   : > { %v1873_v27 = vmul.f32 %v1689_v53, %v1689_v53  ;;  %v1856_v52 = vsel %vm1843_vm10, %v1689_v53, 0.0 }
 0x233   : > { %v1881_v33 = vsel %vm1843_vm10, %v1873_v27, 0.0 }
 0x258   : > { %v1708_v49 = vpop.f32.mrf.mxu1 }
 0x259   : > { %v1709_v47 = vadd.f32 %v1708_v49, %v1665_v30 }
 0x25b   : > { %v1839_v34 = vrot.slane %v1709_v47, 4  ;;  %v1874_v3 = vmul.f32 %v1709_v47, %v1709_v47  ;;  %v1857_v22 = vsel %vm1843_vm10, %v1709_v47, 0.0 }
 0x25c   : > { %v1858_v32 = vadd.f32 %v1857_v22, %v1856_v52 }
 0x25d   : > { %v1844_v5 = vsel %vm1843_vm10, %v1689_v53, %v1839_v34  ;;  %v1882_v24 = vsel %vm1843_vm10, %v1874_v3, 0.0 }
 0x25e   : > { %1852 = vst [vmem:[%s3193_s30] sm:$0xff] %v1844_v5  ;;  %v1728_v26 = vpop.f32.mrf.mxu2  ;;  %v1883_v57 = vadd.f32 %v1882_v24, %v1881_v33 }
 0x25f   : > { %v1729_v54 = vadd.f32 %v1728_v26, %v1665_v30 }
 0x261   : > { %v1875_v12 = vmul.f32 %v1729_v54, %v1729_v54  ;;  %v1859_v19 = vsel %vm1843_vm10, %v1729_v54, 0.0 }
 0x262   : > { %v1860_v23 = vadd.f32 %v1859_v19, %v1858_v32 }
 0x263   : > { %v1884_v48 = vsel %vm1843_vm10, %v1875_v12, 0.0 }
 0x264   : > { %v1885_v61 = vadd.f32 %v1884_v48, %v1883_v57 }
 0x289   : > { %v1748_v51 = vpop.f32.mrf.mxu3 }
 0x28a   : > { %v1749_v37 = vadd.f32 %v1748_v51, %v1665_v30 }
 0x28c   : > { %v1840_v31 = vrot.slane %v1749_v37, 4  ;;  %v1876_v35 = vmul.f32 %v1749_v37, %v1749_v37  ;;  %v1861_v14 = vsel %vm1843_vm10, %v1749_v37, 0.0 }
 0x28d   : > { %v1862_v21 = vadd.f32 %v1861_v14, %v1860_v23 }
 0x28e   : > { %v1845_v43 = vsel %vm1843_vm10, %v1729_v54, %v1840_v31  ;;  %v1886_v11 = vsel %vm1843_vm10, %v1876_v35, 0.0 }
 0x28f   : > { %1853 = vst [vmem:[%s3193_s30 + $0x8] sm:$0xff] %v1845_v43  ;;  %v1887_v0 = vadd.f32 %v1886_v11, %v1885_v61 }
 0x294   : > { %v1768_v8 = vpop.f32.mrf.mxu0  ;;  %v1788_v38 = vpop.f32.mrf.mxu1 }
 0x295   : > { %v1769_v20 = vadd.f32 %v1768_v8, %v1665_v30  ;;  %v1789_v1 = vadd.f32 %v1788_v38, %v1665_v30 }
 0x297   : > { %v1863_v10 = vsel %vm1843_vm10, %v1769_v20, 0.0  ;;  %v1877_v50 = vmul.f32 %v1769_v20, %v1769_v20  ;;  %v1841_v42 = vrot.slane %v1789_v1, 4  ;;  %v1878_v17 = vmul.f32 %v1789_v1, %v1789_v1 }
 0x298   : > { %v1864_v62 = vadd.f32 %v1863_v10, %v1862_v21  ;;  %v1865_v16 = vsel %vm1843_vm10, %v1789_v1, 0.0 }
 0x299   : > { %v1888_v2 = vsel %vm1843_vm10, %v1877_v50, 0.0  ;;  %v1846_v28 = vsel %vm1843_vm10, %v1769_v20, %v1841_v42  ;;  %v1890_v46 = vsel %vm1843_vm10, %v1878_v17, 0.0 }
 0x29a   : > { %1854 = vst [vmem:[%s3193_s30 + $0x10] sm:$0xff] %v1846_v28  ;;  %v1889_v36 = vadd.f32 %v1888_v2, %v1887_v0  ;;  %v1866_v63 = vadd.f32 %v1865_v16, %v1864_v62 }
 0x29b   : > { %v1808_v25 = vpop.f32.mrf.mxu2 }
 0x29c   : > { %v1809_v29 = vadd.f32 %v1808_v25, %v1665_v30  ;;  %v1828_v4 = vpop.f32.mrf.mxu3  ;;  %v1891_v6 = vadd.f32 %v1890_v46, %v1889_v36 }
 0x29d   : > { %v1829_v7 = vadd.f32 %v1828_v4, %v1665_v30 }
 0x29e   : > { %v1879_v60 = vmul.f32 %v1809_v29, %v1809_v29  ;;  %v1867_v15 = vsel %vm1843_vm10, %v1809_v29, 0.0 }
 0x29f   : > { %v1842_v56 = vrot.slane %v1829_v7, 4  ;;  %v1868_v44 = vadd.f32 %v1867_v15, %v1866_v63  ;;  %v1869_v58 = vsel %vm1843_vm10, %v1829_v7, 0.0  ;;  %v1880_v40 = vmul.f32 %v1829_v7, %v1829_v7 }
 0x2a0   : > { %v1892_v45 = vsel %vm1843_vm10, %v1879_v60, 0.0 }
 0x2a1   : > { %v1847_v59 = vsel %vm1843_vm10, %v1809_v29, %v1842_v56  ;;  %v1870_v39 = vadd.f32 %v1869_v58, %v1868_v44  ;;  %v1893_v13 = vadd.f32 %v1892_v45, %v1891_v6  ;;  %v1894_v9 = vsel %vm1843_vm10, %v1880_v40, 0.0 }
 0x2a2   : > { %1855 = vst [vmem:[%s3193_s30 + $0x18] sm:$0xff] %v1847_v59 }
 0x2a3   : > { %1871 = vadd.xlane.f32.xlu1 %v1870_v39  ;;  %v1895_v55 = vadd.f32 %v1894_v9, %v1893_v13 }
 0x2a5   : > { %1896 = vadd.xlane.f32.xlu2 %v1895_v55 }
 0x316   : > { %v1872_v41 = vpop.xlane.xlu1 %1871 }
 0x318   : > { %v1897_v30 = vpop.xlane.xlu2 %1896 }
 0x319   : > { %v1898_v18 = vsel %vm604_vm5, %v1872_v41, %v1897_v30 }
 0x31a   : > { %1900 = vst.msk [vmem:[%s336_s11] sm:$0xf] %vm1899_vm11, %v1898_v18 }
 0x31b PF: > { %s19_s27 = sadd.s32 1, %s2228_s27  }
 0x31c   : > { %p16_p4 = scmp.ge.s32.totalorder %s19_s27, 4  }
 0x31e   :  { %18 = sbr.rel (!%p16_p4) target bundleno = 1 (0x1), region = 97 }

// kernel: up_forward.4
= control target key start
LH: loop header
LB: loop body
LE: loop exit
PB: predicated region body
PF: predicated region fallthrough
CT: control target
= control target key end

     0   :  { %s1845_s24 = smov 0   ;;  %s2585_s0 = inlined_call_operand.vmem [shape: f32[2,4,1024], index: 0, kind: input, shape index: {}]   ;;  %s2586_s1 = inlined_call_operand.vmem [shape: f32[4,1], index: 1, kind: input, shape index: {}]   ;;  %s2587_s2 = inlined_call_operand.vmem [shape: f32[4,1], index: 2, kind: input, shape index: {}]   ;;  %s2588_s3 = inlined_call_operand.vmem [shape: f32[4,72], index: 3, kind: input, shape index: {}]   ;;  %s2589_s4 = inlined_call_operand.vmem [shape: f32[4,1], index: 4, kind: input, shape index: {}]   ;;  %s2590_s5 = inlined_call_operand.vmem [shape: f32[2,1024], index: 5, kind: input, shape index: {}]   ;;  %s2591_s6 = inlined_call_operand.vmem [shape: f32[2,4,1024], index: 6, kind: output, shape index: {0}]   ;;  %s2592_s7 = inlined_call_operand.vmem [shape: f32[2,4,2], index: 7, kind: output, shape index: {1}]  }
   0x1 LB: > { %s1581_s25 = sadd.s32 4294967295, %s1792_s24   ;;  %p1585_p0 = scmp.ge.s32.totalorder %s1792_s24, 1  ;;  %s1792_s24 = sphi %s1845_s24, %s18_s24  }
   0x2   : > { %p240_p1 = scmp.lt.s32.totalorder %s1792_s24, 3 }
   0x4   : > { %p241_p2 = pnand %p1585_p0, %p240_p1 }
   0x5   : > { %s1795_s30 = smov (!%p241_p2), 95   ;;  %s1796_s12 = smov (!%p241_p2), 97  }
   0x6   : > { %244 = sbr.rel (%p241_p2) target bundleno = 727 (0x2d7), region = 44  ;;  %s1797_s15 = smov (!%p241_p2), 33  }
   0x7   : > { %s1798_s18 = smov (!%p241_p2), 31   ;;  %s1799_s21 = smov (!%p241_p2), 1  }
   0x8   : > { %s1801_s26 = smov (!%p241_p2), 127   ;;  %p276_p3 = scmp.lt.s32.totalorder (!%p241_p2), %s1581_s25, 1 }
   0x9   : > { %s1803_s9 = smov (!%p241_p2), 32   ;;  %s1804_s10 = smov (!%p241_p2), 96  }
   0xb   : > { %v305_v0 = vld [vmem:[%s2586_s1] sm:$0xf]  ;;  %v1794_v2 = vmov 0   ;;  %v1800_v43 = vmov 0.0   ;;  %s2596_s25 = smov (!%p276_p3, %s1581_s25), 1  ;;  %vm291_vm0 = vcmask 269312  }
   0xc   : > { %v381_v1 = vld [vmem:[%s2590_s5] ss:$2 sm:$0xff]  ;;  %1625 = vset.pattern.permute.xlu0 %v1794_v2  ;;  %v1872_v11 = vld [vmem:[%s2590_s5 + $0x1] ss:$2 sm:$0xff]  ;;  %293 = vst [vmem:[#allocation2 + $0x8] sm:$0xf0] %v1800_v43 }
   0xd   : > { %v385_v3 = vperm.slane %v381_v1, 2  ;;  %v383_v4 = vperm.slane %v381_v1, 0  ;;  %308 = vperm.xlu0 %1625, %v305_v0   ;;  %v319_v5 = vld [vmem:[%s2587_s2] sm:$0xf]  ;;  %v386_v6 = vperm.slane %v381_v1, 3  ;;  %v384_v7 = vperm.slane %v381_v1, 1 }
   0xe   : > { %v387_v8 = vperm.slane %v381_v1, 4  ;;  %v389_v9 = vperm.slane %v381_v1, 6  ;;  %v388_v10 = vperm.slane %v381_v1, 5  ;;  %v390_v12 = vperm.slane %v381_v1, 7  ;;  %v1593_v18 = vld [vmem:[%s2590_s5 + $0x1] ss:$2 sm:$0xff] }
   0xf   : > { %395 = vrot.lane.b32.xlu2 %v385_v3, %s1795_s30  ;;  %391 = vrot.lane.b32.xlu1 %v383_v4, %s1795_s30  ;;  %v557_v13 = vperm.slane %v1872_v11, 0  ;;  %v559_v14 = vperm.slane %v1872_v11, 2  ;;  %v558_v15 = vperm.slane %v1872_v11, 1  ;;  %v560_v16 = vperm.slane %v1872_v11, 3  ;;  %v1895_v22 = vld [vmem:[%s2590_s5] ss:$2 sm:$0xff] }
  0x10   : > { %v562_v17 = vperm.slane %v1872_v11, 5  ;;  %v561_v19 = vperm.slane %v1872_v11, 4  ;;  %v1083_v20 = vperm.slane %v1593_v18, 1  ;;  %v1085_v21 = vperm.slane %v1593_v18, 3  ;;  %v1904_v26 = vld [vmem:[%s2590_s5 + $0x1] ss:$2 sm:$0xff] }
  0x11   : > { %v1084_v23 = vperm.slane %v1593_v18, 2  ;;  %v1082_v24 = vperm.slane %v1593_v18, 0  ;;  %v911_v25 = vperm.slane %v1895_v22, 1  ;;  %v1086_v27 = vperm.slane %v1593_v18, 4  ;;  %v1930_v39 = vld [vmem:[%s2590_s5] ss:$2 sm:$0xff] }
  0x12   : > { %v912_v28 = vperm.slane %v1895_v22, 2  ;;  %v800_v29 = vperm.slane %v1904_v26, 1  ;;  %v913_v30 = vperm.slane %v1895_v22, 3  ;;  %v801_v31 = vperm.slane %v1904_v26, 2  ;;  %294 = vst [vmem:[#allocation2 + $0x10] sm:$0xf0] %v1800_v43 }
  0x13   : > { %v910_v32 = vperm.slane %v1895_v22, 0  ;;  %v802_v33 = vperm.slane %v1904_v26, 3  ;;  %v914_v34 = vperm.slane %v1895_v22, 4  ;;  %v803_v35 = vperm.slane %v1904_v26, 4  ;;  %295 = vst [vmem:[#allocation2 + $0x18] sm:$0xf0] %v1800_v43 }
  0x14   : > { %v799_v36 = vperm.slane %v1904_v26, 0  ;;  %v1087_v37 = vperm.slane %v1593_v18, 5  ;;  %v1089_v38 = vperm.slane %v1593_v18, 7  ;;  %v1088_v40 = vperm.slane %v1593_v18, 6  ;;  %296 = vst [vmem:[#allocation2 + $0x20] sm:$0xf0] %v1800_v43 }
  0x15   : > { %322 = vperm.xlu0 %1625, %v319_v5   ;;  %v671_v41 = vperm.slane %v1930_v39, 1  ;;  %v673_v42 = vperm.slane %v1930_v39, 3  ;;  %297 = vst [vmem:[#allocation2 + $0x28] sm:$0xf0] %v1800_v43  ;;  %v672_v45 = vperm.slane %v1930_v39, 2  ;;  %v670_v46 = vperm.slane %v1930_v39, 0 }
  0x16   : > { %298 = vst [vmem:[#allocation2 + $0x30] sm:$0xf0] %v1800_v43  ;;  %v915_v47 = vperm.slane %v1895_v22, 5  ;;  %v674_v49 = vperm.slane %v1930_v39, 4  ;;  %v804_v50 = vperm.slane %v1904_v26, 5  ;;  %v916_v51 = vperm.slane %v1895_v22, 6 }
  0x17   : > { %397 = vrot.lane.b32.xlu2 %v386_v6, %s1795_s30  ;;  %393 = vrot.lane.b32.xlu1 %v384_v7, %s1795_s30  ;;  %299 = vst [vmem:[#allocation2 + $0x38] sm:$0xf0] %v1800_v43  ;;  %v917_v53 = vperm.slane %v1895_v22, 7  ;;  %v805_v54 = vperm.slane %v1904_v26, 6  ;;  %v1802_v55 = vmov 839922192  }
  0x18   : > { %300 = vst [vmem:[#allocation2 + $0x40] sm:$0xf0] %v1800_v43  ;;  %v311_v56 = vunpack.c.l.s4 %v1802_v55  ;;  %s1604_s27 = sshll.u32 %s2596_s25, 5  ;;  %vm581_vm1 = vcmask 793600   ;;  %vm407_vm2 = vcmask 777216   ;;  %vm634_vm3 = vcmask 252928  }
  0x19   : > { %s280_s8 = scalar_lea.vmem %s2585_s0, %s1604_s27  ;;  %292 = vst.msk [vmem:[#allocation2 + $0x48] sm:$0xff] %vm291_vm0, %v1800_v43  ;;  %vm747_vm4 = vcmask 7168   ;;  %vm694_vm5 = vcmask 1039360   ;;  %vm520_vm6 = vcmask 261120   ;;  %vm1046_vm7 = vcmask 785408   ;;  %s2551_s16 = scalar_lea.vmem %s2591_s6, %s1604_s27 }
  0x1a   : > { %v312_v57 = vunpack.c.0.s8 %v311_v56  ;;  %v301_v62 = vld [vmem:[%s280_s8] sm:$0xff]  ;;  %v302_v63 = vld [vmem:[%s280_s8 + $0x8] sm:$0xff]  ;;  %v303_v0 = vld [vmem:[%s280_s8 + $0x10] sm:$0xff]  ;;  %vm1261_vm8 = vcmask 588800   ;;  %vm1437_vm9 = vcmask 1043456   ;;  %s1590_s17 = sshll.u32 %s2596_s25, 2 }
  0x1b   : > { %v304_v1 = vld [vmem:[%s280_s8 + $0x18] sm:$0xff]  ;;  %s289_s20 = scalar_lea.vmem %s2592_s7, %s1590_s17  ;;  %vm1493_vm10 = vcmask 11264  }
  0x1d   : > { %399 = vrot.lane.b32.xlu0 %v387_v8, %s1795_s30 }
  0x1f   : > { %403 = vrot.lane.b32.xlu2 %v389_v9, %s1795_s30  ;;  %401 = vrot.lane.b32.xlu1 %v388_v10, %s1795_s30 }
  0x25   : > { %405 = vrot.lane.b32.xlu0 %v390_v12, %s1795_s30 }
  0x27   : > { %565 = vrot.lane.b32.xlu2 %v557_v13, %s1796_s12  ;;  %569 = vrot.lane.b32.xlu1 %v559_v14, %s1796_s12 }
  0x2d   : > { %567 = vrot.lane.b32.xlu0 %v558_v15, %s1796_s12 }
  0x2f   : > { %571 = vrot.lane.b32.xlu2 %v560_v16, %s1796_s12  ;;  %575 = vrot.lane.b32.xlu1 %v562_v17, %s1796_s12 }
  0x35   : > { %573 = vrot.lane.b32.xlu0 %v561_v19, %s1796_s12 }
  0x37   : > { %1092 = vrot.lane.b32.xlu2 %v1083_v20, %s1797_s15  ;;  %1096 = vrot.lane.b32.xlu1 %v1085_v21, %s1797_s15 }
  0x3d   : > { %1094 = vrot.lane.b32.xlu0 %v1084_v23, %s1797_s15 }
  0x3f   : > { %1090 = vrot.lane.b32.xlu2 %v1082_v24, %s1797_s15  ;;  %920 = vrot.lane.b32.xlu1 %v911_v25, %s1798_s18 }
  0x45   : > { %1098 = vrot.lane.b32.xlu0 %v1086_v27, %s1797_s15 }
  0x47   : > { %922 = vrot.lane.b32.xlu2 %v912_v28, %s1798_s18  ;;  %809 = vrot.lane.b32.xlu1 %v800_v29, %s1799_s21 }
  0x4d   : > { %924 = vrot.lane.b32.xlu0 %v913_v30, %s1798_s18 }
  0x4f   : > { %811 = vrot.lane.b32.xlu2 %v801_v31, %s1799_s21  ;;  %918 = vrot.lane.b32.xlu1 %v910_v32, %s1798_s18 }
  0x55   : > { %813 = vrot.lane.b32.xlu0 %v802_v33, %s1799_s21 }
  0x57   : > { %926 = vrot.lane.b32.xlu2 %v914_v34, %s1798_s18  ;;  %815 = vrot.lane.b32.xlu1 %v803_v35, %s1799_s21 }
  0x5d   : > { %807 = vrot.lane.b32.xlu0 %v799_v36, %s1799_s21 }
  0x5f   : > { %1100 = vrot.lane.b32.xlu2 %v1087_v37, %s1797_s15  ;;  %1104 = vrot.lane.b32.xlu1 %v1089_v38, %s1797_s15 }
  0x65   : > { %1102 = vrot.lane.b32.xlu0 %v1088_v40, %s1797_s15 }
  0x67   : > { %680 = vrot.lane.b32.xlu2 %v671_v41, %s1801_s26  ;;  %684 = vrot.lane.b32.xlu1 %v673_v42, %s1801_s26 }
  0x69   : > { %v1941_v44 = vpop.permute.xlu2 %395 }
  0x6d   : > { %682 = vrot.lane.b32.xlu0 %v672_v45, %s1801_s26 }
  0x6f   : > { %678 = vrot.lane.b32.xlu2 %v670_v46, %s1801_s26  ;;  %928 = vrot.lane.b32.xlu1 %v915_v47, %s1798_s18 }
  0x71   : > { %v1953_v48 = vpop.permute.xlu2 %397 }
  0x75   : > { %686 = vrot.lane.b32.xlu0 %v674_v49, %s1801_s26 }
  0x77   : > { %817 = vrot.lane.b32.xlu1 %v804_v50, %s1799_s21  ;;  %930 = vrot.lane.b32.xlu2 %v916_v51, %s1798_s18  ;;  %v410_v51 = vsel %vm407_vm2, %v1941_v44, %v1953_v48 }
  0x79   : > { %v1963_v52 = vpop.permute.xlu2 %403 }
  0x7d   : > { %932 = vrot.lane.b32.xlu0 %v917_v53, %s1798_s18 }
  0x7f   : > { %819 = vrot.lane.b32.xlu2 %v805_v54, %s1799_s21  ;;  %v309_v58 = vpop.permute.xlu0 %308 }
  0x80   : > { %v313_v61 = vperm.slane %v309_v58, %v312_v57 }
  0x81   : > { %v1974_v59 = vpop.permute.xlu2 %565  ;;  %v1976_v60 = vpop.permute.xlu1 %391 }
  0x82   : > { %v315_v2 = vmul.f32 %v313_v61, %v301_v62  ;;  %v316_v4 = vmul.f32 %v313_v61, %v302_v63  ;;  %v317_v5 = vmul.f32 %v313_v61, %v303_v0  ;;  %v318_v6 = vmul.f32 %v313_v61, %v304_v1 }
  0x83   : > { %v2014_v46 = vmul.f32 0.0, %v1974_v59 }
  0x87   : > { %v323_v3 = vpop.permute.xlu0 %322 }
  0x88   : > { %v327_v7 = vperm.slane %v323_v3, %v312_v57 }
  0x89   : > { %v1985_v8 = vpop.permute.xlu2 %571  ;;  %v1987_v9 = vpop.permute.xlu1 %393 }
  0x8a   : > { %v329_v10 = vadd.f32 %v327_v7, %v315_v2  ;;  %v330_v12 = vadd.f32 %v327_v7, %v316_v4  ;;  %v331_v13 = vadd.f32 %v327_v7, %v317_v5  ;;  %v332_v14 = vadd.f32 %v327_v7, %v318_v6 }
  0x8b   : > { %v409_v53 = vsel %vm407_vm2, %v1987_v9, %v1941_v44 }
  0x8c   : > { %v333_v15 = vmax.f32 %v329_v10, 0.0  ;;  %v334_v16 = vmax.f32 %v330_v12, 0.0  ;;  %v335_v17 = vmax.f32 %v331_v13, 0.0  ;;  %v336_v18 = vmax.f32 %v332_v14, 0.0 }
  0x8d   : > { %v408_v12 = vsel %vm407_vm2, %v1976_v60, %v1987_v9  ;;  %v806_v9 = vperm.slane %v1904_v26, 7 }
  0x8e   : > { %341 = vst [vmem:[#allocation1] ss:$2 sm:$0xff] %v333_v15 }
  0x8f   : > { %343 = vst [vmem:[#allocation1 + $0x10] ss:$2 sm:$0xff] %v334_v16  ;;  %v400_v19 = vpop.permute.xlu0 %399  ;;  %v424_v16 = vmul.f32 0.0, %v1976_v60 }
  0x90   : > { %345 = vst [vmem:[#allocation1 + $0x20] ss:$2 sm:$0xff] %v335_v17  ;;  %v411_v0 = vsel %vm407_vm2, %v1953_v48, %v400_v19 }
  0x91   : > { %v1989_v20 = vpop.permute.xlu2 %1092  ;;  %v1991_v21 = vpop.permute.xlu1 %401  ;;  %347 = vst [vmem:[#allocation1 + $0x30] ss:$2 sm:$0xff] %v336_v18 }
  0x92   : > { %v412_v1 = vsel %vm407_vm2, %v400_v19, %v1991_v21 }
  0x95   : > { %v348_v22 = vld.sshfl [vmem:[#allocation1] sm:$0xff pattern:$0x75316420]  ;;  %v349_v23 = vld.sshfl [vmem:[#allocation1 + $0x8] sm:$0xff pattern:$0x75316420] }
  0x96   : > { %364 = vst [vmem:[#allocation2 + $0x8] sm:$0xf] %v348_v22  ;;  %v351_v24 = vld.sshfl [vmem:[#allocation1 + $0x18] sm:$0xff pattern:$0x75316420]  ;;  %v413_v22 = vsel %vm407_vm2, %v1991_v21, %v1963_v52 }
  0x97   : > { %365 = vst [vmem:[#allocation2 + $0x10] sm:$0xf] %v349_v23  ;;  %v352_v25 = vld.sshfl [vmem:[#allocation1 + $0x20] sm:$0xff pattern:$0x75316420]  ;;  %v1993_v27 = vpop.permute.xlu0 %405 }
  0x98   : > { %367 = vst [vmem:[#allocation2 + $0x20] sm:$0xf] %v351_v24  ;;  %v353_v28 = vld.sshfl [vmem:[#allocation1 + $0x28] sm:$0xff pattern:$0x75316420]  ;;  %v414_v23 = vsel %vm407_vm2, %v1963_v52, %v1993_v27  ;;  %v677_v52 = vperm.slane %v1930_v39, 7 }
  0x99   : > { %v1995_v29 = vpop.permute.xlu2 %1090  ;;  %v570_v30 = vpop.permute.xlu1 %569  ;;  %368 = vst [vmem:[#allocation2 + $0x28] sm:$0xf] %v352_v25  ;;  %v354_v31 = vld.sshfl [vmem:[#allocation1 + $0x30] sm:$0xff pattern:$0x75316420] }
  0x9a   : > { %v584_v32 = vsel %vm581_vm1, %v570_v30, %v1985_v8  ;;  %369 = vst [vmem:[#allocation2 + $0x30] sm:$0xf] %v353_v28  ;;  %v355_v33 = vld.sshfl [vmem:[#allocation1 + $0x38] sm:$0xff pattern:$0x75316420]  ;;  %v676_v28 = vperm.slane %v1930_v39, 6 }
  0x9b   : > { %370 = vst [vmem:[#allocation2 + $0x38] sm:$0xf] %v354_v31  ;;  %v350_v34 = vld.sshfl [vmem:[#allocation1 + $0x10] sm:$0xff pattern:$0x75316420] }
  0x9c   : > { %371 = vst [vmem:[#allocation2 + $0x40] sm:$0xf] %v355_v33 }
  0x9d   : > { %v1999_v35 = vld [vmem:[#allocation2 + $0x8] sm:$0xff]  ;;  %366 = vst [vmem:[#allocation2 + $0x18] sm:$0xf] %v350_v34 }
  0x9e   : > { %v1626_v36 = vpack.i.bf16 %v1999_v35, %v1800_v43  ;;  %v2016_v43 = vld [vmem:[#allocation2 + $0x10] sm:$0xff]  ;;  %v425_v17 = vmul.f32 %v408_v12, %v1999_v35 }
  0x9f   : > { %v2003_v37 = vld [vmem:[#allocation2 + $0x20] sm:$0xff]  ;;  %v568_v38 = vpop.permute.xlu0 %567  ;;  %v426_v61 = vmul.f32 %v409_v53, %v2016_v43 }
  0xa0   : > { %v2005_v40 = vld [vmem:[#allocation2 + $0x28] sm:$0xff]  ;;  %v582_v41 = vsel %vm581_vm1, %v1974_v59, %v568_v38  ;;  %v583_v42 = vsel %vm581_vm1, %v568_v38, %v570_v30  ;;  %1627 = vrot.lane.b32.xlu0 %v1626_v36, %s1803_s9  ;;  %v428_v48 = vmul.f32 %v411_v0, %v2003_v37  ;;  %v1646_v19 = vpack.i.bf16 %v425_v17, %v424_v16 }
  0xa1   : > { %v2010_v45 = vpop.permute.xlu1 %575  ;;  %v2019_v47 = vmul.f32 %v582_v41, %v1999_v35  ;;  %v2021_v49 = vpop.permute.xlu2 %922  ;;  %v1636_v50 = vpack.i.bf16 %v2005_v40, %v2003_v37  ;;  %v2031_v54 = vld [vmem:[#allocation2 + $0x30] sm:$0xff]  ;;  %v2036_v56 = vmul.f32 %v583_v42, %v2016_v43  ;;  %v429_v6 = vmul.f32 %v412_v1, %v2005_v40 }
  0xa2   : > { %v2033_v55 = vld [vmem:[#allocation2 + $0x38] sm:$0xff]  ;;  %v430_v26 = vmul.f32 %v413_v22, %v2031_v54  ;;  %v564_v36 = vperm.slane %v1872_v11, 7  ;;  %v1106_v42 = vsel %vm291_vm0, %v1995_v29, %v1989_v20  ;;  %v1691_v1 = vpack.i.bf16 %v2016_v43, %v1999_v35 }
  0xa3   : > { %1637 = vrot.lane.b32.xlu2 %v1636_v50, %s1803_s9  ;;  %v1641_v62 = vpack.i.bf16 %v2033_v55, %v2031_v54  ;;  %v1761_v63 = vpack.i.bf16 %v2019_v47, %v2014_v46  ;;  %v2077_v13 = vld [vmem:[#allocation2 + $0x40] sm:$0xff]  ;;  %v431_v21 = vmul.f32 %v414_v23, %v2033_v55  ;;  %v675_v50 = vperm.slane %v1930_v39, 5 }
  0xa4   : > { %v2038_v57 = vld [vmem:[#allocation2 + $0x18] sm:$0xff]  ;;  %v432_v18 = vmul.f32 %v1993_v27, %v2077_v13  ;;  %v1123_v53 = vmul.f32 %v1106_v42, %v2016_v43 }
  0xa5   : > { %v2042_v58 = vmul.f32 %v584_v32, %v2038_v57  ;;  %v1631_v59 = vpack.i.bf16 %v2038_v57, %v2016_v43  ;;  %v427_v44 = vmul.f32 %v2038_v57, %v410_v51  ;;  %v1661_v27 = vpack.i.bf16 %v431_v21, %v430_v26 }
  0xa6   : > { %v1122_v51 = vmul.f32 %v1995_v29, %v1999_v35 }
  0xa7   : > { %1632 = vrot.lane.b32.xlu1 %v1631_v59, %s1803_s9  ;;  %v2057_v2 = vpop.permute.xlu0 %573  ;;  %v1741_v3 = vpack.i.bf16 %v2042_v58, %v2036_v56  ;;  %v1651_v7 = vpack.i.bf16 %v427_v44, %v426_v61 }
  0xa8   : > { %v2064_v4 = vsel %vm581_vm1, %v1985_v8, %v2057_v2  ;;  %1642 = vrot.lane.b32.xlu0 %v1641_v62, %s1803_s9  ;;  %v1656_v8 = vpack.i.bf16 %v429_v6, %v428_v48  ;;  %v1676_v62 = vpack.i.bf16 %v1123_v53, %v1122_v51 }
  0xa9   : > { %v2066_v5 = vpop.permute.xlu1 %1096  ;;  %v2071_v10 = vpop.permute.xlu2 %811 }
  0xab   : > { %1652 = vrot.lane.b32.xlu2 %v1651_v7, %s1797_s15 }
  0xaf   : > { %518 = vrot.lane.b32.xlu1 %v2077_v13, %s1803_s9  ;;  %v1095_v14 = vpop.permute.xlu0 %1094 }
  0xb0   : > { %1657 = vrot.lane.b32.xlu0 %v1656_v8, %s1797_s15  ;;  %v1107_v30 = vsel %vm291_vm0, %v1989_v20, %v1095_v14  ;;  %v1108_v31 = vsel %vm291_vm0, %v1095_v14, %v2066_v5  ;;  %v563_v20 = vperm.slane %v1872_v11, 6  ;;  %v1671_v11 = vpack.i.bf16 %v2003_v37, %v2038_v57 }
  0xb1   : > { %v921_v15 = vpop.permute.xlu1 %920  ;;  %v2094_v24 = vpop.permute.xlu2 %926  ;;  %v1124_v38 = vmul.f32 %v1107_v30, %v2038_v57  ;;  %v1125_v41 = vmul.f32 %v1108_v31, %v2003_v37 }
  0xb2   : > { %v935_v17 = vsel %vm634_vm3, %v921_v15, %v2021_v49 }
  0xb3   : > { %458 = vrot.lane.b32.xlu2 %v432_v18, %s1797_s15  ;;  %v1666_v59 = vpack.i.bf16 %v1125_v41, %v1124_v38 }
  0xb7   : > { %1647 = vrot.lane.b32.xlu1 %v1646_v19, %s1797_s15  ;;  %v2097_v60 = vpop.permute.xlu0 %1098 }
  0xb8   : > { %821 = vrot.lane.b32.xlu0 %v806_v9, %s1799_s21  ;;  %v1109_v7 = vsel %vm291_vm0, %v2066_v5, %v2097_v60 }
  0xb9   : > { %v2099_v25 = vpop.permute.xlu1 %809  ;;  %v2112_v33 = vpop.permute.xlu2 %1100  ;;  %v1126_v19 = vmul.f32 %v1109_v7, %v2005_v40 }
  0xbb   : > { %690 = vrot.lane.b32.xlu2 %v676_v28, %s1801_s26  ;;  %v952_v28 = vmul.f32 %v935_v17, %v2038_v57 }
  0xbf   : > { %1662 = vrot.lane.b32.xlu1 %v1661_v27, %s1797_s15  ;;  %v925_v32 = vpop.permute.xlu0 %924  ;;  %v824_v27 = vsel %vm747_vm4, %v2099_v25, %v2071_v10 }
  0xc0   : > { %692 = vrot.lane.b32.xlu0 %v677_v52, %s1801_s26  ;;  %v936_v12 = vsel %vm634_vm3, %v2021_v49, %v925_v32  ;;  %v937_v41 = vsel %vm634_vm3, %v925_v32, %v2094_v24 }
  0xc1   : > { %v919_v34 = vpop.permute.xlu1 %918  ;;  %v2128_v0 = vpop.permute.xlu2 %680  ;;  %v953_v5 = vmul.f32 %v936_v12, %v2003_v37 }
  0xc2   : > { %v934_v48 = vsel %vm634_vm3, %v919_v34, %v921_v15  ;;  %v950_v8 = vmul.f32 %v919_v34, %v1999_v35  ;;  %v841_v34 = vmul.f32 %v824_v27, %v2038_v57 }
  0xc3   : > { %579 = vrot.lane.b32.xlu2 %v564_v36, %s1796_s12  ;;  %v951_v14 = vmul.f32 %v934_v48, %v2016_v43  ;;  %v1686_v52 = vpack.i.bf16 %v953_v5, %v952_v28  ;;  %v1696_v36 = vpack.i.bf16 %v2033_v55, %v2005_v40 }
  0xc5   : > { %v1706_v23 = vpack.i.bf16 %v951_v14, %v950_v8 }
  0xc7   : > { %688 = vrot.lane.b32.xlu1 %v675_v50, %s1801_s26  ;;  %v814_v61 = vpop.permute.xlu0 %813 }
  0xc8   : > { %1667 = vrot.lane.b32.xlu0 %v1666_v59, %s1795_s30  ;;  %v825_v49 = vsel %vm747_vm4, %v2071_v10, %v814_v61 }
  0xc9   : > { %v816_v44 = vpop.permute.xlu1 %815  ;;  %v2138_v6 = vpop.permute.xlu2 %678  ;;  %v842_v31 = vmul.f32 %v825_v49, %v2003_v37 }
  0xca   : > { %v826_v51 = vsel %vm747_vm4, %v814_v61, %v816_v44  ;;  %v711_v28 = vmul.f32 0.0, %v2138_v6 }
  0xcb   : > { %1677 = vrot.lane.b32.xlu2 %v1676_v62, %s1795_s30  ;;  %v1701_v42 = vpack.i.bf16 %v842_v31, %v841_v34  ;;  %v954_v62 = vmul.f32 %v937_v41, %v2005_v40 }
  0xcf   : > { %577 = vrot.lane.b32.xlu1 %v563_v20, %s1796_s12  ;;  %v808_v39 = vpop.permute.xlu0 %807 }
  0xd0   : > { %v823_v50 = vsel %vm747_vm4, %v808_v39, %v2099_v25  ;;  %v839_v25 = vmul.f32 %v808_v39, %v1999_v35 }
  0xd1   : > { %v2133_v29 = vpop.permute.xlu1 %1104  ;;  %v931_v21 = vpop.permute.xlu2 %930 }
  0xd3   : > { %1692 = vrot.lane.b32.xlu2 %v1691_v1, %s1804_s10  ;;  %v840_v1 = vmul.f32 %v823_v50, %v2016_v43 }
  0xd5   : > { %v1716_v17 = vpack.i.bf16 %v840_v1, %v839_v25 }
  0xd7   : > { %1672 = vrot.lane.b32.xlu1 %v1671_v11, %s1804_s10  ;;  %v1103_v16 = vpop.permute.xlu0 %1102  ;;  %v843_v11 = vmul.f32 %v826_v51, %v2005_v40 }
  0xd8   : > { %v1111_v18 = vsel %vm291_vm0, %v2112_v33, %v1103_v16  ;;  %v1112_v8 = vsel %vm291_vm0, %v1103_v16, %v2133_v29 }
  0xd9   : > { %v685_v9 = vpop.permute.xlu1 %684  ;;  %v1128_v22 = vmul.f32 %v1111_v18, %v2033_v55  ;;  %v2177_v10 = vpop.permute.xlu2 %819 }
  0xdb   : > { %v1681_v26 = vpack.i.bf16 %v1128_v22, %v1126_v19  ;;  %1707 = vrot.lane.b32.xlu2 %v1706_v23, %s1796_s12  ;;  %v1129_v19 = vmul.f32 %v1112_v8, %v2077_v13 }
  0xdd   : > { %1682 = vrot.lane.b32.xlu0 %v1681_v26, %s1795_s30 }
  0xdf   : > { %1687 = vrot.lane.b32.xlu1 %v1686_v52, %s1796_s12  ;;  %v683_v15 = vpop.permute.xlu0 %682  ;;  %v2223_v52 = vld [vmem:[#allocation2 + $0x48] sm:$0xff] }
  0xe0   : > { %v696_v39 = vsel %vm694_vm5, %v2128_v0, %v683_v15  ;;  %v697_v18 = vsel %vm694_vm5, %v683_v15, %v685_v9  ;;  %v1130_v49 = vmul.f32 %v2133_v29, %v2223_v52 }
  0xe1   : > { %v929_v30 = vpop.permute.xlu1 %928  ;;  %v713_v5 = vmul.f32 %v696_v39, %v2016_v43  ;;  %v714_v22 = vmul.f32 %v697_v18, %v2038_v57 }
  0xe2   : > { %v939_v38 = vsel %vm634_vm3, %v929_v30, %v931_v21  ;;  %v938_v29 = vsel %vm634_vm3, %v2094_v24, %v929_v30 }
  0xe3   : > { %v956_v53 = vmul.f32 %v939_v38, %v2033_v55 }
  0xe5   : > { %1697 = vrot.lane.b32.xlu0 %v1696_v36, %s1804_s10  ;;  %v1711_v12 = vpack.i.bf16 %v956_v53, %v954_v62 }
  0xe7   : > { %1702 = vrot.lane.b32.xlu1 %v1701_v42, %s1801_s26  ;;  %v2182_v59 = vpop.permute.xlu0 %686 }
  0xe8   : > { %v2187_v32 = vsel %vm694_vm5, %v685_v9, %v2182_v59  ;;  %v1731_v9 = vpack.i.bf16 %v714_v22, %v713_v5 }
  0xe9   : > { %v818_v20 = vpop.permute.xlu1 %817 }
  0xea   : > { %v2192_v48 = vsel %vm747_vm4, %v816_v44, %v818_v20  ;;  %v828_v61 = vsel %vm747_vm4, %v818_v20, %v2177_v10  ;;  %v1110_v44 = vsel %vm291_vm0, %v2097_v60, %v2112_v33  ;;  %v1736_v60 = vpack.i.bf16 %v2031_v54, %v2077_v13 }
  0xeb   : > { %v845_v7 = vmul.f32 %v828_v61, %v2033_v55  ;;  %v1127_v16 = vmul.f32 %v1110_v44, %v2031_v54  ;;  %v695_v33 = vsel %vm694_vm5, %v2138_v6, %v2128_v0 }
  0xec   : > { %v712_v26 = vmul.f32 %v695_v33, %v1999_v35 }
  0xed   : > { %v1721_v14 = vpack.i.bf16 %v845_v7, %v843_v11  ;;  %1712 = vrot.lane.b32.xlu0 %v1711_v12, %s1796_s12  ;;  %v1726_v23 = vpack.i.bf16 %v1127_v16, %v1129_v19 }
  0xee   : > { %v1746_v27 = vpack.i.bf16 %v712_v26, %v711_v28 }
  0xef   : > { %1722 = vrot.lane.b32.xlu2 %v1721_v14, %s1801_s26  ;;  %1717 = vrot.lane.b32.xlu1 %v1716_v17, %s1801_s26  ;;  %v2227_v15 = vpop.permute.xlu0 %932 }
  0xf0   : > { %v940_v0 = vsel %vm634_vm3, %v931_v21, %v2227_v15  ;;  %v955_v21 = vmul.f32 %v938_v29, %v2031_v54 }
  0xf1   : > { %v957_v36 = vmul.f32 %v940_v0, %v2077_v13 }
  0xf3   : > { %v1756_v41 = vpack.i.bf16 %v955_v21, %v957_v36 }
  0xf5   : > { %1727 = vrot.lane.b32.xlu0 %v1726_v23, %s1795_s30 }
  0xf7   : > { %1737 = vrot.lane.b32.xlu2 %v1736_v60, %s1804_s10  ;;  %1732 = vrot.lane.b32.xlu1 %v1731_v9, %s1799_s21 }
  0xfd   : > { %1156 = vrot.lane.b32.xlu0 %v1130_v49, %s1795_s30  ;;  %v1638_v31 = vpop.permute.xlu2 %1637  ;;  %v844_v49 = vmul.f32 %v2192_v48, %v2031_v54 }
  0xfe   : > { %v1640_v6 = vunpack.i.h.bf16 %v1638_v31  ;;  %v1639_v34 = vunpack.i.l.bf16 %v1638_v31 }
  0xff   : > { %1747 = vrot.lane.b32.xlu2 %v1746_v27, %s1799_s21  ;;  %1742 = vrot.lane.b32.xlu1 %v1741_v3, %s1798_s18 }
 0x100   : > { %v2241_v38 = vsel %vm520_vm6, %v1639_v34, %v1640_v6 }
 0x105   : > { %v2244_v42 = vpop.permute.xlu2 %1652 }
 0x106   : > { %v1655_v39 = vunpack.i.h.bf16 %v2244_v42  ;;  %v1654_v33 = vunpack.i.l.bf16 %v2244_v42 }
 0x107   : > { %1044 = vrot.lane.b32.xlu2 %v2223_v52, %s1804_s10  ;;  %1757 = vrot.lane.b32.xlu1 %v1756_v41, %s1796_s12 }
 0x10d   : > { %v459_v56 = vpop.permute.xlu2 %458 }
 0x112   : > { %v1628_v58 = vpop.permute.xlu0 %1627 }
 0x113   : > { %v1630_v3 = vunpack.i.h.bf16 %v1628_v58  ;;  %v1629_v50 = vunpack.i.l.bf16 %v1628_v58 }
 0x115   : > { %v2250_v24 = vsel %vm520_vm6, %v1629_v50, %v1630_v3  ;;  %v691_v30 = vpop.permute.xlu2 %690 }
 0x119   : > { %v2252_v51 = vpop.permute.xlu1 %1632 }
 0x11a   : > { %v1635_v53 = vunpack.i.h.bf16 %v2252_v51  ;;  %v1634_v62 = vunpack.i.l.bf16 %v2252_v51  ;;  %v1643_v20 = vpop.permute.xlu0 %1642 }
 0x11b   : > { %v1645_v25 = vunpack.i.h.bf16 %v1643_v20  ;;  %v1644_v1 = vunpack.i.l.bf16 %v1643_v20 }
 0x11c   : > { %v2259_v61 = vsel %vm520_vm6, %v1630_v3, %v1634_v62  ;;  %v2264_v11 = vsel %vm520_vm6, %v1635_v53, %v1639_v34 }
 0x11d   : > { %v2267_v7 = vsel %vm520_vm6, %v1644_v1, %v1645_v25  ;;  %v2270_v12 = vsel %vm520_vm6, %v1640_v6, %v1644_v1  ;;  %v2272_v8 = vpop.permute.xlu2 %579 }
 0x121   : > { %v519_v14 = vpop.permute.xlu1 %518 }
 0x122   : > { %v2274_v17 = vpop.permute.xlu0 %1657  ;;  %v2277_v44 = vsel %vm520_vm6, %v1645_v25, %v519_v14 }
 0x123   : > { %v2593_v18 = vunpack.i.l.bf16 %v2274_v17  ;;  %v1660_v36 = vunpack.i.h.bf16 %v2274_v17 }
 0x125   : > { %v2286_v19 = vsel %vm291_vm0, %v1655_v39, %v2593_v18  ;;  %v1678_v16 = vpop.permute.xlu2 %1677 }
 0x126   : > { %v1680_v5 = vunpack.i.h.bf16 %v1678_v16  ;;  %v1679_v22 = vunpack.i.l.bf16 %v1678_v16 }
 0x128   : > { %v1158_v60 = vsel %vm407_vm2, %v1679_v22, %v1680_v5 }
 0x129   : > { %v2288_v23 = vpop.permute.xlu1 %1647  ;;  %1272 = vmatpush.msra.mxu0 %v1158_v60 }
 0x12a   : > { %v1650_v9 = vunpack.i.h.bf16 %v2288_v23  ;;  %v822_v28 = vpop.permute.xlu0 %821 }
 0x12b   : > { %v829_v26 = vsel %vm747_vm4, %v2177_v10, %v822_v28 }
 0x12c   : > { %v846_v27 = vmul.f32 %v829_v26, %v2077_v13  ;;  %v2303_v0 = vsel %vm291_vm0, %v1650_v9, %v1654_v33  ;;  %v715_v26 = vmul.f32 %v2187_v32, %v2003_v37 }
 0x12d   : > { %v1693_v31 = vpop.permute.xlu2 %1692 }
 0x12e   : > { %v1771_v6 = vpack.i.bf16 %v844_v49, %v846_v27  ;;  %v1695_v34 = vunpack.i.h.bf16 %v1693_v31  ;;  %v1694_v29 = vunpack.i.l.bf16 %v1693_v31 }
 0x130   : > { %1772 = vrot.lane.b32.xlu2 %v1771_v6, %s1801_s26  ;;  %v1047_v48 = vsel %vm1046_vm7, %v1694_v29, %v1695_v34 }
 0x131   : > { %v2306_v10 = vpop.permute.xlu1 %1662  ;;  %1273 = vmatpush.msra.mxu0 %v1047_v48 }
 0x132   : > { %v1665_v21 = vunpack.i.h.bf16 %v2306_v10  ;;  %v1664_v41 = vunpack.i.l.bf16 %v2306_v10  ;;  %v2312_v58 = vpop.permute.xlu0 %692 }
 0x133   : > { %v701_v25 = vsel %vm694_vm5, %v691_v30, %v2312_v58 }
 0x134   : > { %v2319_v3 = vsel %vm291_vm0, %v1660_v36, %v1664_v41  ;;  %v2324_v50 = vsel %vm291_vm0, %v1665_v21, %v459_v56  ;;  %v718_v16 = vmul.f32 %v701_v25, %v2033_v55 }
 0x135   : > { %v1708_v20 = vpop.permute.xlu2 %1707 }
 0x136   : > { %v1710_v1 = vunpack.i.h.bf16 %v1708_v20  ;;  %v1709_v14 = vunpack.i.l.bf16 %v1708_v20 }
 0x138   : > { %v986_v60 = vsel %vm581_vm1, %v1709_v14, %v1710_v1 }
 0x139   : > { %v689_v22 = vpop.permute.xlu1 %688  ;;  %1274 = vmatpush.msra.mxu0 %v986_v60 }
 0x13a   : > { %v699_v49 = vsel %vm694_vm5, %v2182_v59, %v689_v22  ;;  %v700_v56 = vsel %vm694_vm5, %v689_v22, %v691_v30  ;;  %v1668_v27 = vpop.permute.xlu0 %1667  ;;  %v602_v30 = vmul.f32 %v2064_v4, %v2003_v37 }
 0x13b   : > { %v716_v31 = vmul.f32 %v699_v49, %v2005_v40  ;;  %v717_v6 = vmul.f32 %v700_v56, %v2031_v54  ;;  %v1670_v29 = vunpack.i.h.bf16 %v1668_v27  ;;  %v1669_v48 = vunpack.i.l.bf16 %v1668_v27 }
 0x13c   : > { %v958_v27 = vmul.f32 %v2223_v52, %v2227_v15 }
 0x13d   : > { %v1751_v20 = vpack.i.bf16 %v717_v6, %v715_v26  ;;  %v1776_v25 = vpack.i.bf16 %v716_v31, %v718_v16  ;;  %v1159_v14 = vsel %vm407_vm2, %v1680_v5, %v1669_v48  ;;  %v1160_v18 = vsel %vm407_vm2, %v1669_v48, %v1670_v29 }
 0x13e   : > { %1292 = vmatpush.msra.mxu1 %v1159_v14  ;;  %1312 = vmatpush.msra.mxu2 %v1160_v18  ;;  %v606_v5 = vmul.f32 %v2272_v8, %v2077_v13 }
 0x13f   : > { %1752 = vrot.lane.b32.xlu0 %v1751_v20, %s1799_s21  ;;  %1777 = vrot.lane.b32.xlu2 %v1776_v25, %s1799_s21  ;;  %v719_v25 = vmul.f32 %v2312_v58, %v2077_v13 }
 0x141   : > { %v578_v59 = vpop.permute.xlu1 %577 }
 0x142   : > { %v587_v32 = vsel %vm581_vm1, %v2010_v45, %v578_v59  ;;  %v588_v46 = vsel %vm581_vm1, %v578_v59, %v2272_v8 }
 0x143   : > { %v604_v22 = vmul.f32 %v587_v32, %v2031_v54  ;;  %v847_v54 = vmul.f32 %v2223_v52, %v822_v28  ;;  %v605_v52 = vmul.f32 %v588_v46, %v2033_v55 }
 0x145   : > { %v1766_v16 = vpack.i.bf16 %v604_v22, %v602_v30 }
 0x147   : > { %1762 = vrot.lane.b32.xlu0 %v1761_v63, %s1798_s18  ;;  %632 = vrot.lane.b32.xlu2 %v606_v5, %s1798_s18  ;;  %v586_v63 = vsel %vm581_vm1, %v2057_v2, %v2010_v45 }
 0x148   : > { %1767 = vrot.lane.b32.xlu1 %v1766_v16, %s1798_s18  ;;  %v603_v48 = vmul.f32 %v586_v63, %v2005_v40 }
 0x149   : > { %v2354_v18 = vpop.permute.xlu2 %1722  ;;  %v1673_v60 = vpop.permute.xlu1 %1672 }
 0x14a   : > { %v1675_v26 = vunpack.i.h.bf16 %v1673_v60  ;;  %v1674_v4 = vunpack.i.l.bf16 %v1673_v60  ;;  %v1781_v20 = vpack.i.bf16 %v603_v48, %v605_v52 }
 0x14c   : > { %v1048_v49 = vsel %vm1046_vm7, %v1695_v34, %v1674_v4  ;;  %v1049_v56 = vsel %vm1046_vm7, %v1674_v4, %v1675_v26 }
 0x14d   : > { %1293 = vmatpush.msra.mxu1 %v1048_v49  ;;  %1313 = vmatpush.msra.mxu2 %v1049_v56 }
 0x14f   : > { %984 = vrot.lane.b32.xlu0 %v958_v27, %s1796_s12  ;;  %v2364_v47 = vpop.permute.xlu0 %1682 }
 0x150   : > { %873 = vrot.lane.b32.xlu1 %v847_v54, %s1801_s26  ;;  %v1684_v28 = vunpack.i.l.bf16 %v2364_v47  ;;  %v1255_v54 = vld [vmem:[%s2589_s4] sm:$0xf] }
 0x151   : > { %v2371_v34 = vpop.permute.xlu2 %1737  ;;  %v1688_v15 = vpop.permute.xlu1 %1687 }
 0x152   : > { %v1690_v31 = vunpack.i.h.bf16 %v1688_v15  ;;  %v1689_v6 = vunpack.i.l.bf16 %v1688_v15  ;;  %v1161_v8 = vsel %vm407_vm2, %v1670_v29, %v1684_v28  ;;  %v1739_v49 = vunpack.i.l.bf16 %v2371_v34 }
 0x153   : > { %1332 = vmatpush.msra.mxu3 %v1161_v8  ;;  %v1724_v8 = vunpack.i.l.bf16 %v2354_v18 }
 0x154   : > { %v987_v45 = vsel %vm581_vm1, %v1710_v1, %v1689_v6  ;;  %v988_v2 = vsel %vm581_vm1, %v1689_v6, %v1690_v31  ;;  %v1740_v1 = vunpack.i.h.bf16 %v2371_v34 }
 0x155   : > { %1294 = vmatpush.msra.mxu1 %v987_v45  ;;  %1314 = vmatpush.msra.mxu2 %v988_v2 }
 0x157   : > { %1782 = vrot.lane.b32.xlu0 %v1781_v20, %s1798_s18  ;;  %v2383_v14 = vpop.permute.xlu0 %1697 }
 0x158   : > { %745 = vrot.lane.b32.xlu1 %v719_v25, %s1799_s21  ;;  %v1700_v29 = vunpack.i.h.bf16 %v2383_v14  ;;  %v1699_v59 = vunpack.i.l.bf16 %v2383_v14 }
 0x159   : > { %v1748_v32 = vpop.permute.xlu2 %1747  ;;  %v1703_v30 = vpop.permute.xlu1 %1702 }
 0x15a   : > { %v1705_v22 = vunpack.i.h.bf16 %v1703_v30  ;;  %v1704_v5 = vunpack.i.l.bf16 %v1703_v30  ;;  %v1050_v16 = vsel %vm1046_vm7, %v1675_v26, %v1699_v59  ;;  %v2391_v58 = vsel %vm1046_vm7, %v1699_v59, %v1740_v1 }
 0x15b   : > { %1333 = vmatpush.msra.mxu3 %v1050_v16  ;;  %v2396_v60 = vsel %vm1046_vm7, %v1740_v1, %v1700_v29  ;;  %v1750_v48 = vunpack.i.h.bf16 %v1748_v32  ;;  %v1749_v45 = vunpack.i.l.bf16 %v1748_v32  ;;  %v1685_v59 = vunpack.i.h.bf16 %v2364_v47 }
 0x15c   : > { %v877_v4 = vsel %vm694_vm5, %v1704_v5, %v1705_v22  ;;  %v878_v2 = vsel %vm694_vm5, %v1705_v22, %v1724_v8  ;;  %v1053_v42 = vsel %vm1046_vm7, %v1700_v29, %v1739_v49 }
 0x15d   : > { %1315 = vmatpush.msra.mxu2 %v877_v4  ;;  %v748_v20 = vsel %vm747_vm4, %v1749_v45, %v1750_v48 }
 0x15f   : > { %1258 = vperm.xlu0 %1625, %v1255_v54   ;;  %1316 = vmatpush.msra.mxu2 %v2038_v57  ;;  %v1713_v26 = vpop.permute.xlu0 %1712 }
 0x160   : > { %v1714_v56 = vunpack.i.l.bf16 %v1713_v26 }
 0x161   : > { %v1045_v27 = vpop.permute.xlu2 %1044  ;;  %v1718_v46 = vpop.permute.xlu1 %1717 }
 0x162   : > { %v2405_v63 = vsel %vm1046_vm7, %v1739_v49, %v1045_v27  ;;  %v1720_v52 = vunpack.i.h.bf16 %v1718_v46  ;;  %v1719_v15 = vunpack.i.l.bf16 %v1718_v46  ;;  %v989_v6 = vsel %vm581_vm1, %v1690_v31, %v1714_v56  ;;  %v2442_v27 = vld [vmem:[%s2588_s3] sm:$0xf] }
 0x163   : > { %1334 = vmatpush.msra.mxu3 %v989_v6  ;;  %v462_v46 = vsel %vm291_vm0, %v1654_v33, %v1655_v39 }
 0x164   : > { %v875_v34 = vsel %vm694_vm5, %v1719_v15, %v1720_v52  ;;  %v876_v57 = vsel %vm694_vm5, %v1720_v52, %v1704_v5  ;;  %v1715_v15 = vunpack.i.h.bf16 %v1713_v26 }
 0x165   : > { %1275 = vmatpush.msra.mxu0 %v875_v34  ;;  %1295 = vmatpush.msra.mxu1 %v876_v57 }
 0x166   : > { %1335 = vmatpush.msra.mxu3 %v878_v2 }
 0x167   : > { %1276 = vmatpush.msra.mxu0 %v1999_v35  ;;  %1296 = vmatpush.msra.mxu1 %v2016_v43  ;;  %v2416_v31 = vpop.permute.xlu0 %1727 }
 0x168   : > { %v1730_v25 = vunpack.i.h.bf16 %v2416_v31  ;;  %1336 = vmatpush.msra.mxu3 %v2003_v37  ;;  %v1729_v47 = vunpack.i.l.bf16 %v2416_v31 }
 0x169   : > { %v1733_v32 = vpop.permute.xlu1 %1732  ;;  %1277 = vmatpush.msra.mxu0 %v748_v20 }
 0x16a   : > { %v1735_v1 = vunpack.i.h.bf16 %v1733_v32  ;;  %v1734_v30 = vunpack.i.l.bf16 %v1733_v32  ;;  %v2425_v35 = vsel %vm407_vm2, %v1684_v28, %v1730_v25  ;;  %v2428_v43 = vsel %vm407_vm2, %v1730_v25, %v1685_v59 }
 0x16b   : > { %v523_v28 = vsel %vm520_vm6, %v1634_v62, %v1635_v53  ;;  %v1164_v62 = vsel %vm407_vm2, %v1685_v59, %v1729_v47 }
 0x16c   : > { %v749_v22 = vsel %vm747_vm4, %v1750_v48, %v1734_v30  ;;  %v750_v5 = vsel %vm747_vm4, %v1734_v30, %v1735_v1  ;;  %v1725_v48 = vunpack.i.h.bf16 %v2354_v18 }
 0x16d   : > { %1297 = vmatpush.msra.mxu1 %v749_v22  ;;  %1317 = vmatpush.msra.mxu2 %v750_v5  ;;  %v1649_v5 = vunpack.i.l.bf16 %v2288_v23 }
 0x16f   : > { %v1157_v14 = vpop.permute.xlu0 %1156 }
 0x171   : > { %v1743_v37 = vpop.permute.xlu1 %1742 }
 0x172   : > { %v1745_v16 = vunpack.i.h.bf16 %v1743_v37  ;;  %v1744_v4 = vunpack.i.l.bf16 %v1743_v37 }
 0x174   : > { %v637_v54 = vsel %vm634_vm3, %v1744_v4, %v1745_v16 }
 0x175   : > { %1318 = vmatpush.msra.mxu2 %v637_v54 }
 0x177   : > { %1319 = vmatpush.msra.mxu2 %v523_v28  ;;  %v460_v28 = vsel %vm291_vm0, %v1649_v5, %v1650_v9 }
 0x179   : > { %v2449_v52 = vpop.permute.xlu1 %1757  ;;  %1320 = vmatpush.msra.mxu2 %v462_v46 }
 0x17a   : > { %v1760_v51 = vunpack.i.h.bf16 %v2449_v52  ;;  %v1759_v53 = vunpack.i.l.bf16 %v2449_v52  ;;  %1596 = vmatmul.msk.f32.vlgmr.msra.gmra.mxu2 %vm1261_vm8, %v2442_v27 }
 0x17b   : > { %1392 = vmatpush.msrb.mxu2 %v1164_v62 }
 0x17c   : > { %v992_v39 = vsel %vm581_vm1, %v1715_v15, %v1759_v53  ;;  %v990_v33 = vsel %vm581_vm1, %v1714_v56, %v1760_v51  ;;  %v991_v26 = vsel %vm581_vm1, %v1760_v51, %v1715_v15 }
 0x17d   : > { %1393 = vmatpush.msrb.mxu2 %v1053_v42 }
 0x17f   : > { %1394 = vmatpush.msrb.mxu2 %v992_v39 }
 0x18a   : > { %v1773_v6 = vpop.permute.xlu2 %1772 }
 0x18b   : > { %v1774_v45 = vunpack.i.l.bf16 %v1773_v6 }
 0x18d   : > { %v881_v34 = vsel %vm694_vm5, %v1725_v48, %v1774_v45 }
 0x18e   : > { %1395 = vmatpush.msrb.mxu2 %v881_v34 }
 0x190   : > { %1396 = vmatpush.msrb.mxu2 %v2033_v55 }
 0x199   : > { %v2467_v57 = vpop.permute.xlu2 %1777 }
 0x19a   : > { %v1779_v49 = vunpack.i.l.bf16 %v2467_v57 }
 0x1b1   : > { %v2469_v29 = vpop.permute.xlu0 %1752 }
 0x1b2   : > { %v1755_v56 = vunpack.i.h.bf16 %v2469_v29  ;;  %v1754_v2 = vunpack.i.l.bf16 %v2469_v29 }
 0x1b4   : > { %v751_v20 = vsel %vm747_vm4, %v1735_v1, %v1754_v2  ;;  %v754_v25 = vsel %vm747_vm4, %v1755_v56, %v1779_v49 }
 0x1b5   : > { %1337 = vmatpush.msra.mxu3 %v751_v20  ;;  %1397 = vmatpush.msrb.mxu2 %v754_v25 }
 0x1b9   : > { %v1763_v55 = vpop.permute.xlu0 %1762 }
 0x1ba   : > { %v1765_v59 = vunpack.i.h.bf16 %v1763_v55  ;;  %v1764_v32 = vunpack.i.l.bf16 %v1763_v55  ;;  %v1768_v30 = vpop.permute.xlu1 %1767 }
 0x1bb   : > { %v1769_v22 = vunpack.i.l.bf16 %v1768_v30  ;;  %v1770_v31 = vunpack.i.h.bf16 %v1768_v30 }
 0x1bc   : > { %v635_v37 = vsel %vm634_vm3, %v1764_v32, %v1765_v59  ;;  %v636_v54 = vsel %vm634_vm3, %v1765_v59, %v1744_v4 }
 0x1bd   : > { %1278 = vmatpush.msra.mxu0 %v635_v37  ;;  %1298 = vmatpush.msra.mxu1 %v636_v54  ;;  %v638_v1 = vsel %vm634_vm3, %v1745_v16, %v1769_v22 }
 0x1be   : > { %1338 = vmatpush.msra.mxu3 %v638_v1 }
 0x1bf   : > { %1279 = vmatpush.msra.mxu0 %v2250_v24  ;;  %1299 = vmatpush.msra.mxu1 %v2259_v61  ;;  %v1165_v24 = vsel %vm407_vm2, %v1729_v47, %v1157_v14  ;;  %v1775_v61 = vunpack.i.h.bf16 %v1773_v6  ;;  %v633_v47 = vpop.permute.xlu2 %632 }
 0x1c0   : > { %1339 = vmatpush.msra.mxu3 %v2264_v11 }
 0x1c1   : > { %v985_v46 = vpop.permute.xlu0 %984  ;;  %1280 = vmatpush.msra.mxu0 %v460_v28  ;;  %1300 = vmatpush.msra.mxu1 %v2303_v0  ;;  %v879_v23 = vsel %vm694_vm5, %v1724_v8, %v1775_v61  ;;  %v880_v9 = vsel %vm694_vm5, %v1775_v61, %v1725_v48 }
 0x1c2   : > { %v874_v4 = vpop.permute.xlu1 %873  ;;  %1340 = vmatpush.msra.mxu3 %v2286_v19  ;;  %1594 = vmatmul.msk.f32.vlgmr.msra.gmra.mxu0 %vm1261_vm8, %v2442_v27  ;;  %v993_v11 = vsel %vm581_vm1, %v1759_v53, %v985_v46  ;;  %v1780_v19 = vunpack.i.h.bf16 %v2467_v57 }
 0x1c3   : > { %1595 = vmatmul.msk.f32.vlgmr.msra.gmra.mxu1 %vm1261_vm8, %v2442_v27  ;;  %1597 = vmatmul.msk.f32.vlgmr.msra.gmra.mxu3 %vm1261_vm8, %v2442_v27 }
 0x1c4   : > { %1352 = vmatpush.msrb.mxu0 %v2425_v35  ;;  %1372 = vmatpush.msrb.mxu1 %v2428_v43  ;;  %v777_v43 = vld [vmem:[#allocation2 + $0x30] sm:$0xff]  ;;  %v752_v18 = vsel %vm747_vm4, %v1754_v2, %v1780_v19  ;;  %v753_v52 = vsel %vm747_vm4, %v1780_v19, %v1755_v56 }
 0x1c5   : > { %1412 = vmatpush.msrb.mxu3 %v1165_v24 }
 0x1c6   : > { %1353 = vmatpush.msrb.mxu0 %v2391_v58  ;;  %1373 = vmatpush.msrb.mxu1 %v2396_v60  ;;  %v882_v58 = vsel %vm694_vm5, %v1774_v45, %v874_v4 }
 0x1c7   : > { %1413 = vmatpush.msrb.mxu3 %v2405_v63 }
 0x1c8   : > { %1354 = vmatpush.msrb.mxu0 %v990_v33  ;;  %1374 = vmatpush.msrb.mxu1 %v991_v26 }
 0x1c9   : > { %1414 = vmatpush.msrb.mxu3 %v993_v11  ;;  %v1783_v0 = vpop.permute.xlu0 %1782 }
 0x1ca   : > { %1355 = vmatpush.msrb.mxu0 %v879_v23  ;;  %1375 = vmatpush.msrb.mxu1 %v880_v9  ;;  %v1785_v60 = vunpack.i.h.bf16 %v1783_v0  ;;  %v1784_v63 = vunpack.i.l.bf16 %v1783_v0  ;;  %v746_v35 = vpop.permute.xlu1 %745 }
 0x1cb   : > { %1415 = vmatpush.msrb.mxu3 %v882_v58  ;;  %v755_v8 = vsel %vm747_vm4, %v1779_v49, %v746_v35 }
 0x1cc   : > { %1356 = vmatpush.msrb.mxu0 %v2005_v40  ;;  %1376 = vmatpush.msrb.mxu1 %v777_v43  ;;  %v641_v16 = vsel %vm634_vm3, %v1770_v31, %v1784_v63  ;;  %v639_v15 = vsel %vm634_vm3, %v1769_v22, %v1785_v60  ;;  %v640_v51 = vsel %vm634_vm3, %v1785_v60, %v1770_v31 }
 0x1cd   : > { %1416 = vmatpush.msrb.mxu3 %v2077_v13  ;;  %1398 = vmatpush.msrb.mxu2 %v641_v16  ;;  %v642_v40 = vsel %vm634_vm3, %v1784_v63, %v633_v47  ;;  %v466_v13 = vsel %vm291_vm0, %v1664_v41, %v1665_v21 }
 0x1ce   : > { %1357 = vmatpush.msrb.mxu0 %v752_v18  ;;  %1377 = vmatpush.msrb.mxu1 %v753_v52 }
 0x1cf   : > { %1417 = vmatpush.msrb.mxu3 %v755_v8  ;;  %1399 = vmatpush.msrb.mxu2 %v2267_v7  ;;  %v2594_v7 = vunpack.i.l.bf16 %v2274_v17 }
 0x1d0   : > { %1358 = vmatpush.msrb.mxu0 %v639_v15  ;;  %1378 = vmatpush.msrb.mxu1 %v640_v51 }
 0x1d1   : > { %1418 = vmatpush.msrb.mxu3 %v642_v40  ;;  %1400 = vmatpush.msrb.mxu2 %v466_v13  ;;  %v464_v53 = vsel %vm291_vm0, %v2594_v7, %v1660_v36 }
 0x1d2   : > { %1359 = vmatpush.msrb.mxu0 %v2241_v38  ;;  %1379 = vmatpush.msrb.mxu1 %v2270_v12  ;;  %v1259_v38 = vpop.permute.xlu0 %1258 }
 0x1d3   : > { %1419 = vmatpush.msrb.mxu3 %v2277_v44  ;;  %1600 = vmatmul.msk.f32.vlgmr.msrb.gmra.mxu2 %vm1261_vm8, %v2442_v27 }
 0x1d4   : > { %1360 = vmatpush.msrb.mxu0 %v464_v53  ;;  %1380 = vmatpush.msrb.mxu1 %v2319_v3 }
 0x1d5   : > { %1420 = vmatpush.msrb.mxu3 %v2324_v50  ;;  %1598 = vmatmul.msk.f32.vlgmr.msrb.gmra.mxu0 %vm1261_vm8, %v2442_v27 }
 0x1d6   : > { %1599 = vmatmul.msk.f32.vlgmr.msrb.gmra.mxu1 %vm1261_vm8, %v2442_v27  ;;  %1601 = vmatmul.msk.f32.vlgmr.msrb.gmra.mxu3 %vm1261_vm8, %v2442_v27 }
 0x1fd   : > { %v1322_v41 = vpop.f32.mrf.mxu2 }
 0x1fe   : > { %v1323_v27 = vadd.f32 %v1322_v41, %v1259_v38 }
 0x200   : > { %v1469_v14 = vmul.f32 %v1323_v27, %v1323_v27  ;;  %v1453_v49 = vsel %vm1437_vm9, %v1323_v27, 0.0 }
 0x202   : > { %v1478_v25 = vsel %vm1437_vm9, %v1469_v14, 0.0 }
 0x23f   : > { %v1282_v12 = vpop.f32.mrf.mxu0 }
 0x240   : > { %v1302_v17 = vpop.f32.mrf.mxu1  ;;  %v1283_v10 = vadd.f32 %v1282_v12, %v1259_v38 }
 0x241   : > { %v1303_v44 = vadd.f32 %v1302_v17, %v1259_v38 }
 0x242   : > { %v1467_v62 = vmul.f32 %v1283_v10, %v1283_v10  ;;  %v1450_v33 = vsel %vm1437_vm9, %v1283_v10, 0.0 }
 0x243   : > { %v1433_v36 = vrot.slane %v1303_v44, 4  ;;  %v1468_v42 = vmul.f32 %v1303_v44, %v1303_v44  ;;  %v1451_v26 = vsel %vm1437_vm9, %v1303_v44, 0.0 }
 0x244   : > { %v1475_v48 = vsel %vm1437_vm9, %v1467_v62, 0.0  ;;  %v1452_v34 = vadd.f32 %v1451_v26, %v1450_v33 }
 0x245   : > { %v1438_v21 = vsel %vm1437_vm9, %v1283_v10, %v1433_v36  ;;  %v1476_v45 = vsel %vm1437_vm9, %v1468_v42, 0.0 }
 0x246   : > { %1446 = vst [vmem:[%s2551_s16] sm:$0xff] %v1438_v21  ;;  %v1342_v3 = vpop.f32.mrf.mxu3  ;;  %v1477_v29 = vadd.f32 %v1476_v45, %v1475_v48  ;;  %v1454_v2 = vadd.f32 %v1453_v49, %v1452_v34 }
 0x247   : > { %v1343_v50 = vadd.f32 %v1342_v3, %v1259_v38 }
 0x248   : > { %v1479_v22 = vadd.f32 %v1478_v25, %v1477_v29 }
 0x249   : > { %v1434_v39 = vrot.slane %v1343_v50, 4  ;;  %v1470_v57 = vmul.f32 %v1343_v50, %v1343_v50  ;;  %v1455_v56 = vsel %vm1437_vm9, %v1343_v50, 0.0 }
 0x24a   : > { %v1456_v30 = vadd.f32 %v1455_v56, %v1454_v2 }
 0x24b   : > { %v1439_v6 = vsel %vm1437_vm9, %v1323_v27, %v1434_v39  ;;  %v1480_v55 = vsel %vm1437_vm9, %v1470_v57, 0.0 }
 0x24c   : > { %1447 = vst [vmem:[%s2551_s16 + $0x8] sm:$0xff] %v1439_v6  ;;  %v1481_v1 = vadd.f32 %v1480_v55, %v1479_v22 }
 0x252   : > { %v1362_v20 = vpop.f32.mrf.mxu0 }
 0x253   : > { %v1363_v59 = vadd.f32 %v1362_v20, %v1259_v38  ;;  %v1382_v32 = vpop.f32.mrf.mxu1 }
 0x254   : > { %v1383_v5 = vadd.f32 %v1382_v32, %v1259_v38 }
 0x255   : > { %v1457_v37 = vsel %vm1437_vm9, %v1363_v59, 0.0  ;;  %v1471_v54 = vmul.f32 %v1363_v59, %v1363_v59 }
 0x256   : > { %v1458_v28 = vadd.f32 %v1457_v37, %v1456_v30  ;;  %v1435_v46 = vrot.slane %v1383_v5, 4  ;;  %v1472_v4 = vmul.f32 %v1383_v5, %v1383_v5  ;;  %v1402_v24 = vpop.f32.mrf.mxu2  ;;  %v1459_v11 = vsel %vm1437_vm9, %v1383_v5, 0.0 }
 0x257   : > { %v1482_v61 = vsel %vm1437_vm9, %v1471_v54, 0.0  ;;  %v1403_v19 = vadd.f32 %v1402_v24, %v1259_v38 }
 0x258   : > { %v1440_v23 = vsel %vm1437_vm9, %v1363_v59, %v1435_v46  ;;  %v1460_v9 = vadd.f32 %v1459_v11, %v1458_v28  ;;  %v1483_v0 = vadd.f32 %v1482_v61, %v1481_v1  ;;  %v1484_v63 = vsel %vm1437_vm9, %v1472_v4, 0.0 }
 0x259   : > { %1448 = vst [vmem:[%s2551_s16 + $0x10] sm:$0xff] %v1440_v23  ;;  %v1473_v31 = vmul.f32 %v1403_v19, %v1403_v19  ;;  %v1422_v58 = vpop.f32.mrf.mxu3  ;;  %v1461_v60 = vsel %vm1437_vm9, %v1403_v19, 0.0 }
 0x25a   : > { %v1423_v35 = vadd.f32 %v1422_v58, %v1259_v38  ;;  %v1462_v43 = vadd.f32 %v1461_v60, %v1460_v9  ;;  %v1485_v18 = vadd.f32 %v1484_v63, %v1483_v0 }
 0x25b   : > { %v1486_v8 = vsel %vm1437_vm9, %v1473_v31, 0.0 }
 0x25c   : > { %v1436_v16 = vrot.slane %v1423_v35, 4  ;;  %v1463_v47 = vsel %vm1437_vm9, %v1423_v35, 0.0  ;;  %v1474_v52 = vmul.f32 %v1423_v35, %v1423_v35  ;;  %v1487_v15 = vadd.f32 %v1486_v8, %v1485_v18 }
 0x25d   : > { %v1464_v51 = vadd.f32 %v1463_v47, %v1462_v43 }
 0x25e   : > { %v1441_v40 = vsel %vm1437_vm9, %v1403_v19, %v1436_v16  ;;  %v1488_v13 = vsel %vm1437_vm9, %v1474_v52, 0.0 }
 0x25f   : > { %1449 = vst [vmem:[%s2551_s16 + $0x18] sm:$0xff] %v1441_v40  ;;  %1465 = vadd.xlane.f32.xlu1 %v1464_v51  ;;  %v1489_v7 = vadd.f32 %v1488_v13, %v1487_v15 }
 0x261   : > { %1490 = vadd.xlane.f32.xlu2 %v1489_v7 }
 0x2d2   : > { %v1466_v53 = vpop.xlane.xlu1 %1465 }
 0x2d4   : > { %v1491_v38 = vpop.xlane.xlu2 %1490 }
 0x2d5   : > { %v1492_v12 = vsel %vm747_vm4, %v1466_v53, %v1491_v38 }
 0x2d6   : > { %1494 = vst.msk [vmem:[%s289_s20] sm:$0xf] %vm1493_vm10, %v1492_v12 }
 0x2d7 PF: > { %s18_s24 = sadd.s32 1, %s1792_s24  }
 0x2d8   : > { %p15_p4 = scmp.ge.s32.totalorder %s18_s24, 4  }
 0x2da   :  { %17 = sbr.rel (!%p15_p4) target bundleno = 1 (0x1), region = 90 }

</bundles_post_ra>
